<compile_context>
chip_gen: v5e
topology: v5e:2x2
jax: 0.10.0
libtpu: 0.0.40
codegen_flags: <defaults>
</compile_context>

<pallas_src>
import numpy as np
import jax
import jax.numpy as jnp
from jax.experimental import pallas as pl
from jax.experimental.pallas import tpu as pltpu  # noqa: F401  (TPU backend import)

# ----- small config (consistent with Actor's forward) -----
NUM_STOCKS = 2          # STOCK_DIM
TWEETS_EMB = 8          # text embedding dim
N_DAYS     = 3
MAX_TWEETS = 4          # == maxlen used by attn1 mask
H1 = 32                 # intraday hidden dim
H2 = 32                 # interday hidden dim
BATCH = 2

EMB_IDX    = 2 * NUM_STOCKS + 1
LEN_IDX    = EMB_IDX + NUM_STOCKS * N_DAYS * MAX_TWEETS * TWEETS_EMB
TARGET_IDX = LEN_IDX + NUM_STOCKS * N_DAYS
TIME_IDX   = TARGET_IDX + NUM_STOCKS
FEAT_DIMS  = TIME_IDX + NUM_STOCKS * N_DAYS * MAX_TWEETS

# fused / padded layout constants
G         = NUM_STOCKS * H1     # 64: fused (both stocks) hidden width
B_PAD     = 8                   # batch padded to one sublane group
R_ROWS    = N_DAYS * B_PAD      # 24: rows of the intraday recurrence (day-major, 8-aligned)
STOCK_PAD = 16                  # stock-feature columns padded (bf16 row-tile aligned)


# ----------------------------------------------------------------------------
# Single fused kernel: whole Actor.forward, both stocks fused block-diagonally.
#
# Data layouts (wrapper-prepared, all 8-sublane aligned):
#   stock : (B_PAD, STOCK_PAD)             rows 0:B valid
#   sent  : (T*R_ROWS, 2*E)                row = t*R + d*B_PAD + b, col = stock*E + e
#   time  : (T, R_ROWS, G)                 per-stock value broadcast over its 32 lanes
#   lens  : (R_ROWS, G)                    per-stock value broadcast over its 32 lanes
# Weight slabs (bf16): w_step (128,320), w_u (16,256), w_l2 (128,256),
#   w_sq (448,64) [a1W1,a1W2,a1V,a2W1,a2W2,a2V,Wx1], w_x2 (64,128), w_head (240,64).
# Bias slab (f32): (16,256), one bias per row, zero-padded.
# ----------------------------------------------------------------------------
def _actor_kernel(stock_ref, sent_ref, time_ref, lens_ref,
                  wstep_ref, wu_ref, wl2_ref, wsq_ref, wmx_ref, whead_ref, bias_ref,
                  out_ref):
    f32, bf16 = jnp.float32, jnp.bfloat16
    T, R, D, B = MAX_TWEETS, R_ROWS, N_DAYS, B_PAD

    def mm(a, b):
        # bf16 operands for the MXU, f32 accumulation.
        return jnp.dot(a.astype(bf16), b.astype(bf16), preferred_element_type=f32)

    def bias(row, width):
        return bias_ref[row:row + 1, 0:width]          # (1, width) f32

    def sq(k):                                         # k-th (G,G) block of the square slab
        return wsq_ref[G * k:G * (k + 1), :]

    # ---------------- hoisted TimeLSTM input projection (all stocks/steps) -----
    u_all = mm(sent_ref[...], wu_ref[...]) + bias(1, 4 * G)          # (T*R, 256)

    # ---------------- fused intraday TimeLSTM (both stocks, all days) ----------
    Wstep = wstep_ref[...]                                           # (2G, 5G) bf16
    bd    = bias(0, G)                                               # decay bias
    idx   = lens_ref[...].astype(jnp.int32)                          # (R, G)

    h = jnp.zeros((R, G), f32)
    c = jnp.zeros((R, G), f32)
    o_list = []
    for s in range(T):                                               # static unroll
        # one MXU push per step: [h | c] @ [[Wa_bd -> cols 0:4G], [Wd_bd -> cols 4G:5G]]
        pre   = mm(jnp.concatenate([h, c], axis=1), Wstep)           # (R, 5G)
        c_s1  = jnp.tanh(pre[:, 4 * G:5 * G] + bd)
        c_adj = c - c_s1 + c_s1 * time_ref[s]                        # (R, G)
        sg    = jax.nn.sigmoid(pre[:, 0:4 * G] + u_all[s * R:(s + 1) * R, :])
        f_g   = sg[:, 0 * G:1 * G]                                   # gate-major layout
        i_g   = sg[:, 1 * G:2 * G]
        o_g   = sg[:, 2 * G:3 * G]
        ct_g  = sg[:, 3 * G:4 * G]                                   # reference: sigmoid candidate
        c = f_g * c_adj + i_g * ct_g
        h = o_g * jnp.tanh(c)
        o_list.append(o_g)                                           # reference keeps the o gate

    # temp_hn: outputs[k, len[k]-1] if len[k] != 0 else 0  (one-hot select)
    hn = jnp.zeros((R, G), f32)
    for s in range(T):
        sel = jnp.logical_and(idx - 1 == s, idx != 0)
        hn = hn + jnp.where(sel, o_list[s], 0.0)

    # ---------------- attn1 (length-masked, both stocks, batched over steps) ---
    o_all = jnp.concatenate(o_list, axis=0)                          # (T*R, G)
    q     = mm(hn, sq(0)) + bias(2, G)                               # (R, G)
    proj  = mm(o_all, sq(1)) + bias(3, G)                            # (T*R, G)
    e_all = jnp.tanh(proj + jnp.concatenate([q] * T, axis=0))
    sc    = mm(e_all, sq(2)) + bias(4, G)                            # score replicated per stock block
    scs   = [sc[s * R:(s + 1) * R, :] for s in range(T)]
    mmax = scs[0]
    for s in range(1, T):
        mmax = jnp.maximum(mmax, scs[s])
    exps = [jnp.where(idx > s, jnp.exp(scs[s] - mmax), 0.0) for s in range(T)]
    den = exps[0]
    for s in range(1, T):
        den = den + exps[s]
    inv = pl.reciprocal(jnp.maximum(den, 1e-30), approx=True)        # safe if len==0
    ctx = jnp.zeros((R, G), f32)
    for s in range(T):
        ctx = ctx + (exps[s] * inv) * o_list[s]                      # (R, G) lstm1_out

    # ---------------- fused interday LSTM over days (both stocks) --------------
    xw  = mm(ctx, wl2_ref[0:G, :]) + bias(5, 4 * G)                  # (R, 256), hoisted
    Whh = wl2_ref[G:2 * G, :]                                        # (G, 4G) bf16
    h2 = jnp.zeros((B, G), f32)
    c2 = jnp.zeros((B, G), f32)
    h_list = []
    for t in range(D):                                               # nn.LSTM gate order i,f,g,o
        pre = xw[t * B:(t + 1) * B, :] + mm(h2, Whh)                 # (B, 256)
        sg  = jax.nn.sigmoid(pre)
        i_g = sg[:, 0 * G:1 * G]
        f_g = sg[:, 1 * G:2 * G]
        o_g = sg[:, 3 * G:4 * G]
        g_g = jnp.tanh(pre[:, 2 * G:3 * G])
        c2 = f_g * c2 + i_g * g_g
        h2 = o_g * jnp.tanh(c2)
        h_list.append(h2)

    # ---------------- attn2 (no mask, both stocks, batched over days) ----------
    h_all = jnp.concatenate(h_list, axis=0)                          # (D*B, G)
    q2 = mm(h2, sq(3)) + bias(6, G)                                  # query = last hidden state
    p2 = mm(h_all, sq(4)) + bias(7, G)
    e2 = jnp.tanh(p2 + jnp.concatenate([q2] * D, axis=0))
    sc2 = mm(e2, sq(5)) + bias(8, G)
    s2s = [sc2[t * B:(t + 1) * B, :] for t in range(D)]
    m2 = s2s[0]
    for t in range(1, D):
        m2 = jnp.maximum(m2, s2s[t])
    ex2 = [jnp.exp(s2s[t] - m2) for t in range(D)]
    den2 = ex2[0]
    for t in range(1, D):
        den2 = den2 + ex2[t]
    inv2 = pl.reciprocal(den2, approx=True)
    ctx2 = jnp.zeros((B, G), f32)
    for t in range(D):
        ctx2 = ctx2 + (ex2[t] * inv2) * h_list[t]                    # (B, G)

    # ---------------- per-stock MLP (block-diag) + head ------------------------
    y = jnp.maximum(mm(ctx2, sq(6)) + bias(9, G), 0.0)
    # TODO(synk): nn.Dropout(p=0.3) treated as identity (eval/inference semantics).
    y = mm(y, wmx_ref[...]) + bias(10, NUM_STOCKS * 64)              # (B, 128) text_out

    xs = jnp.maximum(mm(stock_ref[...], whead_ref[0:16, :]) + bias(11, 64), 0.0)
    xs = mm(xs, whead_ref[16:80, 0:32]) + bias(12, 32)               # (B, 32)
    logits = (mm(xs, whead_ref[80:112, 0:NUM_STOCKS])
              + mm(y, whead_ref[112:240, 0:NUM_STOCKS])
              + bias(13, NUM_STOCKS))                                # (B, NS)
    out_ref[...] = jnp.tanh(logits[0:out_ref.shape[0], :])


# ----------------------------------------------------------------------------
# Wrapper: layout plumbing (pad batch to 8 sublanes, day-major 8-aligned row
# groups, per-stock lane broadcast of timestamps / lengths) + the single call.
# ----------------------------------------------------------------------------
def actor_forward(state, packed):
    state = state.reshape(-1, FEAT_DIMS)
    bs = state.shape[0]
    assert bs <= B_PAD
    pad_b = B_PAD - bs

    stock_feats = state[:, 0:2 * NUM_STOCKS + 1]
    sentence = state[:, EMB_IDX:LEN_IDX].reshape(
        bs, NUM_STOCKS, N_DAYS, MAX_TWEETS, TWEETS_EMB)
    len_tweets = state[:, LEN_IDX:TARGET_IDX].reshape(bs, NUM_STOCKS, N_DAYS)
    time_feats = state[:, TIME_IDX:].reshape(bs, NUM_STOCKS, N_DAYS, MAX_TWEETS)

    # sentence -> (T*D*B_PAD, NS*E); row = t*R + d*B_PAD + b, col = stock*E + e
    ss = jnp.transpose(sentence, (3, 2, 0, 1, 4)).reshape(
        MAX_TWEETS, N_DAYS, bs, NUM_STOCKS * TWEETS_EMB)
    ss = jnp.pad(ss, ((0, 0), (0, 0), (0, pad_b), (0, 0)))
    sent2 = ss.reshape(MAX_TWEETS * R_ROWS, NUM_STOCKS * TWEETS_EMB)

    # timestamps -> (T, R, G): per-stock value broadcast across its 32 lanes
    tt = jnp.transpose(time_feats, (3, 2, 0, 1))                     # (T, D, B, NS)
    tt = jnp.repeat(tt, H1, axis=3)
    tt = jnp.pad(tt, ((0, 0), (0, 0), (0, pad_b), (0, 0)))
    time3 = tt.reshape(MAX_TWEETS, R_ROWS, G)

    # tweet counts -> (R, G): per-stock value broadcast across its 32 lanes
    ll = jnp.transpose(len_tweets, (2, 0, 1))                        # (D, B, NS)
    ll = jnp.repeat(ll, H1, axis=2)
    ll = jnp.pad(ll, ((0, 0), (0, pad_b), (0, 0)))
    lens2 = ll.reshape(R_ROWS, G)

    # stock features -> (B_PAD, STOCK_PAD) zero-padded (matches padded W1 rows)
    sp = jnp.pad(stock_feats, ((0, pad_b), (0, STOCK_PAD - (2 * NUM_STOCKS + 1))))

    return pl.pallas_call(
        _actor_kernel,
        out_shape=jax.ShapeDtypeStruct((bs, NUM_STOCKS), jnp.float32),
    )(sp, sent2, time3, lens2,
      packed['w_step'], packed['w_u'], packed['w_l2'], packed['w_sq'],
      packed['w_x2'], packed['w_head'], packed['biases'])


# ----------------------------------------------------------------------------
# Deterministic parameter init (PyTorch-style uniform(+/- 1/sqrt(fan_in))).
# Weights stored pre-transposed (y = x @ W + b); paired biases pre-combined.
# ----------------------------------------------------------------------------
def init_params(key):
    keys = iter(jax.random.split(key, 64))

    def lin(in_dim, out_dim, stack=None):
        bound = 1.0 / np.sqrt(in_dim)
        wshape = (in_dim, out_dim) if stack is None else (stack, in_dim, out_dim)
        bshape = (1, out_dim) if stack is None else (stack, 1, out_dim)
        w = jax.random.uniform(next(keys), wshape, jnp.float32, -bound, bound)
        b = jax.random.uniform(next(keys), bshape, jnp.float32, -bound, bound)
        return w, b

    p = {}
    # TimeLSTM (per stock), torch chunk order f,i,o,c_tmp
    p['wa'], ba = lin(H1, 4 * H1, NUM_STOCKS)
    p['ua'], ub = lin(TWEETS_EMB, 4 * H1, NUM_STOCKS)
    p['tl_b'] = ba + ub
    p['wd_w'], p['wd_b'] = lin(H1, H1, NUM_STOCKS)
    # attn1 (per stock)
    p['a1_w1'], p['a1_b1'] = lin(H1, H1, NUM_STOCKS)
    p['a1_w2'], p['a1_b2'] = lin(H1, H1, NUM_STOCKS)
    p['a1_v'], p['a1_vb'] = lin(H1, 1, NUM_STOCKS)
    # lstm2 (per stock), nn.LSTM gate order i,f,g,o; combined bias
    p['lstm2_wih'], bih = lin(H1, 4 * H2, NUM_STOCKS)
    p['lstm2_whh'], bhh = lin(H2, 4 * H2, NUM_STOCKS)
    p['lstm2_b'] = bih + bhh
    # attn2 (per stock)
    p['a2_w1'], p['a2_b1'] = lin(H2, H2, NUM_STOCKS)
    p['a2_w2'], p['a2_b2'] = lin(H2, H2, NUM_STOCKS)
    p['a2_v'], p['a2_vb'] = lin(H2, 1, NUM_STOCKS)
    # per-stock MLP
    p['lx1_w'], p['lx1_b'] = lin(H2, H2, NUM_STOCKS)
    p['lx2_w'], p['lx2_b'] = lin(H2, 64, NUM_STOCKS)
    # head
    p['l1_w'], p['l1_b'] = lin(2 * NUM_STOCKS + 1, 64)
    p['l2_w'], p['l2_b'] = lin(64, 32)
    p['lc_w'], p['lc_b'] = lin(64 * NUM_STOCKS + 32, NUM_STOCKS)
    return p


# ----------------------------------------------------------------------------
# One-time packing into block-diagonal / consolidated slabs (bf16 weights).
# Gate-major column layout: [gate0_s0 gate0_s1 | gate1_s0 gate1_s1 | ...].
# ----------------------------------------------------------------------------
def pack_params(p):
    NS, H = NUM_STOCKS, H1

    def A(x):
        return np.asarray(jax.device_get(x), dtype=np.float32)

    def pack_gates(w_stacked, in_dim):
        w = A(w_stacked)                                   # (NS, in_dim, 4H)
        out = np.zeros((NS * in_dim, 4 * G), np.float32)
        for s in range(NS):
            for g in range(4):
                out[s * in_dim:(s + 1) * in_dim,
                    g * G + s * H:g * G + (s + 1) * H] = w[s][:, g * H:(g + 1) * H]
        return out

    def pack_gate_bias(b_stacked):
        b = A(b_stacked)                                   # (NS, 1, 4H)
        out = np.zeros((4 * G,), np.float32)
        for s in range(NS):
            for g in range(4):
                out[g * G + s * H:g * G + (s + 1) * H] = b[s, 0, g * H:(g + 1) * H]
        return out

    def blockdiag(w_stacked):
        w = A(w_stacked)                                   # (NS, a, b)
        a, b = w.shape[1], w.shape[2]
        out = np.zeros((NS * a, NS * b), np.float32)
        for s in range(NS):
            out[s * a:(s + 1) * a, s * b:(s + 1) * b] = w[s]
        return out

    def concat_bias(b_stacked):
        b = A(b_stacked)
        return np.concatenate([b[s].reshape(-1) for s in range(NS)], axis=0)

    def v_block(v_stacked):                                # (NS, H, 1) -> (G, G) column-replicated
        v = A(v_stacked)
        out = np.zeros((G, G), np.float32)
        for s in range(NS):
            out[s * H:(s + 1) * H, s * H:(s + 1) * H] = np.broadcast_to(v[s], (H, H))
        return out

    def v_bias(vb_stacked):                                # (NS, 1, 1) -> (G,) lane-replicated
        vb = A(vb_stacked)
        out = np.zeros((G,), np.float32)
        for s in range(NS):
            out[s * H:(s + 1) * H] = vb[s].reshape(())
        return out

    # TimeLSTM merged step weight: [h | c] @ [[Wa_bd (cols 0:4G)], [Wd_bd (cols 4G:5G)]]
    w_step = np.zeros((2 * G, 5 * G), np.float32)
    w_step[0:G, 0:4 * G] = pack_gates(p['wa'], H)
    w_step[G:2 * G, 4 * G:5 * G] = blockdiag(p['wd_w'])
    w_u = pack_gates(p['ua'], TWEETS_EMB)

    w_l2 = np.concatenate([pack_gates(p['lstm2_wih'], H1),
                           pack_gates(p['lstm2_whh'], H2)], axis=0)   # (128, 256)

    w_sq = np.concatenate([blockdiag(p['a1_w1']), blockdiag(p['a1_w2']), v_block(p['a1_v']),
                           blockdiag(p['a2_w1']), blockdiag(p['a2_w2']), v_block(p['a2_v']),
                           blockdiag(p['lx1_w'])], axis=0)            # (448, 64)

    w_x2 = np.zeros((G, NS * 64), np.float32)                          # (64, 128)
    lx2 = A(p['lx2_w'])
    for s in range(NS):
        w_x2[s * H:(s + 1) * H, s * 64:(s + 1) * 64] = lx2[s]

    # head slab (240, 64): rows 0:16 W1 (in padded to 16), 16:80 W2 (cols 0:32),
    # 80:112 linear_c stock part, 112:240 linear_c text part (cols 0:NS).
    w_head = np.zeros((240, 64), np.float32)
    w_head[0:2 * NS + 1, :] = A(p['l1_w'])
    w_head[16:80, 0:32] = A(p['l2_w'])
    lc = A(p['lc_w'])
    w_head[80:112, 0:NS] = lc[0:32]
    w_head[112:240, 0:NS] = lc[32:]

    biases = np.zeros((16, 4 * G), np.float32)

    def put(row, vec):
        v = np.asarray(jax.device_get(vec), np.float32).reshape(-1)
        biases[row, :v.shape[0]] = v

    put(0, concat_bias(p['wd_b']))
    put(1, pack_gate_bias(p['tl_b']))
    put(2, concat_bias(p['a1_b1']))
    put(3, concat_bias(p['a1_b2']))
    put(4, v_bias(p['a1_vb']))
    put(5, pack_gate_bias(p['lstm2_b']))
    put(6, concat_bias(p['a2_b1']))
    put(7, concat_bias(p['a2_b2']))
    put(8, v_bias(p['a2_vb']))
    put(9, concat_bias(p['lx1_b']))
    put(10, concat_bias(p['lx2_b']))
    put(11, p['l1_b'])
    put(12, p['l2_b'])
    put(13, p['lc_b'])

    bf = jnp.bfloat16
    return {
        'w_step': jnp.asarray(w_step, bf),
        'w_u': jnp.asarray(w_u, bf),
        'w_l2': jnp.asarray(w_l2, bf),
        'w_sq': jnp.asarray(w_sq, bf),
        'w_x2': jnp.asarray(w_x2, bf),
        'w_head': jnp.asarray(w_head, bf),
        'biases': jnp.asarray(biases, jnp.float32),
    }


if __name__ == "__main__":
    key = jax.random.PRNGKey(0)
    pkey, skey = jax.random.split(key)
    params = init_params(pkey)
    packed = pack_params(params)

    k1, k2, k3, k4, k5 = jax.random.split(skey, 5)
    stock_part = jax.random.normal(k1, (BATCH, 2 * NUM_STOCKS + 1), jnp.float32)
    sent_part = 0.5 * jax.random.normal(
        k2, (BATCH, NUM_STOCKS * N_DAYS * MAX_TWEETS * TWEETS_EMB), jnp.float32)
    # lengths in [1, MAX_TWEETS] so the masked softmax always has a valid entry
    len_part = jax.random.randint(
        k3, (BATCH, NUM_STOCKS * N_DAYS), 1, MAX_TWEETS + 1).astype(jnp.float32)
    target_part = jax.random.normal(k4, (BATCH, NUM_STOCKS), jnp.float32)  # unused slot
    time_part = jax.random.uniform(
        k5, (BATCH, NUM_STOCKS * N_DAYS * MAX_TWEETS), jnp.float32)
    state = jnp.concatenate(
        [stock_part, sent_part, len_part, target_part, time_part], axis=1)
    assert state.shape == (BATCH, FEAT_DIMS)

    out = actor_forward(state, packed)
    out = jax.block_until_ready(out)
    assert out.shape == (BATCH, NUM_STOCKS)
    assert bool(jnp.all(jnp.isfinite(out)))
    print("KERNEL_OK")
</pallas_src>

<mosaic_0001>
module attributes {stable_mosaic.version = 11 : i64} {
  func.func @_actor_kernel(%arg0: memref<8x16xf32, #tpu.memory_space<vmem>>, %arg1: memref<96x16xf32, #tpu.memory_space<vmem>>, %arg2: memref<4x24x64xf32, #tpu.memory_space<vmem>>, %arg3: memref<24x64xf32, #tpu.memory_space<vmem>>, %arg4: memref<128x320xbf16, #tpu.memory_space<vmem>>, %arg5: memref<16x256xbf16, #tpu.memory_space<vmem>>, %arg6: memref<128x256xbf16, #tpu.memory_space<vmem>>, %arg7: memref<448x64xbf16, #tpu.memory_space<vmem>>, %arg8: memref<64x128xbf16, #tpu.memory_space<vmem>>, %arg9: memref<240x64xbf16, #tpu.memory_space<vmem>>, %arg10: memref<16x256xf32, #tpu.memory_space<vmem>>, %arg11: memref<2x2xf32, #tpu.memory_space<vmem>>) attributes {dimension_semantics = [], scalar_prefetch = 0 : i64, scratch_operands = 0 : i64, tpu.core_type = #tpu.core_type<tc>} {
    %c0 = arith.constant 0 : index
    %c0_0 = arith.constant 0 : index
    %0 = vector.load %arg1[%c0, %c0_0] : memref<96x16xf32, #tpu.memory_space<vmem>>, vector<96x16xf32>
    %c0_1 = arith.constant 0 : index
    %c0_2 = arith.constant 0 : index
    %1 = vector.load %arg5[%c0_1, %c0_2] : memref<16x256xbf16, #tpu.memory_space<vmem>>, vector<16x256xbf16>
    %2 = arith.truncf %0 : vector<96x16xf32> to vector<96x16xbf16>
    %cst = arith.constant dense<0.000000e+00> : vector<96x256xf32>
    %3 = tpu.matmul %2, %1, %cst {dimension_numbers = #tpu.dot_dimension_numbers<[1], [0], [0], [1], [0, 0, 1, 1], [], []>} : vector<96x16xbf16>, vector<16x256xbf16>, vector<96x256xf32> -> vector<96x256xf32>
    %c1 = arith.constant 1 : index
    %c0_3 = arith.constant 0 : index
    %4 = vector.load %arg10[%c1, %c0_3] : memref<16x256xf32, #tpu.memory_space<vmem>>, vector<1x256xf32>
    %5 = vector.broadcast %4 : vector<1x256xf32> to vector<96x256xf32>
    %6 = arith.addf %3, %5 : vector<96x256xf32>
    %c0_4 = arith.constant 0 : index
    %c0_5 = arith.constant 0 : index
    %7 = vector.load %arg4[%c0_4, %c0_5] : memref<128x320xbf16, #tpu.memory_space<vmem>>, vector<128x320xbf16>
    %c0_6 = arith.constant 0 : index
    %c0_7 = arith.constant 0 : index
    %8 = vector.load %arg10[%c0_6, %c0_7] : memref<16x256xf32, #tpu.memory_space<vmem>>, vector<1x64xf32>
    %c0_8 = arith.constant 0 : index
    %c0_9 = arith.constant 0 : index
    %9 = vector.load %arg3[%c0_8, %c0_9] : memref<24x64xf32, #tpu.memory_space<vmem>>, vector<24x64xf32>
    %10 = arith.fptosi %9 : vector<24x64xf32> to vector<24x64xi32>
    %cst_10 = arith.constant 0.000000e+00 : f32
    %11 = vector.broadcast %cst_10 : f32 to vector<24x64xf32>
    %cst_11 = arith.constant 0.000000e+00 : f32
    %12 = vector.broadcast %cst_11 : f32 to vector<24x64xf32>
    %13 = tpu.concatenate %11, %12 in 1 : vector<24x64xf32>, vector<24x64xf32> -> vector<24x128xf32>
    %14 = arith.truncf %13 : vector<24x128xf32> to vector<24x128xbf16>
    %cst_12 = arith.constant dense<0.000000e+00> : vector<24x320xf32>
    %15 = tpu.matmul %14, %7, %cst_12 {dimension_numbers = #tpu.dot_dimension_numbers<[1], [0], [0], [1], [0, 0, 1, 1], [], []>} : vector<24x128xbf16>, vector<128x320xbf16>, vector<24x320xf32> -> vector<24x320xf32>
    %16 = vector.extract_strided_slice %15 {offsets = [0, 256], sizes = [24, 64], strides = [1, 1]} : vector<24x320xf32> to vector<24x64xf32>
    %17 = vector.broadcast %8 : vector<1x64xf32> to vector<24x64xf32>
    %18 = arith.addf %16, %17 : vector<24x64xf32>
    %19 = math.tanh %18 : vector<24x64xf32>
    %20 = arith.subf %12, %19 : vector<24x64xf32>
    %c0_13 = arith.constant 0 : index
    %c0_14 = arith.constant 0 : index
    %c0_15 = arith.constant 0 : index
    %21 = vector.load %arg2[%c0_13, %c0_14, %c0_15] : memref<4x24x64xf32, #tpu.memory_space<vmem>>, vector<1x24x64xf32>
    %22 = vector.shape_cast %21 : vector<1x24x64xf32> to vector<24x64xf32>
    %23 = arith.mulf %19, %22 : vector<24x64xf32>
    %24 = arith.addf %20, %23 : vector<24x64xf32>
    %25 = vector.extract_strided_slice %15 {offsets = [0, 0], sizes = [24, 256], strides = [1, 1]} : vector<24x320xf32> to vector<24x256xf32>
    %26 = vector.extract_strided_slice %6 {offsets = [0, 0], sizes = [24, 256], strides = [1, 1]} : vector<96x256xf32> to vector<24x256xf32>
    %27 = arith.addf %25, %26 : vector<24x256xf32>
    %28 = arith.negf %27 : vector<24x256xf32>
    %29 = math.exp %28 : vector<24x256xf32>
    %cst_16 = arith.constant 1.000000e+00 : f32
    %30 = vector.broadcast %cst_16 : f32 to vector<24x256xf32>
    %31 = arith.addf %30, %29 : vector<24x256xf32>
    %32 = arith.divf %30, %31 : vector<24x256xf32>
    %33 = vector.extract_strided_slice %32 {offsets = [0, 0], sizes = [24, 64], strides = [1, 1]} : vector<24x256xf32> to vector<24x64xf32>
    %34 = vector.extract_strided_slice %32 {offsets = [0, 64], sizes = [24, 64], strides = [1, 1]} : vector<24x256xf32> to vector<24x64xf32>
    %35 = vector.extract_strided_slice %32 {offsets = [0, 128], sizes = [24, 64], strides = [1, 1]} : vector<24x256xf32> to vector<24x64xf32>
    %36 = vector.extract_strided_slice %32 {offsets = [0, 192], sizes = [24, 64], strides = [1, 1]} : vector<24x256xf32> to vector<24x64xf32>
    %37 = arith.mulf %33, %24 : vector<24x64xf32>
    %38 = arith.mulf %34, %36 : vector<24x64xf32>
    %39 = arith.addf %37, %38 : vector<24x64xf32>
    %40 = math.tanh %39 : vector<24x64xf32>
    %41 = arith.mulf %35, %40 : vector<24x64xf32>
    %42 = tpu.concatenate %41, %39 in 1 : vector<24x64xf32>, vector<24x64xf32> -> vector<24x128xf32>
    %43 = arith.truncf %42 : vector<24x128xf32> to vector<24x128xbf16>
    %cst_17 = arith.constant dense<0.000000e+00> : vector<24x320xf32>
    %44 = tpu.matmul %43, %7, %cst_17 {dimension_numbers = #tpu.dot_dimension_numbers<[1], [0], [0], [1], [0, 0, 1, 1], [], []>} : vector<24x128xbf16>, vector<128x320xbf16>, vector<24x320xf32> -> vector<24x320xf32>
    %45 = vector.extract_strided_slice %44 {offsets = [0, 256], sizes = [24, 64], strides = [1, 1]} : vector<24x320xf32> to vector<24x64xf32>
    %46 = vector.broadcast %8 : vector<1x64xf32> to vector<24x64xf32>
    %47 = arith.addf %45, %46 : vector<24x64xf32>
    %48 = math.tanh %47 : vector<24x64xf32>
    %49 = arith.subf %39, %48 : vector<24x64xf32>
    %c1_18 = arith.constant 1 : index
    %c0_19 = arith.constant 0 : index
    %c0_20 = arith.constant 0 : index
    %50 = vector.load %arg2[%c1_18, %c0_19, %c0_20] : memref<4x24x64xf32, #tpu.memory_space<vmem>>, vector<1x24x64xf32>
    %51 = vector.shape_cast %50 : vector<1x24x64xf32> to vector<24x64xf32>
    %52 = arith.mulf %48, %51 : vector<24x64xf32>
    %53 = arith.addf %49, %52 : vector<24x64xf32>
    %54 = vector.extract_strided_slice %44 {offsets = [0, 0], sizes = [24, 256], strides = [1, 1]} : vector<24x320xf32> to vector<24x256xf32>
    %55 = vector.extract_strided_slice %6 {offsets = [24, 0], sizes = [24, 256], strides = [1, 1]} : vector<96x256xf32> to vector<24x256xf32>
    %56 = arith.addf %54, %55 : vector<24x256xf32>
    %57 = arith.negf %56 : vector<24x256xf32>
    %58 = math.exp %57 : vector<24x256xf32>
    %cst_21 = arith.constant 1.000000e+00 : f32
    %59 = vector.broadcast %cst_21 : f32 to vector<24x256xf32>
    %60 = arith.addf %59, %58 : vector<24x256xf32>
    %61 = arith.divf %59, %60 : vector<24x256xf32>
    %62 = vector.extract_strided_slice %61 {offsets = [0, 0], sizes = [24, 64], strides = [1, 1]} : vector<24x256xf32> to vector<24x64xf32>
    %63 = vector.extract_strided_slice %61 {offsets = [0, 64], sizes = [24, 64], strides = [1, 1]} : vector<24x256xf32> to vector<24x64xf32>
    %64 = vector.extract_strided_slice %61 {offsets = [0, 128], sizes = [24, 64], strides = [1, 1]} : vector<24x256xf32> to vector<24x64xf32>
    %65 = vector.extract_strided_slice %61 {offsets = [0, 192], sizes = [24, 64], strides = [1, 1]} : vector<24x256xf32> to vector<24x64xf32>
    %66 = arith.mulf %62, %53 : vector<24x64xf32>
    %67 = arith.mulf %63, %65 : vector<24x64xf32>
    %68 = arith.addf %66, %67 : vector<24x64xf32>
    %69 = math.tanh %68 : vector<24x64xf32>
    %70 = arith.mulf %64, %69 : vector<24x64xf32>
    %71 = tpu.concatenate %70, %68 in 1 : vector<24x64xf32>, vector<24x64xf32> -> vector<24x128xf32>
    %72 = arith.truncf %71 : vector<24x128xf32> to vector<24x128xbf16>
    %cst_22 = arith.constant dense<0.000000e+00> : vector<24x320xf32>
    %73 = tpu.matmul %72, %7, %cst_22 {dimension_numbers = #tpu.dot_dimension_numbers<[1], [0], [0], [1], [0, 0, 1, 1], [], []>} : vector<24x128xbf16>, vector<128x320xbf16>, vector<24x320xf32> -> vector<24x320xf32>
    %74 = vector.extract_strided_slice %73 {offsets = [0, 256], sizes = [24, 64], strides = [1, 1]} : vector<24x320xf32> to vector<24x64xf32>
    %75 = vector.broadcast %8 : vector<1x64xf32> to vector<24x64xf32>
    %76 = arith.addf %74, %75 : vector<24x64xf32>
    %77 = math.tanh %76 : vector<24x64xf32>
    %78 = arith.subf %68, %77 : vector<24x64xf32>
    %c2 = arith.constant 2 : index
    %c0_23 = arith.constant 0 : index
    %c0_24 = arith.constant 0 : index
    %79 = vector.load %arg2[%c2, %c0_23, %c0_24] : memref<4x24x64xf32, #tpu.memory_space<vmem>>, vector<1x24x64xf32>
    %80 = vector.shape_cast %79 : vector<1x24x64xf32> to vector<24x64xf32>
    %81 = arith.mulf %77, %80 : vector<24x64xf32>
    %82 = arith.addf %78, %81 : vector<24x64xf32>
    %83 = vector.extract_strided_slice %73 {offsets = [0, 0], sizes = [24, 256], strides = [1, 1]} : vector<24x320xf32> to vector<24x256xf32>
    %84 = vector.extract_strided_slice %6 {offsets = [48, 0], sizes = [24, 256], strides = [1, 1]} : vector<96x256xf32> to vector<24x256xf32>
    %85 = arith.addf %83, %84 : vector<24x256xf32>
    %86 = arith.negf %85 : vector<24x256xf32>
    %87 = math.exp %86 : vector<24x256xf32>
    %cst_25 = arith.constant 1.000000e+00 : f32
    %88 = vector.broadcast %cst_25 : f32 to vector<24x256xf32>
    %89 = arith.addf %88, %87 : vector<24x256xf32>
    %90 = arith.divf %88, %89 : vector<24x256xf32>
    %91 = vector.extract_strided_slice %90 {offsets = [0, 0], sizes = [24, 64], strides = [1, 1]} : vector<24x256xf32> to vector<24x64xf32>
    %92 = vector.extract_strided_slice %90 {offsets = [0, 64], sizes = [24, 64], strides = [1, 1]} : vector<24x256xf32> to vector<24x64xf32>
    %93 = vector.extract_strided_slice %90 {offsets = [0, 128], sizes = [24, 64], strides = [1, 1]} : vector<24x256xf32> to vector<24x64xf32>
    %94 = vector.extract_strided_slice %90 {offsets = [0, 192], sizes = [24, 64], strides = [1, 1]} : vector<24x256xf32> to vector<24x64xf32>
    %95 = arith.mulf %91, %82 : vector<24x64xf32>
    %96 = arith.mulf %92, %94 : vector<24x64xf32>
    %97 = arith.addf %95, %96 : vector<24x64xf32>
    %98 = math.tanh %97 : vector<24x64xf32>
    %99 = arith.mulf %93, %98 : vector<24x64xf32>
    %100 = tpu.concatenate %99, %97 in 1 : vector<24x64xf32>, vector<24x64xf32> -> vector<24x128xf32>
    %101 = arith.truncf %100 : vector<24x128xf32> to vector<24x128xbf16>
    %cst_26 = arith.constant dense<0.000000e+00> : vector<24x320xf32>
    %102 = tpu.matmul %101, %7, %cst_26 {dimension_numbers = #tpu.dot_dimension_numbers<[1], [0], [0], [1], [0, 0, 1, 1], [], []>} : vector<24x128xbf16>, vector<128x320xbf16>, vector<24x320xf32> -> vector<24x320xf32>
    %103 = vector.extract_strided_slice %102 {offsets = [0, 0], sizes = [24, 256], strides = [1, 1]} : vector<24x320xf32> to vector<24x256xf32>
    %104 = vector.extract_strided_slice %6 {offsets = [72, 0], sizes = [24, 256], strides = [1, 1]} : vector<96x256xf32> to vector<24x256xf32>
    %105 = arith.addf %103, %104 : vector<24x256xf32>
    %106 = arith.negf %105 : vector<24x256xf32>
    %107 = math.exp %106 : vector<24x256xf32>
    %cst_27 = arith.constant 1.000000e+00 : f32
    %108 = vector.broadcast %cst_27 : f32 to vector<24x256xf32>
    %109 = arith.addf %108, %107 : vector<24x256xf32>
    %110 = arith.divf %108, %109 : vector<24x256xf32>
    %111 = vector.extract_strided_slice %110 {offsets = [0, 128], sizes = [24, 64], strides = [1, 1]} : vector<24x256xf32> to vector<24x64xf32>
    %cst_28 = arith.constant 0.000000e+00 : f32
    %112 = vector.broadcast %cst_28 : f32 to vector<24x64xf32>
    %c1_i32 = arith.constant 1 : i32
    %113 = vector.broadcast %c1_i32 : i32 to vector<24x64xi32>
    %114 = arith.subi %10, %113 : vector<24x64xi32>
    %c0_i32 = arith.constant 0 : i32
    %115 = vector.broadcast %c0_i32 : i32 to vector<24x64xi32>
    %116 = arith.cmpi eq, %114, %115 : vector<24x64xi32>
    %c0_i32_29 = arith.constant 0 : i32
    %117 = vector.broadcast %c0_i32_29 : i32 to vector<24x64xi32>
    %118 = arith.cmpi ne, %10, %117 : vector<24x64xi32>
    %119 = arith.andi %116, %118 : vector<24x64xi1>
    %cst_30 = arith.constant 0.000000e+00 : f32
    %120 = vector.broadcast %cst_30 : f32 to vector<24x64xf32>
    %121 = arith.select %119, %35, %120 : vector<24x64xi1>, vector<24x64xf32>
    %122 = arith.addf %112, %121 : vector<24x64xf32>
    %c1_i32_31 = arith.constant 1 : i32
    %123 = vector.broadcast %c1_i32_31 : i32 to vector<24x64xi32>
    %124 = arith.subi %10, %123 : vector<24x64xi32>
    %c1_i32_32 = arith.constant 1 : i32
    %125 = vector.broadcast %c1_i32_32 : i32 to vector<24x64xi32>
    %126 = arith.cmpi eq, %124, %125 : vector<24x64xi32>
    %c0_i32_33 = arith.constant 0 : i32
    %127 = vector.broadcast %c0_i32_33 : i32 to vector<24x64xi32>
    %128 = arith.cmpi ne, %10, %127 : vector<24x64xi32>
    %129 = arith.andi %126, %128 : vector<24x64xi1>
    %cst_34 = arith.constant 0.000000e+00 : f32
    %130 = vector.broadcast %cst_34 : f32 to vector<24x64xf32>
    %131 = arith.select %129, %64, %130 : vector<24x64xi1>, vector<24x64xf32>
    %132 = arith.addf %122, %131 : vector<24x64xf32>
    %c1_i32_35 = arith.constant 1 : i32
    %133 = vector.broadcast %c1_i32_35 : i32 to vector<24x64xi32>
    %134 = arith.subi %10, %133 : vector<24x64xi32>
    %c2_i32 = arith.constant 2 : i32
    %135 = vector.broadcast %c2_i32 : i32 to vector<24x64xi32>
    %136 = arith.cmpi eq, %134, %135 : vector<24x64xi32>
    %c0_i32_36 = arith.constant 0 : i32
    %137 = vector.broadcast %c0_i32_36 : i32 to vector<24x64xi32>
    %138 = arith.cmpi ne, %10, %137 : vector<24x64xi32>
    %139 = arith.andi %136, %138 : vector<24x64xi1>
    %cst_37 = arith.constant 0.000000e+00 : f32
    %140 = vector.broadcast %cst_37 : f32 to vector<24x64xf32>
    %141 = arith.select %139, %93, %140 : vector<24x64xi1>, vector<24x64xf32>
    %142 = arith.addf %132, %141 : vector<24x64xf32>
    %c1_i32_38 = arith.constant 1 : i32
    %143 = vector.broadcast %c1_i32_38 : i32 to vector<24x64xi32>
    %144 = arith.subi %10, %143 : vector<24x64xi32>
    %c3_i32 = arith.constant 3 : i32
    %145 = vector.broadcast %c3_i32 : i32 to vector<24x64xi32>
    %146 = arith.cmpi eq, %144, %145 : vector<24x64xi32>
    %c0_i32_39 = arith.constant 0 : i32
    %147 = vector.broadcast %c0_i32_39 : i32 to vector<24x64xi32>
    %148 = arith.cmpi ne, %10, %147 : vector<24x64xi32>
    %149 = arith.andi %146, %148 : vector<24x64xi1>
    %cst_40 = arith.constant 0.000000e+00 : f32
    %150 = vector.broadcast %cst_40 : f32 to vector<24x64xf32>
    %151 = arith.select %149, %111, %150 : vector<24x64xi1>, vector<24x64xf32>
    %152 = arith.addf %142, %151 : vector<24x64xf32>
    %153 = tpu.concatenate %35, %64, %93, %111 in 0 : vector<24x64xf32>, vector<24x64xf32>, vector<24x64xf32>, vector<24x64xf32> -> vector<96x64xf32>
    %c0_41 = arith.constant 0 : index
    %c0_42 = arith.constant 0 : index
    %154 = vector.load %arg7[%c0_41, %c0_42] : memref<448x64xbf16, #tpu.memory_space<vmem>>, vector<64x64xbf16>
    %155 = arith.truncf %152 : vector<24x64xf32> to vector<24x64xbf16>
    %cst_43 = arith.constant dense<0.000000e+00> : vector<24x64xf32>
    %156 = tpu.matmul %155, %154, %cst_43 {dimension_numbers = #tpu.dot_dimension_numbers<[1], [0], [0], [1], [0, 0, 1, 1], [], []>} : vector<24x64xbf16>, vector<64x64xbf16>, vector<24x64xf32> -> vector<24x64xf32>
    %c2_44 = arith.constant 2 : index
    %c0_45 = arith.constant 0 : index
    %157 = vector.load %arg10[%c2_44, %c0_45] : memref<16x256xf32, #tpu.memory_space<vmem>>, vector<1x64xf32>
    %158 = vector.broadcast %157 : vector<1x64xf32> to vector<24x64xf32>
    %159 = arith.addf %156, %158 : vector<24x64xf32>
    %c64 = arith.constant 64 : index
    %c0_46 = arith.constant 0 : index
    %160 = vector.load %arg7[%c64, %c0_46] : memref<448x64xbf16, #tpu.memory_space<vmem>>, vector<64x64xbf16>
    %161 = arith.truncf %153 : vector<96x64xf32> to vector<96x64xbf16>
    %cst_47 = arith.constant dense<0.000000e+00> : vector<96x64xf32>
    %162 = tpu.matmul %161, %160, %cst_47 {dimension_numbers = #tpu.dot_dimension_numbers<[1], [0], [0], [1], [0, 0, 1, 1], [], []>} : vector<96x64xbf16>, vector<64x64xbf16>, vector<96x64xf32> -> vector<96x64xf32>
    %c3 = arith.constant 3 : index
    %c0_48 = arith.constant 0 : index
    %163 = vector.load %arg10[%c3, %c0_48] : memref<16x256xf32, #tpu.memory_space<vmem>>, vector<1x64xf32>
    %164 = vector.broadcast %163 : vector<1x64xf32> to vector<96x64xf32>
    %165 = arith.addf %162, %164 : vector<96x64xf32>
    %166 = tpu.concatenate %159, %159, %159, %159 in 0 : vector<24x64xf32>, vector<24x64xf32>, vector<24x64xf32>, vector<24x64xf32> -> vector<96x64xf32>
    %167 = arith.addf %165, %166 : vector<96x64xf32>
    %168 = math.tanh %167 : vector<96x64xf32>
    %c128 = arith.constant 128 : index
    %c0_49 = arith.constant 0 : index
    %169 = vector.load %arg7[%c128, %c0_49] : memref<448x64xbf16, #tpu.memory_space<vmem>>, vector<64x64xbf16>
    %170 = arith.truncf %168 : vector<96x64xf32> to vector<96x64xbf16>
    %cst_50 = arith.constant dense<0.000000e+00> : vector<96x64xf32>
    %171 = tpu.matmul %170, %169, %cst_50 {dimension_numbers = #tpu.dot_dimension_numbers<[1], [0], [0], [1], [0, 0, 1, 1], [], []>} : vector<96x64xbf16>, vector<64x64xbf16>, vector<96x64xf32> -> vector<96x64xf32>
    %c4 = arith.constant 4 : index
    %c0_51 = arith.constant 0 : index
    %172 = vector.load %arg10[%c4, %c0_51] : memref<16x256xf32, #tpu.memory_space<vmem>>, vector<1x64xf32>
    %173 = vector.broadcast %172 : vector<1x64xf32> to vector<96x64xf32>
    %174 = arith.addf %171, %173 : vector<96x64xf32>
    %175 = vector.extract_strided_slice %174 {offsets = [0, 0], sizes = [24, 64], strides = [1, 1]} : vector<96x64xf32> to vector<24x64xf32>
    %176 = vector.extract_strided_slice %174 {offsets = [24, 0], sizes = [24, 64], strides = [1, 1]} : vector<96x64xf32> to vector<24x64xf32>
    %177 = vector.extract_strided_slice %174 {offsets = [48, 0], sizes = [24, 64], strides = [1, 1]} : vector<96x64xf32> to vector<24x64xf32>
    %178 = vector.extract_strided_slice %174 {offsets = [72, 0], sizes = [24, 64], strides = [1, 1]} : vector<96x64xf32> to vector<24x64xf32>
    %179 = arith.maximumf %175, %176 : vector<24x64xf32>
    %180 = arith.maximumf %179, %177 : vector<24x64xf32>
    %181 = arith.maximumf %180, %178 : vector<24x64xf32>
    %c0_i32_52 = arith.constant 0 : i32
    %182 = vector.broadcast %c0_i32_52 : i32 to vector<24x64xi32>
    %183 = arith.cmpi sgt, %10, %182 : vector<24x64xi32>
    %184 = arith.subf %175, %181 : vector<24x64xf32>
    %185 = math.exp %184 : vector<24x64xf32>
    %cst_53 = arith.constant 0.000000e+00 : f32
    %186 = vector.broadcast %cst_53 : f32 to vector<24x64xf32>
    %187 = arith.select %183, %185, %186 : vector<24x64xi1>, vector<24x64xf32>
    %c1_i32_54 = arith.constant 1 : i32
    %188 = vector.broadcast %c1_i32_54 : i32 to vector<24x64xi32>
    %189 = arith.cmpi sgt, %10, %188 : vector<24x64xi32>
    %190 = arith.subf %176, %181 : vector<24x64xf32>
    %191 = math.exp %190 : vector<24x64xf32>
    %cst_55 = arith.constant 0.000000e+00 : f32
    %192 = vector.broadcast %cst_55 : f32 to vector<24x64xf32>
    %193 = arith.select %189, %191, %192 : vector<24x64xi1>, vector<24x64xf32>
    %c2_i32_56 = arith.constant 2 : i32
    %194 = vector.broadcast %c2_i32_56 : i32 to vector<24x64xi32>
    %195 = arith.cmpi sgt, %10, %194 : vector<24x64xi32>
    %196 = arith.subf %177, %181 : vector<24x64xf32>
    %197 = math.exp %196 : vector<24x64xf32>
    %cst_57 = arith.constant 0.000000e+00 : f32
    %198 = vector.broadcast %cst_57 : f32 to vector<24x64xf32>
    %199 = arith.select %195, %197, %198 : vector<24x64xi1>, vector<24x64xf32>
    %c3_i32_58 = arith.constant 3 : i32
    %200 = vector.broadcast %c3_i32_58 : i32 to vector<24x64xi32>
    %201 = arith.cmpi sgt, %10, %200 : vector<24x64xi32>
    %202 = arith.subf %178, %181 : vector<24x64xf32>
    %203 = math.exp %202 : vector<24x64xf32>
    %cst_59 = arith.constant 0.000000e+00 : f32
    %204 = vector.broadcast %cst_59 : f32 to vector<24x64xf32>
    %205 = arith.select %201, %203, %204 : vector<24x64xi1>, vector<24x64xf32>
    %206 = arith.addf %187, %193 : vector<24x64xf32>
    %207 = arith.addf %206, %199 : vector<24x64xf32>
    %208 = arith.addf %207, %205 : vector<24x64xf32>
    %cst_60 = arith.constant 1.000000e-30 : f32
    %209 = vector.broadcast %cst_60 : f32 to vector<24x64xf32>
    %210 = arith.maximumf %208, %209 : vector<24x64xf32>
    %211 = tpu.reciprocal %210 {approx = true} : vector<24x64xf32> -> vector<24x64xf32>
    %cst_61 = arith.constant 0.000000e+00 : f32
    %212 = vector.broadcast %cst_61 : f32 to vector<24x64xf32>
    %213 = arith.mulf %187, %211 : vector<24x64xf32>
    %214 = arith.mulf %213, %35 : vector<24x64xf32>
    %215 = arith.addf %212, %214 : vector<24x64xf32>
    %216 = arith.mulf %193, %211 : vector<24x64xf32>
    %217 = arith.mulf %216, %64 : vector<24x64xf32>
    %218 = arith.addf %215, %217 : vector<24x64xf32>
    %219 = arith.mulf %199, %211 : vector<24x64xf32>
    %220 = arith.mulf %219, %93 : vector<24x64xf32>
    %221 = arith.addf %218, %220 : vector<24x64xf32>
    %222 = arith.mulf %205, %211 : vector<24x64xf32>
    %223 = arith.mulf %222, %111 : vector<24x64xf32>
    %224 = arith.addf %221, %223 : vector<24x64xf32>
    %c0_62 = arith.constant 0 : index
    %c0_63 = arith.constant 0 : index
    %225 = vector.load %arg6[%c0_62, %c0_63] : memref<128x256xbf16, #tpu.memory_space<vmem>>, vector<64x256xbf16>
    %226 = arith.truncf %224 : vector<24x64xf32> to vector<24x64xbf16>
    %cst_64 = arith.constant dense<0.000000e+00> : vector<24x256xf32>
    %227 = tpu.matmul %226, %225, %cst_64 {dimension_numbers = #tpu.dot_dimension_numbers<[1], [0], [0], [1], [0, 0, 1, 1], [], []>} : vector<24x64xbf16>, vector<64x256xbf16>, vector<24x256xf32> -> vector<24x256xf32>
    %c5 = arith.constant 5 : index
    %c0_65 = arith.constant 0 : index
    %228 = vector.load %arg10[%c5, %c0_65] : memref<16x256xf32, #tpu.memory_space<vmem>>, vector<1x256xf32>
    %229 = vector.broadcast %228 : vector<1x256xf32> to vector<24x256xf32>
    %230 = arith.addf %227, %229 : vector<24x256xf32>
    %c64_66 = arith.constant 64 : index
    %c0_67 = arith.constant 0 : index
    %231 = vector.load %arg6[%c64_66, %c0_67] : memref<128x256xbf16, #tpu.memory_space<vmem>>, vector<64x256xbf16>
    %cst_68 = arith.constant 0.000000e+00 : f32
    %232 = vector.broadcast %cst_68 : f32 to vector<8x64xf32>
    %cst_69 = arith.constant 0.000000e+00 : f32
    %233 = vector.broadcast %cst_69 : f32 to vector<8x64xf32>
    %234 = vector.extract_strided_slice %230 {offsets = [0, 0], sizes = [8, 256], strides = [1, 1]} : vector<24x256xf32> to vector<8x256xf32>
    %235 = arith.truncf %232 : vector<8x64xf32> to vector<8x64xbf16>
    %cst_70 = arith.constant dense<0.000000e+00> : vector<8x256xf32>
    %236 = tpu.matmul %235, %231, %cst_70 {dimension_numbers = #tpu.dot_dimension_numbers<[1], [0], [0], [1], [0, 0, 1, 1], [], []>} : vector<8x64xbf16>, vector<64x256xbf16>, vector<8x256xf32> -> vector<8x256xf32>
    %237 = arith.addf %234, %236 : vector<8x256xf32>
    %238 = arith.negf %237 : vector<8x256xf32>
    %239 = math.exp %238 : vector<8x256xf32>
    %cst_71 = arith.constant 1.000000e+00 : f32
    %240 = vector.broadcast %cst_71 : f32 to vector<8x256xf32>
    %241 = arith.addf %240, %239 : vector<8x256xf32>
    %242 = arith.divf %240, %241 : vector<8x256xf32>
    %243 = vector.extract_strided_slice %242 {offsets = [0, 0], sizes = [8, 64], strides = [1, 1]} : vector<8x256xf32> to vector<8x64xf32>
    %244 = vector.extract_strided_slice %242 {offsets = [0, 64], sizes = [8, 64], strides = [1, 1]} : vector<8x256xf32> to vector<8x64xf32>
    %245 = vector.extract_strided_slice %242 {offsets = [0, 192], sizes = [8, 64], strides = [1, 1]} : vector<8x256xf32> to vector<8x64xf32>
    %246 = vector.extract_strided_slice %237 {offsets = [0, 128], sizes = [8, 64], strides = [1, 1]} : vector<8x256xf32> to vector<8x64xf32>
    %247 = math.tanh %246 : vector<8x64xf32>
    %248 = arith.mulf %244, %233 : vector<8x64xf32>
    %249 = arith.mulf %243, %247 : vector<8x64xf32>
    %250 = arith.addf %248, %249 : vector<8x64xf32>
    %251 = math.tanh %250 : vector<8x64xf32>
    %252 = arith.mulf %245, %251 : vector<8x64xf32>
    %253 = vector.extract_strided_slice %230 {offsets = [8, 0], sizes = [8, 256], strides = [1, 1]} : vector<24x256xf32> to vector<8x256xf32>
    %254 = arith.truncf %252 : vector<8x64xf32> to vector<8x64xbf16>
    %cst_72 = arith.constant dense<0.000000e+00> : vector<8x256xf32>
    %255 = tpu.matmul %254, %231, %cst_72 {dimension_numbers = #tpu.dot_dimension_numbers<[1], [0], [0], [1], [0, 0, 1, 1], [], []>} : vector<8x64xbf16>, vector<64x256xbf16>, vector<8x256xf32> -> vector<8x256xf32>
    %256 = arith.addf %253, %255 : vector<8x256xf32>
    %257 = arith.negf %256 : vector<8x256xf32>
    %258 = math.exp %257 : vector<8x256xf32>
    %cst_73 = arith.constant 1.000000e+00 : f32
    %259 = vector.broadcast %cst_73 : f32 to vector<8x256xf32>
    %260 = arith.addf %259, %258 : vector<8x256xf32>
    %261 = arith.divf %259, %260 : vector<8x256xf32>
    %262 = vector.extract_strided_slice %261 {offsets = [0, 0], sizes = [8, 64], strides = [1, 1]} : vector<8x256xf32> to vector<8x64xf32>
    %263 = vector.extract_strided_slice %261 {offsets = [0, 64], sizes = [8, 64], strides = [1, 1]} : vector<8x256xf32> to vector<8x64xf32>
    %264 = vector.extract_strided_slice %261 {offsets = [0, 192], sizes = [8, 64], strides = [1, 1]} : vector<8x256xf32> to vector<8x64xf32>
    %265 = vector.extract_strided_slice %256 {offsets = [0, 128], sizes = [8, 64], strides = [1, 1]} : vector<8x256xf32> to vector<8x64xf32>
    %266 = math.tanh %265 : vector<8x64xf32>
    %267 = arith.mulf %263, %250 : vector<8x64xf32>
    %268 = arith.mulf %262, %266 : vector<8x64xf32>
    %269 = arith.addf %267, %268 : vector<8x64xf32>
    %270 = math.tanh %269 : vector<8x64xf32>
    %271 = arith.mulf %264, %270 : vector<8x64xf32>
    %272 = vector.extract_strided_slice %230 {offsets = [16, 0], sizes = [8, 256], strides = [1, 1]} : vector<24x256xf32> to vector<8x256xf32>
    %273 = arith.truncf %271 : vector<8x64xf32> to vector<8x64xbf16>
    %cst_74 = arith.constant dense<0.000000e+00> : vector<8x256xf32>
    %274 = tpu.matmul %273, %231, %cst_74 {dimension_numbers = #tpu.dot_dimension_numbers<[1], [0], [0], [1], [0, 0, 1, 1], [], []>} : vector<8x64xbf16>, vector<64x256xbf16>, vector<8x256xf32> -> vector<8x256xf32>
    %275 = arith.addf %272, %274 : vector<8x256xf32>
    %276 = arith.negf %275 : vector<8x256xf32>
    %277 = math.exp %276 : vector<8x256xf32>
    %cst_75 = arith.constant 1.000000e+00 : f32
    %278 = vector.broadcast %cst_75 : f32 to vector<8x256xf32>
    %279 = arith.addf %278, %277 : vector<8x256xf32>
    %280 = arith.divf %278, %279 : vector<8x256xf32>
    %281 = vector.extract_strided_slice %280 {offsets = [0, 0], sizes = [8, 64], strides = [1, 1]} : vector<8x256xf32> to vector<8x64xf32>
    %282 = vector.extract_strided_slice %280 {offsets = [0, 64], sizes = [8, 64], strides = [1, 1]} : vector<8x256xf32> to vector<8x64xf32>
    %283 = vector.extract_strided_slice %280 {offsets = [0, 192], sizes = [8, 64], strides = [1, 1]} : vector<8x256xf32> to vector<8x64xf32>
    %284 = vector.extract_strided_slice %275 {offsets = [0, 128], sizes = [8, 64], strides = [1, 1]} : vector<8x256xf32> to vector<8x64xf32>
    %285 = math.tanh %284 : vector<8x64xf32>
    %286 = arith.mulf %282, %269 : vector<8x64xf32>
    %287 = arith.mulf %281, %285 : vector<8x64xf32>
    %288 = arith.addf %286, %287 : vector<8x64xf32>
    %289 = math.tanh %288 : vector<8x64xf32>
    %290 = arith.mulf %283, %289 : vector<8x64xf32>
    %291 = tpu.concatenate %252, %271, %290 in 0 : vector<8x64xf32>, vector<8x64xf32>, vector<8x64xf32> -> vector<24x64xf32>
    %c192 = arith.constant 192 : index
    %c0_76 = arith.constant 0 : index
    %292 = vector.load %arg7[%c192, %c0_76] : memref<448x64xbf16, #tpu.memory_space<vmem>>, vector<64x64xbf16>
    %293 = arith.truncf %290 : vector<8x64xf32> to vector<8x64xbf16>
    %cst_77 = arith.constant dense<0.000000e+00> : vector<8x64xf32>
    %294 = tpu.matmul %293, %292, %cst_77 {dimension_numbers = #tpu.dot_dimension_numbers<[1], [0], [0], [1], [0, 0, 1, 1], [], []>} : vector<8x64xbf16>, vector<64x64xbf16>, vector<8x64xf32> -> vector<8x64xf32>
    %c6 = arith.constant 6 : index
    %c0_78 = arith.constant 0 : index
    %295 = vector.load %arg10[%c6, %c0_78] : memref<16x256xf32, #tpu.memory_space<vmem>>, vector<1x64xf32>
    %296 = vector.broadcast %295 : vector<1x64xf32> to vector<8x64xf32>
    %297 = arith.addf %294, %296 : vector<8x64xf32>
    %c256 = arith.constant 256 : index
    %c0_79 = arith.constant 0 : index
    %298 = vector.load %arg7[%c256, %c0_79] : memref<448x64xbf16, #tpu.memory_space<vmem>>, vector<64x64xbf16>
    %299 = arith.truncf %291 : vector<24x64xf32> to vector<24x64xbf16>
    %cst_80 = arith.constant dense<0.000000e+00> : vector<24x64xf32>
    %300 = tpu.matmul %299, %298, %cst_80 {dimension_numbers = #tpu.dot_dimension_numbers<[1], [0], [0], [1], [0, 0, 1, 1], [], []>} : vector<24x64xbf16>, vector<64x64xbf16>, vector<24x64xf32> -> vector<24x64xf32>
    %c7 = arith.constant 7 : index
    %c0_81 = arith.constant 0 : index
    %301 = vector.load %arg10[%c7, %c0_81] : memref<16x256xf32, #tpu.memory_space<vmem>>, vector<1x64xf32>
    %302 = vector.broadcast %301 : vector<1x64xf32> to vector<24x64xf32>
    %303 = arith.addf %300, %302 : vector<24x64xf32>
    %304 = tpu.concatenate %297, %297, %297 in 0 : vector<8x64xf32>, vector<8x64xf32>, vector<8x64xf32> -> vector<24x64xf32>
    %305 = arith.addf %303, %304 : vector<24x64xf32>
    %306 = math.tanh %305 : vector<24x64xf32>
    %c320 = arith.constant 320 : index
    %c0_82 = arith.constant 0 : index
    %307 = vector.load %arg7[%c320, %c0_82] : memref<448x64xbf16, #tpu.memory_space<vmem>>, vector<64x64xbf16>
    %308 = arith.truncf %306 : vector<24x64xf32> to vector<24x64xbf16>
    %cst_83 = arith.constant dense<0.000000e+00> : vector<24x64xf32>
    %309 = tpu.matmul %308, %307, %cst_83 {dimension_numbers = #tpu.dot_dimension_numbers<[1], [0], [0], [1], [0, 0, 1, 1], [], []>} : vector<24x64xbf16>, vector<64x64xbf16>, vector<24x64xf32> -> vector<24x64xf32>
    %c8 = arith.constant 8 : index
    %c0_84 = arith.constant 0 : index
    %310 = vector.load %arg10[%c8, %c0_84] : memref<16x256xf32, #tpu.memory_space<vmem>>, vector<1x64xf32>
    %311 = vector.broadcast %310 : vector<1x64xf32> to vector<24x64xf32>
    %312 = arith.addf %309, %311 : vector<24x64xf32>
    %313 = vector.extract_strided_slice %312 {offsets = [0, 0], sizes = [8, 64], strides = [1, 1]} : vector<24x64xf32> to vector<8x64xf32>
    %314 = vector.extract_strided_slice %312 {offsets = [8, 0], sizes = [8, 64], strides = [1, 1]} : vector<24x64xf32> to vector<8x64xf32>
    %315 = vector.extract_strided_slice %312 {offsets = [16, 0], sizes = [8, 64], strides = [1, 1]} : vector<24x64xf32> to vector<8x64xf32>
    %316 = arith.maximumf %313, %314 : vector<8x64xf32>
    %317 = arith.maximumf %316, %315 : vector<8x64xf32>
    %318 = arith.subf %313, %317 : vector<8x64xf32>
    %319 = math.exp %318 : vector<8x64xf32>
    %320 = arith.subf %314, %317 : vector<8x64xf32>
    %321 = math.exp %320 : vector<8x64xf32>
    %322 = arith.subf %315, %317 : vector<8x64xf32>
    %323 = math.exp %322 : vector<8x64xf32>
    %324 = arith.addf %319, %321 : vector<8x64xf32>
    %325 = arith.addf %324, %323 : vector<8x64xf32>
    %326 = tpu.reciprocal %325 {approx = true} : vector<8x64xf32> -> vector<8x64xf32>
    %cst_85 = arith.constant 0.000000e+00 : f32
    %327 = vector.broadcast %cst_85 : f32 to vector<8x64xf32>
    %328 = arith.mulf %319, %326 : vector<8x64xf32>
    %329 = arith.mulf %328, %252 : vector<8x64xf32>
    %330 = arith.addf %327, %329 : vector<8x64xf32>
    %331 = arith.mulf %321, %326 : vector<8x64xf32>
    %332 = arith.mulf %331, %271 : vector<8x64xf32>
    %333 = arith.addf %330, %332 : vector<8x64xf32>
    %334 = arith.mulf %323, %326 : vector<8x64xf32>
    %335 = arith.mulf %334, %290 : vector<8x64xf32>
    %336 = arith.addf %333, %335 : vector<8x64xf32>
    %c384 = arith.constant 384 : index
    %c0_86 = arith.constant 0 : index
    %337 = vector.load %arg7[%c384, %c0_86] : memref<448x64xbf16, #tpu.memory_space<vmem>>, vector<64x64xbf16>
    %338 = arith.truncf %336 : vector<8x64xf32> to vector<8x64xbf16>
    %cst_87 = arith.constant dense<0.000000e+00> : vector<8x64xf32>
    %339 = tpu.matmul %338, %337, %cst_87 {dimension_numbers = #tpu.dot_dimension_numbers<[1], [0], [0], [1], [0, 0, 1, 1], [], []>} : vector<8x64xbf16>, vector<64x64xbf16>, vector<8x64xf32> -> vector<8x64xf32>
    %c9 = arith.constant 9 : index
    %c0_88 = arith.constant 0 : index
    %340 = vector.load %arg10[%c9, %c0_88] : memref<16x256xf32, #tpu.memory_space<vmem>>, vector<1x64xf32>
    %341 = vector.broadcast %340 : vector<1x64xf32> to vector<8x64xf32>
    %342 = arith.addf %339, %341 : vector<8x64xf32>
    %cst_89 = arith.constant 0.000000e+00 : f32
    %343 = vector.broadcast %cst_89 : f32 to vector<8x64xf32>
    %344 = arith.maximumf %342, %343 : vector<8x64xf32>
    %c0_90 = arith.constant 0 : index
    %c0_91 = arith.constant 0 : index
    %345 = vector.load %arg8[%c0_90, %c0_91] : memref<64x128xbf16, #tpu.memory_space<vmem>>, vector<64x128xbf16>
    %346 = arith.truncf %344 : vector<8x64xf32> to vector<8x64xbf16>
    %cst_92 = arith.constant dense<0.000000e+00> : vector<8x128xf32>
    %347 = tpu.matmul %346, %345, %cst_92 {dimension_numbers = #tpu.dot_dimension_numbers<[1], [0], [0], [1], [0, 0, 1, 1], [], []>} : vector<8x64xbf16>, vector<64x128xbf16>, vector<8x128xf32> -> vector<8x128xf32>
    %c10 = arith.constant 10 : index
    %c0_93 = arith.constant 0 : index
    %348 = vector.load %arg10[%c10, %c0_93] : memref<16x256xf32, #tpu.memory_space<vmem>>, vector<1x128xf32>
    %349 = vector.broadcast %348 : vector<1x128xf32> to vector<8x128xf32>
    %350 = arith.addf %347, %349 : vector<8x128xf32>
    %c0_94 = arith.constant 0 : index
    %c0_95 = arith.constant 0 : index
    %351 = vector.load %arg0[%c0_94, %c0_95] : memref<8x16xf32, #tpu.memory_space<vmem>>, vector<8x16xf32>
    %c0_96 = arith.constant 0 : index
    %c0_97 = arith.constant 0 : index
    %352 = vector.load %arg9[%c0_96, %c0_97] : memref<240x64xbf16, #tpu.memory_space<vmem>>, vector<16x64xbf16>
    %353 = arith.truncf %351 : vector<8x16xf32> to vector<8x16xbf16>
    %cst_98 = arith.constant dense<0.000000e+00> : vector<8x64xf32>
    %354 = tpu.matmul %353, %352, %cst_98 {dimension_numbers = #tpu.dot_dimension_numbers<[1], [0], [0], [1], [0, 0, 1, 1], [], []>} : vector<8x16xbf16>, vector<16x64xbf16>, vector<8x64xf32> -> vector<8x64xf32>
    %c11 = arith.constant 11 : index
    %c0_99 = arith.constant 0 : index
    %355 = vector.load %arg10[%c11, %c0_99] : memref<16x256xf32, #tpu.memory_space<vmem>>, vector<1x64xf32>
    %356 = vector.broadcast %355 : vector<1x64xf32> to vector<8x64xf32>
    %357 = arith.addf %354, %356 : vector<8x64xf32>
    %cst_100 = arith.constant 0.000000e+00 : f32
    %358 = vector.broadcast %cst_100 : f32 to vector<8x64xf32>
    %359 = arith.maximumf %357, %358 : vector<8x64xf32>
    %c16 = arith.constant 16 : index
    %c0_101 = arith.constant 0 : index
    %360 = vector.load %arg9[%c16, %c0_101] : memref<240x64xbf16, #tpu.memory_space<vmem>>, vector<64x32xbf16>
    %361 = arith.truncf %359 : vector<8x64xf32> to vector<8x64xbf16>
    %cst_102 = arith.constant dense<0.000000e+00> : vector<8x32xf32>
    %362 = tpu.matmul %361, %360, %cst_102 {dimension_numbers = #tpu.dot_dimension_numbers<[1], [0], [0], [1], [0, 0, 1, 1], [], []>} : vector<8x64xbf16>, vector<64x32xbf16>, vector<8x32xf32> -> vector<8x32xf32>
    %c12 = arith.constant 12 : index
    %c0_103 = arith.constant 0 : index
    %363 = vector.load %arg10[%c12, %c0_103] : memref<16x256xf32, #tpu.memory_space<vmem>>, vector<1x32xf32>
    %364 = vector.broadcast %363 : vector<1x32xf32> to vector<8x32xf32>
    %365 = arith.addf %362, %364 : vector<8x32xf32>
    %c80 = arith.constant 80 : index
    %c0_104 = arith.constant 0 : index
    %366 = vector.load %arg9[%c80, %c0_104] : memref<240x64xbf16, #tpu.memory_space<vmem>>, vector<32x2xbf16>
    %367 = arith.truncf %365 : vector<8x32xf32> to vector<8x32xbf16>
    %cst_105 = arith.constant dense<0.000000e+00> : vector<8x2xf32>
    %368 = tpu.matmul %367, %366, %cst_105 {dimension_numbers = #tpu.dot_dimension_numbers<[1], [0], [0], [1], [0, 0, 1, 1], [], []>} : vector<8x32xbf16>, vector<32x2xbf16>, vector<8x2xf32> -> vector<8x2xf32>
    %c112 = arith.constant 112 : index
    %c0_106 = arith.constant 0 : index
    %369 = vector.load %arg9[%c112, %c0_106] : memref<240x64xbf16, #tpu.memory_space<vmem>>, vector<128x2xbf16>
    %370 = arith.truncf %350 : vector<8x128xf32> to vector<8x128xbf16>
    %cst_107 = arith.constant dense<0.000000e+00> : vector<8x2xf32>
    %371 = tpu.matmul %370, %369, %cst_107 {dimension_numbers = #tpu.dot_dimension_numbers<[1], [0], [0], [1], [0, 0, 1, 1], [], []>} : vector<8x128xbf16>, vector<128x2xbf16>, vector<8x2xf32> -> vector<8x2xf32>
    %372 = arith.addf %368, %371 : vector<8x2xf32>
    %c13 = arith.constant 13 : index
    %c0_108 = arith.constant 0 : index
    %373 = vector.load %arg10[%c13, %c0_108] : memref<16x256xf32, #tpu.memory_space<vmem>>, vector<1x2xf32>
    %374 = vector.broadcast %373 : vector<1x2xf32> to vector<8x2xf32>
    %375 = arith.addf %372, %374 : vector<8x2xf32>
    %376 = vector.extract_strided_slice %375 {offsets = [0, 0], sizes = [2, 2], strides = [1, 1]} : vector<8x2xf32> to vector<2x2xf32>
    %377 = math.tanh %376 : vector<2x2xf32>
    %c0_109 = arith.constant 0 : index
    %c0_110 = arith.constant 0 : index
    %378 = vector.load %arg11[%c0_109, %c0_110] : memref<2x2xf32, #tpu.memory_space<vmem>>, vector<2x2xf32>
    tpu.vector_store %arg11[%c0_109, %c0_110], %377 {strides = array<i32>} : memref<2x2xf32, #tpu.memory_space<vmem>>, vector<2x2xf32>,
    return
  }
}

</mosaic_0001>

<bundles_post_ra>
// kernel: tpu_custom_call.1
= control target key start
LH: loop header
LB: loop body
LE: loop exit
PB: predicated region body
PF: predicated region fallthrough
CT: control target
= control target key end

     0   :  { %vm4564_vm0 = vcmask 130048   ;;  %s4552_s0 = inlined_call_operand.vmem [shape: f32[8,16], index: 0, kind: input, shape index: {}]   ;;  %s4553_s1 = inlined_call_operand.vmem [shape: f32[96,16], index: 1, kind: input, shape index: {}]   ;;  %s4554_s2 = inlined_call_operand.vmem [shape: f32[4,24,64], index: 2, kind: input, shape index: {}]   ;;  %s4555_s3 = inlined_call_operand.vmem [shape: f32[24,64], index: 3, kind: input, shape index: {}]   ;;  %s4556_s4 = inlined_call_operand.vmem [shape: bf16[128,320], index: 4, kind: input, shape index: {}]   ;;  %s4557_s5 = inlined_call_operand.vmem [shape: bf16[16,256], index: 5, kind: input, shape index: {}]   ;;  %s4558_s6 = inlined_call_operand.vmem [shape: bf16[128,256], index: 6, kind: input, shape index: {}]   ;;  %s4559_s7 = inlined_call_operand.vmem [shape: bf16[448,64], index: 7, kind: input, shape index: {}]   ;;  %s4560_s8 = inlined_call_operand.vmem [shape: bf16[64,128], index: 8, kind: input, shape index: {}]   ;;  %s4561_s9 = inlined_call_operand.vmem [shape: bf16[240,64], index: 9, kind: input, shape index: {}]   ;;  %s4562_s10 = inlined_call_operand.vmem [shape: f32[16,256], index: 10, kind: input, shape index: {}]   ;;  %s4563_s11 = inlined_call_operand.hbm [shape: f32[2,2], index: 11, kind: output, shape index: {}]  }
   0x1   :  { %v2599_v0 = vld [vmem:[%s4556_s4 + $0xa8] sm:$0xf]  ;;  %v2954_v1 = vld [vmem:[%s4556_s4 + $0xb0] sm:$0xf0]  ;;  %v2953_v2 = vld [vmem:[%s4556_s4 + $0xac] sm:$0xf] }
   0x2   :  { %v3378_v3 = vor.u32 %v2954_v1, %v2599_v0  ;;  %v2601_v4 = vld [vmem:[%s4556_s4 + $0xb4] sm:$0xf0]  ;;  %v2587_v5 = vld [vmem:[%s4556_s4 + $0x90] sm:$0xf]  ;;  %v2951_v6 = vld [vmem:[%s4556_s4 + $0x98] sm:$0xf0] }
   0x3   :  { %v3389_v7 = vor.u32 %v2953_v2, %v2601_v4  ;;  %v2950_v8 = vld [vmem:[%s4556_s4 + $0x94] sm:$0xf]  ;;  %v2589_v9 = vld [vmem:[%s4556_s4 + $0x9c] sm:$0xf0]  ;;  %v3398_v10 = vor.u32 %v2951_v6, %v2587_v5  ;;  %v2575_v12 = vld [vmem:[%s4556_s4 + $0x78] sm:$0xf] }
   0x4   :  { %339 = vmatpush.bf16.msra.mxu2 %v3378_v3  ;;  %v3401_v11 = vor.u32 %v2950_v8, %v2589_v9  ;;  %v2948_v13 = vld [vmem:[%s4556_s4 + $0x80] sm:$0xf0]  ;;  %v2947_v14 = vld [vmem:[%s4556_s4 + $0x7c] sm:$0xf]  ;;  %v2577_v15 = vld [vmem:[%s4556_s4 + $0x84] sm:$0xf0] }
   0x5   :  { %357 = vmatpush.bf16.msra.mxu3 %v3389_v7  ;;  %v3416_v16 = vor.u32 %v2948_v13, %v2575_v12  ;;  %v2563_v17 = vld [vmem:[%s4556_s4 + $0x60] sm:$0xf]  ;;  %v2945_v18 = vld [vmem:[%s4556_s4 + $0x68] sm:$0xf0]  ;;  %v3425_v19 = vor.u32 %v2947_v14, %v2577_v15  ;;  %v2931_v21 = vld [vmem:[%s4557_s5 + $0x4] sm:$0xf0] }
   0x6   :  { %v2495_v20 = vld [vmem:[%s4557_s5] sm:$0xf]  ;;  %v2930_v22 = vld [vmem:[%s4557_s5 + $0x4] sm:$0xf]  ;;  %v2565_v24 = vld [vmem:[%s4556_s4 + $0x6c] sm:$0xf0]  ;;  %v3449_v29 = vor.u32 %v2945_v18, %v2563_v17 }
   0x7   :  { %v2944_v23 = vld [vmem:[%s4556_s4 + $0x64] sm:$0xf]  ;;  %v2496_v25 = vor.u32 %v2931_v21, %v2495_v20  ;;  %v2497_v26 = vld [vmem:[%s4557_s5 + $0x8] sm:$0xf0]  ;;  %v2551_v32 = vld [vmem:[%s4556_s4 + $0x48] sm:$0xf] }
   0x8   :  { %340 = vmatpush.bf16.msra.mxu2 %v3398_v10  ;;  %v2500_v27 = vor.u32 %v2930_v22, %v2497_v26  ;;  %v40_v28 = vld [vmem:[%s4553_s1] sm:$0xff]  ;;  %v41_v30 = vld [vmem:[%s4553_s1 + $0x8] sm:$0xff]  ;;  %v3455_v31 = vor.u32 %v2944_v23, %v2565_v24  ;;  %v2942_v33 = vld [vmem:[%s4556_s4 + $0x50] sm:$0xf0] }
   0x9   :  { %358 = vmatpush.bf16.msra.mxu3 %v3401_v11  ;;  %103 = vmatpush.bf16.msra.mxu0 %v2496_v25  ;;  %v54_v34 = vpack.c.bf16 %v41_v30, %v40_v28  ;;  %v2941_v35 = vld [vmem:[%s4556_s4 + $0x4c] sm:$0xf]  ;;  %v2553_v36 = vld [vmem:[%s4556_s4 + $0x54] sm:$0xf0]  ;;  %v3473_v37 = vor.u32 %v2942_v33, %v2551_v32 }
   0xa   :  { %139 = vmatpush.bf16.msra.mxu1 %v2500_v27 }
   0xc   :  { %341 = vmatpush.bf16.msra.mxu2 %v3416_v16  ;;  %2501 = vmatmul.msk.bf16.vlgmr.msra.gmra.mxu0 %vm4564_vm0, %v54_v34 }
   0xd   :  { %359 = vmatpush.bf16.msra.mxu3 %v3425_v19  ;;  %813 = vmatpush.bf16.msrb.mxu0 %v3378_v3 }
   0xe   :  { %831 = vmatpush.bf16.msrb.mxu1 %v3389_v7 }
   0xf   :  { %2507 = vmatmul.msk.bf16.vlgmr.msra.gmra.mxu1 %vm4564_vm0, %v54_v34 }
  0x10   :  { %342 = vmatpush.bf16.msra.mxu2 %v3449_v29 }
  0x11   :  { %16 = vsyncpa [#allocation3], 0  ;;  %360 = vmatpush.bf16.msra.mxu3 %v3455_v31  ;;  %v3477_v38 = vor.u32 %v2941_v35, %v2553_v36  ;;  %v2539_v39 = vld [vmem:[%s4556_s4 + $0x30] sm:$0xf]  ;;  %v2939_v40 = vld [vmem:[%s4556_s4 + $0x38] sm:$0xf0]  ;;  %814 = vmatpush.bf16.msrb.mxu0 %v3398_v10 }
  0x12   :  { %v2938_v41 = vld [vmem:[%s4556_s4 + $0x34] sm:$0xf]  ;;  %v2541_v42 = vld [vmem:[%s4556_s4 + $0x3c] sm:$0xf0]  ;;  %832 = vmatpush.bf16.msrb.mxu1 %v3401_v11  ;;  %v3494_v43 = vor.u32 %v2939_v40, %v2539_v39  ;;  %v2527_v45 = vld [vmem:[%s4556_s4 + $0x18] sm:$0xf] }
  0x13   :  { %v3497_v44 = vor.u32 %v2938_v41, %v2541_v42  ;;  %v2936_v46 = vld [vmem:[%s4556_s4 + $0x20] sm:$0xf0]  ;;  %v2935_v47 = vld [vmem:[%s4556_s4 + $0x1c] sm:$0xf]  ;;  %v2529_v48 = vld [vmem:[%s4556_s4 + $0x24] sm:$0xf0] }
  0x14   :  { %343 = vmatpush.bf16.msra.mxu2 %v3473_v37  ;;  %v3514_v49 = vor.u32 %v2936_v46, %v2527_v45  ;;  %v42_v50 = vld [vmem:[%s4553_s1 + $0x10] sm:$0xff]  ;;  %v43_v51 = vld [vmem:[%s4553_s1 + $0x18] sm:$0xff]  ;;  %v3523_v52 = vor.u32 %v2935_v47, %v2529_v48  ;;  %v2515_v53 = vld [vmem:[%s4556_s4] sm:$0xf]  ;;  %v3305_v5 = vmov 0.0|0.0   ;;  %s3306_s14 = smov 64  }
  0x15   :  { %361 = vmatpush.bf16.msra.mxu3 %v3477_v38  ;;  %815 = vmatpush.bf16.msrb.mxu0 %v3416_v16  ;;  %v2933_v54 = vld [vmem:[%s4556_s4 + $0x8] sm:$0xf0]  ;;  %v2932_v55 = vld [vmem:[%s4556_s4 + $0x4] sm:$0xf]  ;;  %v2517_v56 = vld [vmem:[%s4556_s4 + $0xc] sm:$0xf0]  ;;  %v55_v59 = vpack.c.bf16 %v43_v51, %v42_v50 }
  0x16   :  { %833 = vmatpush.bf16.msrb.mxu1 %v3425_v19  ;;  %v2607_v57 = vld [vmem:[%s4556_s4 + $0xb0] sm:$0xf]  ;;  %v2955_v58 = vld [vmem:[%s4556_s4 + $0xb8] sm:$0xf0]  ;;  %v2516_v60 = vor.u32 %v2933_v54, %v2515_v53  ;;  %v3547_v61 = vor.u32 %v2932_v55, %v2517_v56  ;;  %v2595_v63 = vld [vmem:[%s4556_s4 + $0x98] sm:$0xf] }
  0x17   :  { %v3549_v62 = vor.u32 %v2955_v58, %v2607_v57  ;;  %v2952_v0 = vld [vmem:[%s4556_s4 + $0xa0] sm:$0xf0]  ;;  %v2583_v2 = vld [vmem:[%s4556_s4 + $0x80] sm:$0xf]  ;;  %v2949_v4 = vld [vmem:[%s4556_s4 + $0x88] sm:$0xf0] }
  0x18   :  { %344 = vmatpush.bf16.msra.mxu2 %v3494_v43  ;;  %v3563_v1 = vor.u32 %v2952_v0, %v2595_v63  ;;  %v2584_v6 = vor.u32 %v2949_v4, %v2583_v2  ;;  %v2571_v8 = vld [vmem:[%s4556_s4 + $0x68] sm:$0xf]  ;;  %v2946_v9 = vld [vmem:[%s4556_s4 + $0x70] sm:$0xf0]  ;;  %v2559_v12 = vld [vmem:[%s4556_s4 + $0x50] sm:$0xf] }
  0x19   :  { %362 = vmatpush.bf16.msra.mxu3 %v3497_v44  ;;  %816 = vmatpush.bf16.msrb.mxu0 %v3449_v29  ;;  %v2943_v13 = vld [vmem:[%s4556_s4 + $0x58] sm:$0xf0]  ;;  %v2547_v14 = vld [vmem:[%s4556_s4 + $0x38] sm:$0xf]  ;;  %v2940_v15 = vld [vmem:[%s4556_s4 + $0x40] sm:$0xf0] }
  0x1a   :  { %834 = vmatpush.bf16.msrb.mxu1 %v3455_v31  ;;  %v2548_v17 = vor.u32 %v2940_v15, %v2547_v14  ;;  %v2937_v18 = vld [vmem:[%s4556_s4 + $0x28] sm:$0xf0]  ;;  %v2523_v21 = vld [vmem:[%s4556_s4 + $0x8] sm:$0xf]  ;;  %v2934_v22 = vld [vmem:[%s4556_s4 + $0x10] sm:$0xf0] }
  0x1b   :  { %v2524_v23 = vor.u32 %v2934_v22, %v2523_v21  ;;  %v2492_v24 = vld [vmem:[%s4562_s10 + $0x1] ss:$8 sm:$0x3]  ;;  %s3308_s22 = smov [#allocation2]   ;;  %s2483_s24 = sshll.u32 %s4563_s11, 4  ;;  %s2484_s24 = int_to_ptr.hbm [resolvable:$true] %s2483_s24 }
  0x1c   :  { %345 = vmatpush.bf16.msra.mxu2 %v3514_v49  ;;  %2502 = vmatmul.msk.bf16.gmra.mxu0 %vm4564_vm0, %v55_v59  ;;  %v3629_v26 = vperm.slane %v2492_v24, 0  ;;  %v3631_v28 = vperm.slane %v2492_v24, 1 }
  0x1d   :  { %363 = vmatpush.bf16.msra.mxu3 %v3523_v52  ;;  %817 = vmatpush.bf16.msrb.mxu0 %v3473_v37 }
  0x1e   :  { %835 = vmatpush.bf16.msrb.mxu1 %v3477_v38 }
  0x1f   :  { %2508 = vmatmul.msk.bf16.gmra.mxu1 %vm4564_vm0, %v55_v59 }
  0x20   :  { %346 = vmatpush.bf16.msra.mxu2 %v2516_v60 }
  0x21   :  { %364 = vmatpush.bf16.msra.mxu3 %v3547_v61  ;;  %818 = vmatpush.bf16.msrb.mxu0 %v3494_v43 }
  0x22   :  { %836 = vmatpush.bf16.msrb.mxu1 %v3497_v44 }
  0x23   :  { %347 = vmatmul.bf16.vlgmr.msra.gmra.mxu2 %v3305_v5 }
  0x24   :  { %375 = vmatpush.bf16.msrb.mxu2 %v3549_v62  ;;  %365 = vmatmul.bf16.vlgmr.msra.gmra.mxu3 %v3305_v5 }
  0x25   :  { %576 = vmatpush.bf16.msrb.mxu3 %v3378_v3  ;;  %819 = vmatpush.bf16.msrb.mxu0 %v3514_v49  ;;  %v2572_v3 = vor.u32 %v2946_v9, %v2571_v8 }
  0x26   :  { %837 = vmatpush.bf16.msrb.mxu1 %v3523_v52 }
  0x28   :  { %376 = vmatpush.bf16.msrb.mxu2 %v3563_v1 }
  0x29   :  { %577 = vmatpush.bf16.msrb.mxu3 %v3398_v10  ;;  %820 = vmatpush.bf16.msrb.mxu0 %v2516_v60  ;;  %v2560_v10 = vor.u32 %v2943_v13, %v2559_v12 }
  0x2a   :  { %838 = vmatpush.bf16.msrb.mxu1 %v3547_v61 }
  0x2c   :  { %377 = vmatpush.bf16.msrb.mxu2 %v2584_v6 }
  0x2d   :  { %578 = vmatpush.bf16.msrb.mxu3 %v3416_v16  ;;  %v2535_v16 = vld [vmem:[%s4556_s4 + $0x20] sm:$0xf] }
  0x2e   :  { %v2536_v20 = vor.u32 %v2937_v18, %v2535_v16 }
  0x30   :  { %378 = vmatpush.bf16.msrb.mxu2 %v2572_v3 }
  0x31   :  { %579 = vmatpush.bf16.msrb.mxu3 %v3449_v29 }
  0x33   :  { %352 = vmatmul.bf16.gmra.mxu2 %v3305_v5 }
  0x34   :  { %379 = vmatpush.bf16.msrb.mxu2 %v2560_v10  ;;  %370 = vmatmul.bf16.gmra.mxu3 %v3305_v5 }
  0x35   :  { %580 = vmatpush.bf16.msrb.mxu3 %v3473_v37 }
  0x38   :  { %380 = vmatpush.bf16.msrb.mxu2 %v2548_v17 }
  0x39   :  { %581 = vmatpush.bf16.msrb.mxu3 %v3494_v43 }
  0x3c   :  { %381 = vmatpush.bf16.msrb.mxu2 %v2536_v20 }
  0x3d   :  { %582 = vmatpush.bf16.msrb.mxu3 %v3514_v49 }
  0x40   :  { %382 = vmatpush.bf16.msrb.mxu2 %v2524_v23 }
  0x41   :  { %583 = vmatpush.bf16.msrb.mxu3 %v2516_v60 }
  0x43   :  { %383 = vmatmul.bf16.vlgmr.msrb.gmra.mxu2 %v3305_v5 }
  0x44   :  { %594 = vmatpush.bf16.msra.mxu2 %v3389_v7 }
  0x45   :  { %612 = vmatpush.bf16.msra.mxu3 %v3549_v62 }
  0x48   :  { %595 = vmatpush.bf16.msra.mxu2 %v3401_v11 }
  0x49   :  { %613 = vmatpush.bf16.msra.mxu3 %v3563_v1 }
  0x4c   :  { %596 = vmatpush.bf16.msra.mxu2 %v3425_v19 }
  0x4d   :  { %614 = vmatpush.bf16.msra.mxu3 %v2584_v6 }
  0x50   :  { %597 = vmatpush.bf16.msra.mxu2 %v3455_v31 }
  0x51   :  { %615 = vmatpush.bf16.msra.mxu3 %v2572_v3 }
  0x53   :  { %388 = vmatmul.bf16.gmra.mxu2 %v3305_v5 }
  0x54   :  { %598 = vmatpush.bf16.msra.mxu2 %v3477_v38 }
  0x55   :  { %616 = vmatpush.bf16.msra.mxu3 %v2560_v10 }
  0x58   :  { %599 = vmatpush.bf16.msra.mxu2 %v3497_v44 }
  0x59   :  { %617 = vmatpush.bf16.msra.mxu3 %v2548_v17 }
  0x5c   :  { %600 = vmatpush.bf16.msra.mxu2 %v3523_v52 }
  0x5d   :  { %618 = vmatpush.bf16.msra.mxu3 %v2536_v20 }
  0x60   :  { %601 = vmatpush.bf16.msra.mxu2 %v3547_v61 }
  0x61   :  { %619 = vmatpush.bf16.msra.mxu3 %v2524_v23 }
  0x64   :  { %849 = vmatpush.bf16.msrb.mxu2 %v3549_v62 }
  0x68   :  { %850 = vmatpush.bf16.msrb.mxu2 %v3563_v1 }
  0x6c   :  { %851 = vmatpush.bf16.msrb.mxu2 %v2584_v6 }
  0x70   :  { %852 = vmatpush.bf16.msrb.mxu2 %v2572_v3 }
  0x74   :  { %853 = vmatpush.bf16.msrb.mxu2 %v2560_v10 }
  0x78   :  { %854 = vmatpush.bf16.msrb.mxu2 %v2548_v17 }
  0x7c   :  { %855 = vmatpush.bf16.msrb.mxu2 %v2536_v20 }
  0x80   :  { %856 = vmatpush.bf16.msrb.mxu2 %v2524_v23 }
  0x89   :  { %v105_v25 = vpop.f32.mrf.mxu0 }
  0x8a   :  { %v106_v29 = vadd.f32 %v105_v25, %v3629_v26 }
  0x8c   :  { %v141_v27 = vpop.f32.mrf.mxu1 }
  0x8d   :  { %v142_v30 = vadd.f32 %v141_v27, %v3631_v28 }
  0x91   :  { %v107_v35 = vpop.f32.mrf.mxu0 }
  0x92   :  { %v108_v41 = vadd.f32 %v107_v35, %v3629_v26 }
  0x94   :  { %v143_v37 = vpop.f32.mrf.mxu1 }
  0x95   :  { %v144_v42 = vadd.f32 %v143_v37, %v3631_v28  ;;  %v3654_v37 = vld [vmem:[%s4562_s10] ss:$0 sm:$0xff] }
  0x99   :  { %v110_v48 = vpop.f32.mrf.mxu0 }
  0x9a   :  { %v111_v57 = vadd.f32 %v110_v48, %v3629_v26 }
  0x9c   :  { %v146_v51 = vpop.f32.mrf.mxu1 }
  0x9d   :  { %v147_v58 = vadd.f32 %v146_v51, %v3631_v28 }
  0xa6   :  { %v348_v32 = vpop.f32.mrf.mxu2 }
  0xa7   :  { %v411_v33 = vadd.f32 %v348_v32, %v106_v29  ;;  %v366_v34 = vpop.f32.mrf.mxu3 }
  0xa8   :  { %v412_v36 = vadd.f32 %v366_v34, %v142_v30 }
  0xa9   :  { %v2609_v39 = vmul.f32 -1.442695, %v411_v33 }
  0xaa   :  { %v2610_v40 = vmul.f32 -1.442695, %v412_v36 }
  0xab   :  { %3053 = vpow2.f32 %v2609_v39 }
  0xac   :  { %3055 = vpow2.f32 %v2610_v40 }
  0xae   :  { %v350_v43 = vpop.f32.mrf.mxu2 }
  0xaf   :  { %v413_v45 = vadd.f32 %v350_v43, %v108_v41  ;;  %v368_v46 = vpop.f32.mrf.mxu3 }
  0xb0   :  { %v414_v47 = vadd.f32 %v368_v46, %v144_v42 }
  0xb1   :  { %v3054_v49 = vpop.eup %3053  ;;  %v2611_v50 = vmul.f32 -1.442695, %v413_v45 }
  0xb2   :  { %v3056_v53 = vpop.eup %3055  ;;  %v435_v54 = vadd.f32 1.0, %v3054_v49  ;;  %v2612_v55 = vmul.f32 -1.442695, %v414_v47 }
  0xb3   :  { %v436_v56 = vadd.f32 1.0, %v3056_v53  ;;  %3057 = vpow2.f32 %v2611_v50 }
  0xb4   :  { %3059 = vrcp.f32 %v435_v54  ;;  %v450_v15 = vand.u32 2147483647, %v435_v54  ;;  %v452_v17 = vand.u32 2147483648, %v435_v54  ;;  %vm446_vm3 = vweird.f32 %v435_v54 }
  0xb5   :  { %3061 = vrcp.f32 %v436_v56  ;;  %v465_v16 = vand.u32 2147483647, %v436_v56  ;;  %v467_v20 = vand.u32 2147483648, %v436_v56  ;;  %vm461_vm4 = vweird.f32 %v436_v56 }
  0xb6   :  { %3063 = vpow2.f32 %v2612_v55  ;;  %v353_v59 = vpop.f32.mrf.mxu2  ;;  %vm451_vm6 = vcmp.eq.f32.partialorder %v450_v15, 8.507059e+37  ;;  %v453_v29 = vor.u32 1.1754944e-38, %v452_v17 }
  0xb7   :  { %v415_v60 = vadd.f32 %v353_v59, %v111_v57  ;;  %v371_v62 = vpop.f32.mrf.mxu3  ;;  %vm466_vm8 = vcmp.eq.f32.partialorder %v465_v16, 8.507059e+37  ;;  %v468_v34 = vor.u32 1.1754944e-38, %v467_v20 }
  0xb8   :  { %v416_v63 = vadd.f32 %v371_v62, %v147_v58 }
  0xb9   :  { %v3058_v0 = vpop.eup %3057  ;;  %v2613_v1 = vmul.f32 -1.442695, %v415_v60 }
  0xba   :  { %v3060_v2 = vpop.eup %3059  ;;  %v3639_v4 = vadd.f32 1.0, %v3058_v0  ;;  %v2614_v5 = vmul.f32 -1.442695, %v416_v63 }
  0xbb   :  { %v3062_v6 = vpop.eup %3061  ;;  %3065 = vpow2.f32 %v2613_v1  ;;  %v442_v8 = vmul.f32 %v3060_v2, %v435_v54  ;;  %vm447_vm1 = vweird.f32 %v3060_v2 }
  0xbc   :  { %v3064_v9 = vpop.eup %3063  ;;  %v457_v3 = vmul.f32 %v3062_v6, %v436_v56  ;;  %3067 = vrcp.f32 %v3639_v4  ;;  %vm462_vm2 = vweird.f32 %v3062_v6  ;;  %vm448_vm5 = vmor %vm446_vm3, %vm447_vm1  ;;  %v480_v45 = vand.u32 2147483647, %v3639_v4 }
  0xbd   :  { %v3642_v12 = vadd.f32 1.0, %v3064_v9  ;;  %3069 = vpow2.f32 %v2614_v5  ;;  %v443_v13 = vsub.f32 1.0, %v442_v8  ;;  %vm463_vm7 = vmor %vm461_vm4, %vm462_vm2  ;;  %v482_v46 = vand.u32 2147483648, %v3639_v4 }
  0xbe   :  { %v458_v10 = vsub.f32 1.0, %v457_v3  ;;  %v355_v14 = vpop.f32.mrf.mxu2  ;;  %vm476_vm10 = vweird.f32 %v3639_v4  ;;  %vm3671_vm11 = vcmp.eq.f32.partialorder %v480_v45, 8.507059e+37 }
  0xbf   :  { %3071 = vrcp.f32 %v3642_v12  ;;  %v444_v18 = vmul.f32 %v3060_v2, %v443_v13  ;;  %v373_v21 = vpop.f32.mrf.mxu3  ;;  %v495_v50 = vand.u32 2147483647, %v3642_v12  ;;  %v497_v54 = vand.u32 2147483648, %v3642_v12  ;;  %v402_v13 = vld [vmem:[%s4554_s2] sm:$0xff] }
  0xc0   :  { %v459_v22 = vmul.f32 %v3062_v6, %v458_v10  ;;  %v483_v60 = vor.u32 1.1754944e-38, %v482_v46  ;;  %vm491_vm13 = vweird.f32 %v3642_v12 }
  0xc1   :  { %v3066_v23 = vpop.eup %3065  ;;  %v445_v24 = vadd.f32 %v3060_v2, %v444_v18  ;;  %vm3682_vm15 = vcmp.eq.f32.partialorder %v495_v50, 8.507059e+37  ;;  %v498_v1 = vor.u32 1.1754944e-38, %v497_v54 }
  0xc2   :  { %v3068_v25 = vpop.eup %3067  ;;  %v3645_v27 = vadd.f32 1.0, %v3066_v23  ;;  %v460_v30 = vadd.f32 %v3062_v6, %v459_v22 }
  0xc3   :  { %v3070_v32 = vpop.eup %3069  ;;  %v449_v33 = vsel %vm448_vm5, %v3060_v2, %v445_v24  ;;  %v472_v35 = vmul.f32 %v3068_v25, %v3639_v4  ;;  %vm477_vm9 = vweird.f32 %v3068_v25 }
  0xc4   :  { %3073 = vrcp.f32 %v3645_v27  ;;  %v3649_v36 = vadd.f32 1.0, %v3070_v32  ;;  %v3656_v39 = vsel %vm451_vm6, %v453_v29, %v449_v33  ;;  %v464_v40 = vsel %vm463_vm7, %v3062_v6, %v460_v30  ;;  %vm3675_vm12 = vmor %vm476_vm10, %vm477_vm9 }
  0xc5   :  { %v3072_v41 = vpop.eup %3071  ;;  %v3658_v42 = vsel %vm466_vm8, %v468_v34, %v464_v40  ;;  %v473_v43 = vsub.f32 1.0, %v472_v35  ;;  %vm506_vm1 = vweird.f32 %v3645_v27  ;;  %v510_v6 = vand.u32 2147483647, %v3645_v27 }
  0xc6   :  { %v487_v47 = vmul.f32 %v3072_v41, %v3642_v12  ;;  %3075 = vrcp.f32 %v3649_v36  ;;  %v384_v48 = vpop.f32.mrf.mxu2  ;;  %v534_v49 = vmul.f32 %v3658_v42, %v3656_v39  ;;  %vm492_vm14 = vweird.f32 %v3072_v41 }
  0xc7   :  { %v393_v51 = vadd.f32 %v384_v48, %v3654_v37  ;;  %v474_v53 = vmul.f32 %v3068_v25, %v473_v43  ;;  %v512_v8 = vand.u32 2147483648, %v3645_v27  ;;  %vm493_vm2 = vmor %vm491_vm13, %vm492_vm14  ;;  %vm521_vm4 = vweird.f32 %v3649_v36 }
  0xc8   :  { %v488_v55 = vsub.f32 1.0, %v487_v47  ;;  %540 = vrot.lane.b32.xlu0 %v534_v49, %s3306_s14  ;;  %v525_v15 = vand.u32 2147483647, %v3649_v36  ;;  %v527_v17 = vand.u32 2147483648, %v3649_v36  ;;  %vm511_vm7 = vcmp.eq.f32.partialorder %v510_v6, 8.507059e+37  ;;  %v404_v49 = vld [vmem:[%s4554_s2 + $0x10] sm:$0xff] }
  0xc9   :  { %3077 = vtanh.f32 %v393_v51  ;;  %v475_v56 = vadd.f32 %v3068_v25, %v474_v53  ;;  %v513_v23 = vor.u32 1.1754944e-38, %v512_v8  ;;  %v44_v6 = vld [vmem:[%s4553_s1 + $0x20] sm:$0xff]  ;;  %v45_v8 = vld [vmem:[%s4553_s1 + $0x28] sm:$0xff]  ;;  %vm570_vm10 = vcmask 523264  }
  0xca   :  { %v3074_v58 = vpop.eup %3073  ;;  %v489_v62 = vmul.f32 %v3072_v41, %v488_v55  ;;  %v528_v32 = vor.u32 1.1754944e-38, %v527_v17  ;;  %vm526_vm9 = vcmp.eq.f32.partialorder %v525_v15, 8.507059e+37 }
  0xcb   :  { %v479_v63 = vsel %vm3675_vm12, %v3068_v25, %v475_v56  ;;  %v502_v2 = vmul.f32 %v3074_v58, %v3645_v27  ;;  %vm507_vm3 = vweird.f32 %v3074_v58  ;;  %v403_v56 = vld [vmem:[%s4554_s2 + $0x8] sm:$0xff] }
  0xcc   :  { %v3076_v4 = vpop.eup %3075  ;;  %v490_v5 = vadd.f32 %v3072_v41, %v489_v62  ;;  %v484_v3 = vsel %vm3671_vm11, %v483_v60, %v479_v63  ;;  %vm508_vm6 = vmor %vm506_vm1, %vm507_vm3 }
  0xcd   :  { %v517_v9 = vmul.f32 %v3076_v4, %v3649_v36  ;;  %v503_v12 = vsub.f32 1.0, %v502_v2  ;;  %vm522_vm5 = vweird.f32 %v3076_v4 }
  0xce   :  { %v386_v10 = vpop.f32.mrf.mxu2  ;;  %v494_v14 = vsel %vm493_vm2, %v3072_v41, %v490_v5  ;;  %vm523_vm8 = vmor %vm521_vm4, %vm522_vm5 }
  0xcf   :  { %v3078_v16 = vpop.eup %3077  ;;  %v518_v18 = vsub.f32 1.0, %v517_v9  ;;  %v3701_v20 = vsel %vm3682_vm15, %v498_v1, %v494_v14  ;;  %v504_v21 = vmul.f32 %v3074_v58, %v503_v12  ;;  %v394_v54 = vadd.f32 %v386_v10, %v3654_v37 }
  0xd0   :  { %v535_v22 = vmul.f32 %v3701_v20, %v484_v3  ;;  %v399_v24 = vsub.f32 0.0, %v3078_v16  ;;  %v405_v25 = vmul.f32 %v3078_v16, %v402_v13  ;;  %v56_v9 = vpack.c.bf16 %v45_v8, %v44_v6 }
  0xd1   :  { %v505_v29 = vadd.f32 %v3074_v58, %v504_v21  ;;  %v519_v30 = vmul.f32 %v3076_v4, %v518_v18 }
  0xd2   :  { %542 = vrot.lane.b32.xlu0 %v535_v22, %s3306_s14  ;;  %v408_v33 = vadd.f32 %v405_v25, %v399_v24  ;;  %2503 = vmatmul.msk.bf16.gmra.mxu0 %vm4564_vm0, %v56_v9 }
  0xd3   :  { %v509_v34 = vsel %vm508_vm6, %v3074_v58, %v505_v29  ;;  %v520_v35 = vadd.f32 %v3076_v4, %v519_v30  ;;  %2509 = vmatmul.msk.bf16.gmra.mxu1 %vm4564_vm0, %v56_v9 }
  0xd4   :  { %v514_v40 = vsel %vm511_vm7, %v513_v23, %v509_v34  ;;  %v531_v27 = vmul.f32 %v3656_v39, %v408_v33 }
  0xd5   :  { %v524_v41 = vsel %vm523_vm8, %v3076_v4, %v520_v35 }
  0xd6   :  { %v3710_v43 = vsel %vm526_vm9, %v528_v32, %v524_v41  ;;  %v389_v45 = vpop.f32.mrf.mxu2 }
  0xd7   :  { %v536_v46 = vmul.f32 %v3710_v43, %v514_v40  ;;  %v395_v36 = vadd.f32 %v389_v45, %v3654_v37 }
  0xd9   :  { %544 = vrot.lane.b32.xlu1 %v536_v46, %s3306_s14  ;;  %3079 = vtanh.f32 %v395_v36 }
  0xda   :  { %3081 = vtanh.f32 %v394_v54 }
  0xde   :  { %v391_v47 = vpop.f32.mrf.mxu2 }
  0xdf   :  { %v3080_v48 = vpop.eup %3079 }
  0xe0   :  { %v401_v50 = vsub.f32 0.0, %v3080_v48  ;;  %v407_v51 = vmul.f32 %v3080_v48, %v404_v49  ;;  %v3082_v55 = vpop.eup %3081 }
  0xe1   :  { %v400_v58 = vsub.f32 0.0, %v3082_v55  ;;  %v406_v59 = vmul.f32 %v3082_v55, %v403_v56 }
  0xe2   :  { %v410_v39 = vadd.f32 %v407_v51, %v401_v50 }
  0xe3   :  { %v409_v60 = vadd.f32 %v406_v59, %v400_v58 }
  0xe4   :  { %v533_v53 = vmul.f32 %v514_v40, %v410_v39 }
  0xe5   :  { %v532_v62 = vmul.f32 %v484_v3, %v409_v60 }
 0x13a   :  { %v541_v57 = vpop.permute.xlu0 %540 }
 0x13b   :  { %v3722_v0 = vadd.f32 %v541_v57, %v531_v27 }
 0x13d   :  { %3083 = vtanh.f32 %v3722_v0 }
 0x143   :  { %v3084_v3 = vpop.eup %3083 }
 0x144   :  { %v543_v63 = vpop.permute.xlu0 %542  ;;  %v555_v15 = vmul.f32 %v3084_v3, %v3658_v42 }
 0x145   :  { %v3724_v1 = vadd.f32 %v543_v63, %v532_v62 }
 0x147   :  { %v3038_v2 = vpack.i.bf16 %v3724_v1, %v3722_v0  ;;  %3085 = vtanh.f32 %v3724_v1 }
 0x149   :  { %3039 = vrot.lane.b32.xlu1 %v3038_v2, %s3306_s14 }
 0x14b   :  { %v545_v4 = vpop.permute.xlu1 %544 }
 0x14c   :  { %v3729_v5 = vadd.f32 %v545_v4, %v533_v53 }
 0x14d   :  { %v3086_v12 = vpop.eup %3085 }
 0x14e   :  { %565 = vrot.lane.b32.xlu2 %v3729_v5, %s3306_s14  ;;  %v556_v17 = vmul.f32 %v3086_v12, %v3701_v20  ;;  %3087 = vtanh.f32 %v3729_v5 }
 0x154   :  { %v3088_v22 = vpop.eup %3087 }
 0x155   :  { %v557_v24 = vmul.f32 %v3088_v22, %v3710_v43 }
 0x1a8   :  { %v566_v23 = vpop.permute.xlu2 %565 }
 0x1a9   :  { %v573_v25 = vsel %vm570_vm10, %v557_v24, %v566_v23 }
 0x1aa   :  { %v575_v29 = vpack.c.bf16 %v573_v25, %v573_v25 }
 0x1bb   :  { %v3040_v13 = vpop.permute.xlu1 %3039 }
 0x1bc   :  { %v3042_v10 = vunpack.i.h.bf16 %v3040_v13  ;;  %v3041_v14 = vunpack.i.l.bf16 %v3040_v13 }
 0x1be   :  { %v571_v16 = vsel %vm570_vm10, %v555_v15, %v3041_v14  ;;  %v572_v18 = vsel %vm570_vm10, %v556_v17, %v3042_v10 }
 0x1bf   :  { %v574_v21 = vpack.c.bf16 %v572_v18, %v571_v16 }
 0x1c1   :  { %584 = vmatmul.bf16.vlgmr.msrb.gmra.mxu3 %v574_v21  ;;  %602 = vmatmul.bf16.vlgmr.msra.gmra.mxu2 %v574_v21 }
 0x1c2   :  { %1050 = vmatpush.bf16.msrb.mxu3 %v3389_v7  ;;  %v112_v7 = vpop.f32.mrf.mxu0 }
 0x1c6   :  { %1051 = vmatpush.bf16.msrb.mxu3 %v3401_v11  ;;  %v148_v11 = vpop.f32.mrf.mxu1 }
 0x1c7   :  { %v149_v30 = vadd.f32 %v148_v11, %v3631_v28 }
 0x1ca   :  { %1052 = vmatpush.bf16.msrb.mxu3 %v3425_v19  ;;  %v113_v19 = vadd.f32 %v112_v7, %v3629_v26  ;;  %v115_v35 = vpop.f32.mrf.mxu0 }
 0x1ce   :  { %1053 = vmatpush.bf16.msrb.mxu3 %v3455_v31 }
 0x1d1   :  { %589 = vmatmul.bf16.gmra.mxu3 %v575_v29  ;;  %607 = vmatmul.bf16.gmra.mxu2 %v575_v29 }
 0x1d2   :  { %1054 = vmatpush.bf16.msrb.mxu3 %v3477_v38  ;;  %v151_v38 = vpop.f32.mrf.mxu1  ;;  %v117_v50 = vpop.f32.mrf.mxu0 }
 0x1d3   :  { %v118_v54 = vadd.f32 %v117_v50, %v3629_v26 }
 0x1d6   :  { %1055 = vmatpush.bf16.msrb.mxu3 %v3497_v44 }
 0x1da   :  { %1056 = vmatpush.bf16.msrb.mxu3 %v3523_v52  ;;  %v116_v52 = vadd.f32 %v115_v35, %v3629_v26  ;;  %v153_v51 = vpop.f32.mrf.mxu1 }
 0x1db   :  { %v154_v55 = vadd.f32 %v153_v51, %v3631_v28 }
 0x1de   :  { %1057 = vmatpush.bf16.msrb.mxu3 %v3547_v61  ;;  %v152_v61 = vadd.f32 %v151_v38, %v3631_v28 }
 0x1e1   :  { %620 = vmatmul.bf16.vlgmr.msra.gmra.mxu3 %v574_v21 }
 0x1f1   :  { %625 = vmatmul.bf16.gmra.mxu3 %v575_v29 }
 0x244   :  { %v585_v31 = vpop.f32.mrf.mxu3  ;;  %v603_v32 = vpop.f32.mrf.mxu2 }
 0x245   :  { %v649_v33 = vadd.f32 %v585_v31, %v113_v19  ;;  %v650_v34 = vadd.f32 %v603_v32, %v149_v30 }
 0x247   :  { %v2618_v40 = vmul.f32 -1.442695, %v649_v33  ;;  %v2619_v44 = vmul.f32 -1.442695, %v650_v34 }
 0x249   :  { %3089 = vpow2.f32 %v2618_v40 }
 0x24a   :  { %3091 = vpow2.f32 %v2619_v44 }
 0x24c   :  { %v587_v27 = vpop.f32.mrf.mxu3  ;;  %v605_v41 = vpop.f32.mrf.mxu2 }
 0x24d   :  { %v651_v45 = vadd.f32 %v587_v27, %v116_v52  ;;  %v652_v46 = vadd.f32 %v605_v41, %v152_v61 }
 0x24f   :  { %v3090_v47 = vpop.eup %3089  ;;  %v2620_v36 = vmul.f32 -1.442695, %v651_v45  ;;  %v2621_v39 = vmul.f32 -1.442695, %v652_v46 }
 0x250   :  { %v3092_v48 = vpop.eup %3091  ;;  %v673_v49 = vadd.f32 1.0, %v3090_v47 }
 0x251   :  { %v674_v53 = vadd.f32 1.0, %v3092_v48  ;;  %3093 = vpow2.f32 %v2620_v36 }
 0x252   :  { %3095 = vrcp.f32 %v673_v49  ;;  %v688_v17 = vand.u32 2147483647, %v673_v49  ;;  %v690_v16 = vand.u32 2147483648, %v673_v49  ;;  %vm684_vm13 = vweird.f32 %v673_v49 }
 0x253   :  { %3097 = vrcp.f32 %v674_v53  ;;  %v703_v18 = vand.u32 2147483647, %v674_v53  ;;  %v705_v22 = vand.u32 2147483648, %v674_v53  ;;  %vm699_vm14 = vweird.f32 %v674_v53 }
 0x254   :  { %3099 = vpow2.f32 %v2621_v39  ;;  %v590_v56 = vpop.f32.mrf.mxu3  ;;  %v608_v57 = vpop.f32.mrf.mxu2  ;;  %vm689_vm1 = vcmp.eq.f32.partialorder %v688_v17, 8.507059e+37  ;;  %v691_v11 = vor.u32 1.1754944e-38, %v690_v16 }
 0x255   :  { %v653_v58 = vadd.f32 %v590_v56, %v118_v54  ;;  %v654_v59 = vadd.f32 %v608_v57, %v154_v55  ;;  %vm704_vm3 = vcmp.eq.f32.partialorder %v703_v18, 8.507059e+37  ;;  %v706_v32 = vor.u32 1.1754944e-38, %v705_v22 }
 0x257   :  { %v3094_v60 = vpop.eup %3093  ;;  %v2622_v62 = vmul.f32 -1.442695, %v653_v58  ;;  %v2623_v63 = vmul.f32 -1.442695, %v654_v59 }
 0x258   :  { %v3096_v2 = vpop.eup %3095  ;;  %v3764_v4 = vadd.f32 1.0, %v3094_v60 }
 0x259   :  { %v3098_v6 = vpop.eup %3097  ;;  %v680_v8 = vmul.f32 %v3096_v2, %v673_v49  ;;  %3101 = vpow2.f32 %v2622_v62  ;;  %vm685_vm11 = vweird.f32 %v3096_v2 }
 0x25a   :  { %v3100_v9 = vpop.eup %3099  ;;  %v695_v3 = vmul.f32 %v3098_v6, %v674_v53  ;;  %3103 = vrcp.f32 %v3764_v4  ;;  %vm700_vm12 = vweird.f32 %v3098_v6  ;;  %vm686_vm15 = vmor %vm684_vm13, %vm685_vm11  ;;  %v718_v45 = vand.u32 2147483647, %v3764_v4 }
 0x25b   :  { %v3767_v12 = vadd.f32 1.0, %v3100_v9  ;;  %3105 = vpow2.f32 %v2623_v63  ;;  %v681_v13 = vsub.f32 1.0, %v680_v8  ;;  %vm701_vm2 = vmor %vm699_vm14, %vm700_vm12  ;;  %v720_v36 = vand.u32 2147483648, %v3764_v4 }
 0x25c   :  { %v696_v10 = vsub.f32 1.0, %v695_v3  ;;  %v592_v14 = vpop.f32.mrf.mxu3  ;;  %v610_v15 = vpop.f32.mrf.mxu2  ;;  %vm714_vm5 = vweird.f32 %v3764_v4  ;;  %vm719_vm7 = vcmp.eq.f32.partialorder %v718_v45, 8.507059e+37  ;;  %v2617_v45 = vld [vmem:[%s4554_s2 + $0x28] sm:$0xff] }
 0x25d   :  { %3107 = vrcp.f32 %v3767_v12  ;;  %v682_v21 = vmul.f32 %v3096_v2, %v681_v13  ;;  %v733_v49 = vand.u32 2147483647, %v3767_v12  ;;  %v735_v50 = vand.u32 2147483648, %v3767_v12 }
 0x25e   :  { %v697_v23 = vmul.f32 %v3098_v6, %v696_v10  ;;  %v721_v56 = vor.u32 1.1754944e-38, %v720_v36  ;;  %vm729_vm9 = vweird.f32 %v3767_v12 }
 0x25f   :  { %v3102_v24 = vpop.eup %3101  ;;  %v683_v25 = vadd.f32 %v3096_v2, %v682_v21  ;;  %vm3793_vm11 = vcmp.eq.f32.partialorder %v733_v49, 8.507059e+37  ;;  %v736_v60 = vor.u32 1.1754944e-38, %v735_v50 }
 0x260   :  { %v3104_v29 = vpop.eup %3103  ;;  %v3770_v7 = vadd.f32 1.0, %v3102_v24  ;;  %v698_v19 = vadd.f32 %v3098_v6, %v697_v23 }
 0x261   :  { %v3106_v30 = vpop.eup %3105  ;;  %v687_v31 = vsel %vm686_vm15, %v3096_v2, %v683_v25  ;;  %v710_v33 = vmul.f32 %v3104_v29, %v3764_v4  ;;  %vm715_vm4 = vweird.f32 %v3104_v29 }
 0x262   :  { %3109 = vrcp.f32 %v3770_v7  ;;  %v3774_v34 = vadd.f32 1.0, %v3106_v30  ;;  %v3776_v35 = vsel %vm689_vm1, %v691_v11, %v687_v31  ;;  %v702_v38 = vsel %vm701_vm2, %v3098_v6, %v698_v19  ;;  %vm716_vm6 = vmor %vm714_vm5, %vm715_vm4  ;;  %v2615_v6 = vld [vmem:[%s4554_s2 + $0x18] sm:$0xff] }
 0x263   :  { %v3108_v40 = vpop.eup %3107  ;;  %v3778_v44 = vsel %vm704_vm3, %v706_v32, %v702_v38  ;;  %v711_v52 = vsub.f32 1.0, %v710_v33  ;;  %vm744_vm12 = vweird.f32 %v3770_v7  ;;  %v748_v4 = vand.u32 2147483647, %v3770_v7  ;;  %v2616_v33 = vld [vmem:[%s4554_s2 + $0x20] sm:$0xff] }
 0x264   :  { %v725_v61 = vmul.f32 %v3108_v40, %v3767_v12  ;;  %3111 = vrcp.f32 %v3774_v34  ;;  %v621_v27 = vpop.f32.mrf.mxu3  ;;  %v772_v41 = vmul.f32 %v3778_v44, %v3776_v35  ;;  %vm730_vm8 = vweird.f32 %v3108_v40 }
 0x265   :  { %v630_v46 = vadd.f32 %v621_v27, %v3654_v37  ;;  %v712_v47 = vmul.f32 %v3104_v29, %v711_v52  ;;  %vm731_vm13 = vmor %vm729_vm9, %vm730_vm8  ;;  %v750_v3 = vand.u32 2147483648, %v3770_v7  ;;  %v763_v12 = vand.u32 2147483647, %v3774_v34 }
 0x266   :  { %v726_v48 = vsub.f32 1.0, %v725_v61  ;;  %778 = vrot.lane.b32.xlu2 %v772_v41, %s3306_s14  ;;  %v765_v18 = vand.u32 2147483648, %v3774_v34  ;;  %vm749_vm2 = vcmp.eq.f32.partialorder %v748_v4, 8.507059e+37  ;;  %vm759_vm3 = vweird.f32 %v3774_v34 }
 0x267   :  { %3113 = vtanh.f32 %v630_v46  ;;  %v713_v51 = vadd.f32 %v3104_v29, %v712_v47  ;;  %v751_v25 = vor.u32 1.1754944e-38, %v750_v3  ;;  %vm764_vm5 = vcmp.eq.f32.partialorder %v763_v12, 8.507059e+37 }
 0x268   :  { %v3110_v39 = vpop.eup %3109  ;;  %v727_v53 = vmul.f32 %v3108_v40, %v726_v48 }
 0x269   :  { %v740_v54 = vmul.f32 %v3110_v39, %v3770_v7  ;;  %v717_v55 = vsel %vm716_vm6, %v3104_v29, %v713_v51  ;;  %vm745_vm14 = vweird.f32 %v3110_v39  ;;  %v47_v51 = vld [vmem:[%s4553_s1 + $0x38] sm:$0xff] }
 0x26a   :  { %v3112_v57 = vpop.eup %3111  ;;  %v728_v58 = vadd.f32 %v3108_v40, %v727_v53  ;;  %v722_v63 = vsel %vm719_vm7, %v721_v56, %v717_v55  ;;  %vm746_vm1 = vmor %vm744_vm12, %vm745_vm14  ;;  %v49_v53 = vld [vmem:[%s4553_s1 + $0x48] sm:$0xff] }
 0x26b   :  { %v755_v62 = vmul.f32 %v3112_v57, %v3774_v34  ;;  %v741_v2 = vsub.f32 1.0, %v740_v54  ;;  %vm760_vm15 = vweird.f32 %v3112_v57 }
 0x26c   :  { %v623_v8 = vpop.f32.mrf.mxu3  ;;  %v732_v9 = vsel %vm731_vm13, %v3108_v40, %v728_v58  ;;  %vm761_vm4 = vmor %vm759_vm3, %vm760_vm15 }
 0x26d   :  { %v3114_v13 = vpop.eup %3113  ;;  %v756_v10 = vsub.f32 1.0, %v755_v62  ;;  %v631_v14 = vadd.f32 %v623_v8, %v3654_v37  ;;  %v3808_v15 = vsel %vm3793_vm11, %v736_v60, %v732_v9  ;;  %v742_v17 = vmul.f32 %v3110_v39, %v741_v2  ;;  %v50_v60 = vld [vmem:[%s4553_s1 + $0x50] sm:$0xff]  ;;  %v51_v62 = vld [vmem:[%s4553_s1 + $0x58] sm:$0xff] }
 0x26e   :  { %v773_v16 = vmul.f32 %v3808_v15, %v722_v63  ;;  %v636_v21 = vsub.f32 %v3722_v0, %v3114_v13  ;;  %v643_v22 = vmul.f32 %v3114_v13, %v2615_v6  ;;  %v766_v0 = vor.u32 1.1754944e-38, %v765_v18 }
 0x26f   :  { %v757_v23 = vmul.f32 %v3112_v57, %v756_v10  ;;  %3115 = vtanh.f32 %v631_v14  ;;  %v743_v24 = vadd.f32 %v3110_v39, %v742_v17  ;;  %v59_v4 = vpack.c.bf16 %v51_v62, %v50_v60  ;;  %v2963_v14 = vld [vmem:[%s4559_s7 + $0x38] sm:$0xff] }
 0x270   :  { %780 = vrot.lane.b32.xlu0 %v773_v16, %s3306_s14  ;;  %v646_v29 = vadd.f32 %v643_v22, %v636_v21  ;;  %1302 = vmatpush.bf16.msra.mxu1 %v2963_v14  ;;  %v2962_v21 = vld [vmem:[%s4559_s7 + $0x30] sm:$0xff]  ;;  %v2961_v22 = vld [vmem:[%s4559_s7 + $0x28] sm:$0xff] }
 0x271   :  { %v747_v11 = vsel %vm746_vm1, %v3110_v39, %v743_v24  ;;  %v758_v19 = vadd.f32 %v3112_v57, %v757_v23  ;;  %v2960_v23 = vld [vmem:[%s4559_s7 + $0x20] sm:$0xff] }
 0x272   :  { %v752_v30 = vsel %vm749_vm2, %v751_v25, %v747_v11  ;;  %v769_v31 = vmul.f32 %v3776_v35, %v646_v29 }
 0x273   :  { %v762_v32 = vsel %vm761_vm4, %v3112_v57, %v758_v19 }
 0x274   :  { %v626_v7 = vpop.f32.mrf.mxu3  ;;  %v3822_v38 = vsel %vm764_vm5, %v766_v0, %v762_v32  ;;  %1303 = vmatpush.bf16.msra.mxu1 %v2962_v21  ;;  %v1249_v0 = vpack.c.bf16 %v3701_v20, %v3658_v42 }
 0x275   :  { %v3116_v40 = vpop.eup %3115  ;;  %v632_v52 = vadd.f32 %v626_v7, %v3654_v37  ;;  %v774_v61 = vmul.f32 %v3822_v38, %v752_v30 }
 0x276   :  { %v637_v34 = vsub.f32 %v3724_v1, %v3116_v40  ;;  %v644_v27 = vmul.f32 %v3116_v40, %v2616_v33  ;;  %v46_v1 = vld [vmem:[%s4553_s1 + $0x30] sm:$0xff]  ;;  %v1250_v33 = vpack.c.bf16 %v3778_v44, %v3710_v43 }
 0x277   :  { %3117 = vtanh.f32 %v632_v52  ;;  %782 = vrot.lane.b32.xlu1 %v774_v61, %s3306_s14  ;;  %v57_v39 = vpack.c.bf16 %v47_v51, %v46_v1  ;;  %v1251_v61 = vpack.c.bf16 %v3822_v38, %v3808_v15 }
 0x278   :  { %v647_v35 = vadd.f32 %v644_v27, %v637_v34  ;;  %1304 = vmatpush.bf16.msra.mxu1 %v2961_v22 }
 0x279   :  { %2504 = vmatmul.msk.bf16.gmra.mxu0 %vm4564_vm0, %v57_v39  ;;  %2510 = vmatmul.msk.bf16.gmra.mxu1 %vm4564_vm0, %v57_v39 }
 0x27a   :  { %v770_v41 = vmul.f32 %v722_v63, %v647_v35 }
 0x27c   :  { %v628_v46 = vpop.f32.mrf.mxu3  ;;  %1305 = vmatpush.bf16.msra.mxu1 %v2960_v23 }
 0x27d   :  { %v3118_v47 = vpop.eup %3117 }
 0x27e   :  { %v638_v36 = vsub.f32 %v3729_v5, %v3118_v47  ;;  %v645_v48 = vmul.f32 %v3118_v47, %v2617_v45  ;;  %v48_v5 = vld [vmem:[%s4553_s1 + $0x40] sm:$0xff]  ;;  %s2481_s1 = sshll.u32 %s3308_s22, 4  ;;  %s2482_s1 = int_to_ptr.vmem [resolvable:$true] %s2481_s1 }
 0x27f   :  { %v58_v54 = vpack.c.bf16 %v49_v53, %v48_v5 }
 0x280   :  { %v648_v49 = vadd.f32 %v645_v48, %v638_v36 }
 0x282   :  { %v771_v50 = vmul.f32 %v752_v30, %v648_v49 }
 0x289   :  { %2505 = vmatmul.msk.bf16.gmra.mxu0 %vm4564_vm0, %v58_v54  ;;  %2511 = vmatmul.msk.bf16.gmra.mxu1 %vm4564_vm0, %v58_v54 }
 0x299   :  { %2506 = vmatmul.msk.bf16.gmra.mxu0 %vm4564_vm0, %v59_v4  ;;  %2512 = vmatmul.msk.bf16.gmra.mxu1 %vm4564_vm0, %v59_v4 }
 0x2c0   :  { %v779_v55 = vpop.permute.xlu2 %778 }
 0x2c1   :  { %v3848_v57 = vadd.f32 %v779_v55, %v769_v31 }
 0x2c3   :  { %3119 = vtanh.f32 %v3848_v57 }
 0x2c9   :  { %v3120_v6 = vpop.eup %3119 }
 0x2ca   :  { %v793_v13 = vmul.f32 %v3120_v6, %v3778_v44 }
 0x2e2   :  { %v781_v56 = vpop.permute.xlu0 %780 }
 0x2e3   :  { %v3850_v58 = vadd.f32 %v781_v56, %v770_v41 }
 0x2e5   :  { %v3043_v59 = vpack.i.bf16 %v3850_v58, %v3848_v57  ;;  %3121 = vtanh.f32 %v3850_v58 }
 0x2e7   :  { %3044 = vrot.lane.b32.xlu2 %v3043_v59, %s3306_s14 }
 0x2e9   :  { %v783_v63 = vpop.permute.xlu1 %782 }
 0x2ea   :  { %v3861_v2 = vadd.f32 %v783_v63, %v771_v50 }
 0x2eb   :  { %v3122_v8 = vpop.eup %3121 }
 0x2ec   :  { %803 = vrot.lane.b32.xlu0 %v3861_v2, %s3306_s14  ;;  %v794_v10 = vmul.f32 %v3122_v8, %v3808_v15  ;;  %3123 = vtanh.f32 %v3861_v2 }
 0x2f2   :  { %v3124_v24 = vpop.eup %3123 }
 0x2f3   :  { %v795_v25 = vmul.f32 %v3124_v24, %v3822_v38 }
 0x2f6   :  { %v120_v30 = vpop.f32.mrf.mxu0  ;;  %v156_v40 = vpop.f32.mrf.mxu1 }
 0x2f7   :  { %v121_v47 = vadd.f32 %v120_v30, %v3629_v26  ;;  %v157_v36 = vadd.f32 %v156_v40, %v3631_v28 }
 0x2fe   :  { %v122_v31 = vpop.f32.mrf.mxu0  ;;  %v158_v27 = vpop.f32.mrf.mxu1 }
 0x2ff   :  { %v123_v5 = vadd.f32 %v122_v31, %v3629_v26  ;;  %v159_v53 = vadd.f32 %v158_v27, %v3631_v28 }
 0x306   :  { %v125_v32 = vpop.f32.mrf.mxu0  ;;  %v161_v35 = vpop.f32.mrf.mxu1 }
 0x307   :  { %v126_v21 = vadd.f32 %v125_v32, %v3629_v26  ;;  %v162_v31 = vadd.f32 %v161_v35, %v3631_v28 }
 0x30e   :  { %v127_v7 = vpop.f32.mrf.mxu0  ;;  %v3897_v41 = vpop.f32.mrf.mxu1 }
 0x316   :  { %v129_v52 = vpop.f32.mrf.mxu0  ;;  %v3899_v45 = vpop.f32.mrf.mxu1 }
 0x31e   :  { %v130_v34 = vpop.f32.mrf.mxu0  ;;  %v3901_v46 = vpop.f32.mrf.mxu1 }
 0x341   :  { %v3045_v9 = vpop.permute.xlu2 %3044 }
 0x342   :  { %v3047_v3 = vunpack.i.h.bf16 %v3045_v9  ;;  %v3046_v12 = vunpack.i.l.bf16 %v3045_v9 }
 0x344   :  { %v808_v17 = vsel %vm570_vm10, %v793_v13, %v3046_v12  ;;  %v809_v16 = vsel %vm570_vm10, %v794_v10, %v3047_v3 }
 0x345   :  { %v811_v18 = vpack.c.bf16 %v809_v16, %v808_v17 }
 0x347   :  { %821 = vmatmul.bf16.vlgmr.msrb.gmra.mxu0 %v811_v18  ;;  %839 = vmatmul.bf16.vlgmr.msrb.gmra.mxu1 %v811_v18 }
 0x348   :  { %857 = vmatmul.bf16.vlgmr.msrb.gmra.mxu2 %v811_v18 }
 0x35e   :  { %v804_v29 = vpop.permute.xlu0 %803 }
 0x35f   :  { %v810_v11 = vsel %vm570_vm10, %v795_v25, %v804_v29 }
 0x360   :  { %v812_v19 = vpack.c.bf16 %v810_v11, %v810_v11  ;;  %v2624_v11 = vld [vmem:[%s4554_s2 + $0x30] sm:$0xff] }
 0x362   :  { %826 = vmatmul.bf16.gmra.mxu0 %v812_v19  ;;  %844 = vmatmul.bf16.gmra.mxu1 %v812_v19 }
 0x363   :  { %862 = vmatmul.bf16.gmra.mxu2 %v812_v19 }
 0x372   :  { %2673 = vmatmul.msk.bf16.vlgmr.msra.gmra.mxu1 %vm570_vm10, %v1249_v0 }
 0x382   :  { %2674 = vmatmul.msk.bf16.gmra.mxu1 %vm570_vm10, %v1250_v33 }
 0x392   :  { %2675 = vmatmul.msk.bf16.gmra.mxu1 %vm570_vm10, %v1251_v61 }
 0x3c4   :  { %v822_v48 = vpop.f32.mrf.mxu0  ;;  %v840_v49 = vpop.f32.mrf.mxu1 }
 0x3c5   :  { %v886_v50 = vadd.f32 %v822_v48, %v121_v47  ;;  %v887_v1 = vadd.f32 %v840_v49, %v157_v36 }
 0x3c7   :  { %v2627_v51 = vmul.f32 -1.442695, %v886_v50  ;;  %v2628_v39 = vmul.f32 -1.442695, %v887_v1 }
 0x3c9   :  { %3125 = vpow2.f32 %v2627_v51 }
 0x3ca   :  { %3127 = vpow2.f32 %v2628_v39 }
 0x3cb   :  { %v858_v54 = vpop.f32.mrf.mxu2 }
 0x3cc   :  { %v867_v55 = vadd.f32 %v858_v54, %v3654_v37  ;;  %v824_v56 = vpop.f32.mrf.mxu0  ;;  %v842_v59 = vpop.f32.mrf.mxu1 }
 0x3cd   :  { %v888_v60 = vadd.f32 %v824_v56, %v123_v5  ;;  %v889_v62 = vadd.f32 %v842_v59, %v159_v53 }
 0x3ce   :  { %3129 = vtanh.f32 %v867_v55 }
 0x3cf   :  { %v3126_v63 = vpop.eup %3125  ;;  %v2629_v4 = vmul.f32 -1.442695, %v888_v60  ;;  %v2630_v9 = vmul.f32 -1.442695, %v889_v62  ;;  %v2625_v62 = vld [vmem:[%s4554_s2 + $0x38] sm:$0xff] }
 0x3d0   :  { %v3128_v6 = vpop.eup %3127  ;;  %v910_v8 = vadd.f32 1.0, %v3126_v63 }
 0x3d1   :  { %v911_v3 = vadd.f32 1.0, %v3128_v6  ;;  %3131 = vpow2.f32 %v2629_v4 }
 0x3d2   :  { %3133 = vrcp.f32 %v910_v8  ;;  %v925_v25 = vand.u32 2147483647, %v910_v8  ;;  %v927_v29 = vand.u32 2147483648, %v910_v8  ;;  %vm921_vm7 = vweird.f32 %v910_v8 }
 0x3d3   :  { %3135 = vrcp.f32 %v911_v3  ;;  %v860_v12 = vpop.f32.mrf.mxu2  ;;  %v940_v0 = vand.u32 2147483647, %v911_v3  ;;  %v942_v26 = vand.u32 2147483648, %v911_v3  ;;  %vm936_vm8 = vweird.f32 %v911_v3 }
 0x3d4   :  { %3137 = vpow2.f32 %v2630_v9  ;;  %v3130_v13 = vpop.eup %3129  ;;  %v868_v14 = vadd.f32 %v860_v12, %v3654_v37  ;;  %vm3921_vm11 = vcmp.eq.f32.partialorder %v925_v25, 8.507059e+37  ;;  %v928_v35 = vor.u32 1.1754944e-38, %v927_v29 }
 0x3d5   :  { %v873_v32 = vsub.f32 %v3848_v57, %v3130_v13  ;;  %v880_v40 = vmul.f32 %v3130_v13, %v2624_v11  ;;  %vm3925_vm12 = vcmp.eq.f32.partialorder %v940_v0, 8.507059e+37  ;;  %v943_v1 = vor.u32 1.1754944e-38, %v942_v26 }
 0x3d7   :  { %v3132_v10 = vpop.eup %3131  ;;  %v883_v54 = vadd.f32 %v880_v40, %v873_v32 }
 0x3d8   :  { %v3134_v17 = vpop.eup %3133  ;;  %v3909_v16 = vadd.f32 1.0, %v3132_v10 }
 0x3d9   :  { %v3136_v18 = vpop.eup %3135  ;;  %v917_v22 = vmul.f32 %v3134_v17, %v910_v8  ;;  %vm922_vm6 = vweird.f32 %v3134_v17 }
 0x3da   :  { %v3138_v23 = vpop.eup %3137  ;;  %v932_v24 = vmul.f32 %v3136_v18, %v911_v3  ;;  %3139 = vrcp.f32 %v3909_v16  ;;  %vm937_vm9 = vweird.f32 %v3136_v18  ;;  %vm923_vm13 = vmor %vm921_vm7, %vm922_vm6  ;;  %v955_v53 = vand.u32 2147483647, %v3909_v16 }
 0x3db   :  { %v3916_v19 = vadd.f32 1.0, %v3138_v23  ;;  %3141 = vtanh.f32 %v868_v14  ;;  %v918_v30 = vsub.f32 1.0, %v917_v22  ;;  %vm938_vm14 = vmor %vm936_vm8, %vm937_vm9  ;;  %v957_v8 = vand.u32 2147483648, %v3909_v16 }
 0x3dc   :  { %v933_v33 = vsub.f32 1.0, %v932_v24  ;;  %vm951_vm1 = vweird.f32 %v3909_v16  ;;  %vm956_vm4 = vcmp.eq.f32.partialorder %v955_v53, 8.507059e+37 }
 0x3dd   :  { %3143 = vrcp.f32 %v3916_v19  ;;  %v919_v7 = vmul.f32 %v3134_v17, %v918_v30  ;;  %v972_v24 = vand.u32 2147483648, %v3916_v19  ;;  %v958_v29 = vor.u32 1.1754944e-38, %v957_v8 }
 0x3de   :  { %v934_v52 = vmul.f32 %v3136_v18, %v933_v33  ;;  %vm966_vm5 = vweird.f32 %v3916_v19 }
 0x3df   :  { %v827_v61 = vpop.f32.mrf.mxu0  ;;  %v845_v34 = vpop.f32.mrf.mxu1  ;;  %v920_v27 = vadd.f32 %v3134_v17, %v919_v7  ;;  %v973_v7 = vor.u32 1.1754944e-38, %v972_v24 }
 0x3e0   :  { %v3140_v57 = vpop.eup %3139  ;;  %v890_v48 = vadd.f32 %v827_v61, %v126_v21  ;;  %v891_v49 = vadd.f32 %v845_v34, %v162_v31  ;;  %v935_v50 = vadd.f32 %v3136_v18, %v934_v52 }
 0x3e1   :  { %v3142_v51 = vpop.eup %3141  ;;  %v947_v39 = vmul.f32 %v3140_v57, %v3909_v16  ;;  %v924_v5 = vsel %vm923_vm13, %v3134_v17, %v920_v27  ;;  %vm952_vm15 = vweird.f32 %v3140_v57 }
 0x3e2   :  { %v2631_v55 = vmul.f32 -1.442695, %v890_v48  ;;  %v2632_v56 = vmul.f32 -1.442695, %v891_v49  ;;  %v929_v59 = vsel %vm3921_vm11, %v928_v35, %v924_v5  ;;  %v939_v60 = vsel %vm938_vm14, %v3136_v18, %v935_v50  ;;  %vm953_vm2 = vmor %vm951_vm1, %vm952_vm15  ;;  %v2626_v49 = vld [vmem:[%s4554_s2 + $0x40] sm:$0xff] }
 0x3e3   :  { %v3144_v63 = vpop.eup %3143  ;;  %v3941_v4 = vsel %vm3925_vm12, %v943_v1, %v939_v60  ;;  %v948_v6 = vsub.f32 1.0, %v947_v39  ;;  %v3944_v9 = vmul.f32 %v929_v59, %v883_v54  ;;  %v874_v13 = vsub.f32 %v3850_v58, %v3142_v51 }
 0x3e4   :  { %v962_v3 = vmul.f32 %v3144_v63, %v3916_v19  ;;  %3145 = vpow2.f32 %v2631_v55  ;;  %v1009_v12 = vmul.f32 %v3941_v4, %v929_v59  ;;  %v881_v14 = vmul.f32 %v3142_v51, %v2625_v62 }
 0x3e5   :  { %3147 = vpow2.f32 %v2632_v56  ;;  %v949_v10 = vmul.f32 %v3140_v57, %v948_v6  ;;  %vm967_vm3 = vweird.f32 %v3144_v63  ;;  %v970_v58 = vand.u32 2147483647, %v3916_v19 }
 0x3e6   :  { %v963_v17 = vsub.f32 1.0, %v962_v3  ;;  %1015 = vrot.lane.b32.xlu1 %v1009_v12, %s3306_s14  ;;  %v863_v18 = vpop.f32.mrf.mxu2  ;;  %v884_v30 = vadd.f32 %v881_v14, %v874_v13  ;;  %vm968_vm6 = vmor %vm966_vm5, %vm967_vm3 }
 0x3e7   :  { %v829_v21 = vpop.f32.mrf.mxu0  ;;  %v847_v22 = vpop.f32.mrf.mxu1  ;;  %v950_v23 = vadd.f32 %v3140_v57, %v949_v10  ;;  %v869_v16 = vadd.f32 %v863_v18, %v3654_v37  ;;  %vm971_vm7 = vcmp.eq.f32.partialorder %v970_v58, 8.507059e+37 }
 0x3e8   :  { %v964_v25 = vmul.f32 %v3144_v63, %v963_v17 }
 0x3e9   :  { %v954_v11 = vsel %vm953_vm2, %v3140_v57, %v950_v23 }
 0x3ea   :  { %v3146_v0 = vpop.eup %3145  ;;  %v959_v31 = vsel %vm956_vm4, %v958_v29, %v954_v11  ;;  %v965_v33 = vadd.f32 %v3144_v63, %v964_v25 }
 0x3eb   :  { %v3148_v26 = vpop.eup %3147  ;;  %v914_v32 = vadd.f32 1.0, %v3146_v0  ;;  %v1007_v40 = vmul.f32 %v959_v31, %v884_v30 }
 0x3ec   :  { %v915_v52 = vadd.f32 1.0, %v3148_v26  ;;  %v969_v61 = vsel %vm968_vm6, %v3144_v63, %v965_v33 }
 0x3ed   :  { %3149 = vrcp.f32 %v914_v32  ;;  %v3955_v34 = vsel %vm971_vm7, %v973_v7, %v969_v61  ;;  %v985_v51 = vand.u32 2147483647, %v914_v32  ;;  %v987_v39 = vand.u32 2147483648, %v914_v32 }
 0x3ee   :  { %3151 = vrcp.f32 %v915_v52  ;;  %v1010_v27 = vmul.f32 %v3955_v34, %v959_v31  ;;  %v1252_v47 = vpack.c.bf16 %v3955_v34, %v3941_v4  ;;  %v865_v19 = vpop.f32.mrf.mxu2  ;;  %v1002_v5 = vand.u32 2147483648, %v915_v52 }
 0x3ef   :  { %3153 = vtanh.f32 %v869_v16  ;;  %v1000_v59 = vand.u32 2147483647, %v915_v52  ;;  %vm981_vm11 = vweird.f32 %v914_v32  ;;  %v988_v62 = vor.u32 1.1754944e-38, %v987_v39 }
 0x3f0   :  { %1017 = vrot.lane.b32.xlu2 %v1010_v27, %s3306_s14  ;;  %2676 = vmatmul.msk.bf16.gmra.mxu1 %vm570_vm10, %v1252_v47  ;;  %vm996_vm13 = vweird.f32 %v915_v52  ;;  %vm986_vm14 = vcmp.eq.f32.partialorder %v985_v51, 8.507059e+37  ;;  %v1003_v8 = vor.u32 1.1754944e-38, %v1002_v5  ;;  %v164_v27 = vadd.f32 %v3897_v41, %v3631_v28  ;;  %v2959_v47 = vld [vmem:[%s4559_s7 + $0x18] sm:$0xff]  ;;  %v205_v41 = vld [vmem:[%s4555_s3 + $0x8] sm:$0xff] }
 0x3f1   :  { %vm1001_vm1 = vcmp.eq.f32.partialorder %v1000_v59, 8.507059e+37  ;;  %1227 = vmatpush.bf16.msra.mxu0 %v2959_v47  ;;  %v3025_v39 = vceil.f32 %v205_v41  ;;  %v3026_v5 = vfloor.f32 %v205_v41  ;;  %vm3024_vm3 = vcmp.lt.s32.totalorder %v205_v41, 0 }
 0x3f3   :  { %v3150_v37 = vpop.eup %3149 }
 0x3f4   :  { %v3152_v35 = vpop.eup %3151  ;;  %v977_v36 = vmul.f32 %v3150_v37, %v914_v32  ;;  %vm982_vm8 = vweird.f32 %v3150_v37 }
 0x3f5   :  { %v3154_v57 = vpop.eup %3153  ;;  %v992_v48 = vmul.f32 %v3152_v35, %v915_v52  ;;  %vm997_vm9 = vweird.f32 %v3152_v35  ;;  %vm983_vm12 = vmor %vm981_vm11, %vm982_vm8 }
 0x3f6   :  { %v978_v50 = vsub.f32 1.0, %v977_v36  ;;  %v875_v54 = vsub.f32 %v3861_v2, %v3154_v57  ;;  %v882_v55 = vmul.f32 %v3154_v57, %v2626_v49  ;;  %vm998_vm15 = vmor %vm996_vm13, %vm997_vm9  ;;  %v2958_v36 = vld [vmem:[%s4559_s7 + $0x10] sm:$0xff]  ;;  %v204_v57 = vld [vmem:[%s4555_s3] sm:$0xff] }
 0x3f7   :  { %v993_v1 = vsub.f32 1.0, %v992_v48  ;;  %1228 = vmatpush.bf16.msra.mxu0 %v2958_v36  ;;  %v167_v48 = vadd.f32 %v3899_v45, %v3631_v28  ;;  %v2957_v49 = vld [vmem:[%s4559_s7 + $0x8] sm:$0xff]  ;;  %vm3019_vm2 = vcmp.lt.s32.totalorder %v204_v57, 0 }
 0x3f8   :  { %v979_v53 = vmul.f32 %v3150_v37, %v978_v50  ;;  %v885_v3 = vadd.f32 %v882_v55, %v875_v54  ;;  %v3020_v50 = vceil.f32 %v204_v57  ;;  %v2956_v54 = vld [vmem:[%s4559_s7] sm:$0xff] }
 0x3f9   :  { %v994_v56 = vmul.f32 %v3152_v35, %v993_v1  ;;  %v3021_v1 = vfloor.f32 %v204_v57 }
 0x3fa   :  { %v980_v60 = vadd.f32 %v3150_v37, %v979_v53 }
 0x3fb   :  { %v995_v63 = vadd.f32 %v3152_v35, %v994_v56  ;;  %1229 = vmatpush.bf16.msra.mxu0 %v2957_v49  ;;  %v3022_v45 = vsel %vm3019_vm2, %v3020_v50, %v3021_v1 }
 0x3fc   :  { %v984_v6 = vsel %vm983_vm12, %v3150_v37, %v980_v60  ;;  %v3027_v60 = vsel %vm3024_vm3, %v3025_v39, %v3026_v5 }
 0x3fd   :  { %v989_v12 = vsel %vm986_vm14, %v988_v62, %v984_v6  ;;  %v999_v13 = vsel %vm998_vm15, %v3152_v35, %v995_v63  ;;  %v4001_v62 = vcvt.f32.s32 %v3022_v45  ;;  %v169_v63 = vadd.f32 %v3901_v46, %v3631_v28  ;;  %v206_v46 = vld [vmem:[%s4555_s3 + $0x10] sm:$0xff] }
 0x3fe   :  { %v3966_v10 = vsel %vm1001_vm1, %v1003_v8, %v999_v13  ;;  %v1008_v2 = vmul.f32 %v989_v12, %v885_v3  ;;  %v4005_v6 = vcvt.f32.s32 %v3027_v60  ;;  %vm3029_vm2 = vcmp.lt.s32.totalorder %v206_v46, 0 }
 0x3ff   :  { %v1011_v14 = vmul.f32 %v3966_v10, %v989_v12  ;;  %1230 = vmatpush.bf16.msra.mxu0 %v2956_v54  ;;  %v2636_v13 = vadd.s32 4294967295, %v4001_v62  ;;  %vm1134_vm5 = vcmp.ne.s32.totalorder %v4001_v62, 0 }
 0x400   :  { %vm1135_vm7 = vcmp.ne.s32.totalorder %v4005_v6, 0 }
 0x401   :  { %1019 = vrot.lane.b32.xlu0 %v1011_v14, %s3306_s14  ;;  %vm1131_vm4 = vcmp.eq.s32.totalorder %v2636_v13, 0  ;;  %vm1146_vm11 = vcmp.eq.s32.totalorder %v2636_v13, 1  ;;  %vm1158_vm1 = vcmp.eq.s32.totalorder %v2636_v13, 2 }
 0x402   :  { %vm4019_vm9 = vmand %vm1131_vm4, %vm1134_vm5 }
 0x403   :  { %vm4033_vm3 = vmand %vm1146_vm11, %vm1134_vm5  ;;  %vm1170_vm11 = vcmp.eq.s32.totalorder %v2636_v13, 3  ;;  %v1140_v49 = vsel %vm4019_vm9, %v3658_v42, 0.0 }
 0x44a   :  { %v1018_v17 = vpop.permute.xlu2 %1017 }
 0x44b   :  { %v1025_v21 = vadd.f32 %v1018_v17, %v1007_v40  ;;  %v2637_v17 = vadd.s32 4294967295, %v4005_v6 }
 0x44d   :  { %3155 = vtanh.f32 %v1025_v21  ;;  %vm1132_vm6 = vcmp.eq.s32.totalorder %v2637_v17, 0  ;;  %vm1147_vm13 = vcmp.eq.s32.totalorder %v2637_v17, 1  ;;  %vm1159_vm4 = vcmp.eq.s32.totalorder %v2637_v17, 2 }
 0x44e   :  { %vm4025_vm12 = vmand %vm1132_vm6, %vm1135_vm7 }
 0x44f   :  { %vm4041_vm0 = vmand %vm1147_vm13, %vm1135_vm7  ;;  %v1141_v50 = vsel %vm4025_vm12, %v3701_v20, 0.0 }
 0x450   :  { %vm4061_vm13 = vmand %vm1159_vm4, %vm1135_vm7  ;;  %v1153_v57 = vsel %vm4041_vm0, %v3808_v15, 0.0 }
 0x451   :  { %v1165_v39 = vsel %vm4061_vm13, %v3955_v34, 0.0 }
 0x453   :  { %v3156_v29 = vpop.eup %3155 }
 0x454   :  { %v1031_v30 = vmul.f32 %v3156_v29, %v3955_v34 }
 0x458   :  { %v1016_v18 = vpop.permute.xlu1 %1015 }
 0x459   :  { %v1024_v22 = vadd.f32 %v1016_v18, %v3944_v9 }
 0x45b   :  { %v3048_v23 = vpack.i.bf16 %v1025_v21, %v1024_v22  ;;  %3157 = vtanh.f32 %v1024_v22 }
 0x45d   :  { %3049 = vrot.lane.b32.xlu1 %v3048_v23, %s3306_s14 }
 0x461   :  { %v3158_v58 = vpop.eup %3157 }
 0x462   :  { %v1030_v0 = vmul.f32 %v3158_v58, %v3941_v4  ;;  %v3030_v58 = vceil.f32 %v206_v46 }
 0x473   :  { %v1020_v24 = vpop.permute.xlu0 %1019 }
 0x474   :  { %v1026_v25 = vadd.f32 %v1020_v24, %v1008_v2 }
 0x476   :  { %1040 = vrot.lane.b32.xlu2 %v1026_v25, %s3306_s14  ;;  %3159 = vtanh.f32 %v1026_v25 }
 0x47c   :  { %v3160_v16 = vpop.eup %3159 }
 0x47d   :  { %v1032_v40 = vmul.f32 %v3160_v16, %v3966_v10 }
 0x4cf   :  { %v3050_v11 = vpop.permute.xlu1 %3049 }
 0x4d0   :  { %v3052_v31 = vunpack.i.h.bf16 %v3050_v11  ;;  %v3051_v33 = vunpack.i.l.bf16 %v3050_v11  ;;  %v1041_v7 = vpop.permute.xlu2 %1040 }
 0x4d1   :  { %v1047_v52 = vsel %vm570_vm10, %v1032_v40, %v1041_v7  ;;  %v1307_v40 = vpop.f32.mrf.mxu1 }
 0x4d2   :  { %v1045_v9 = vsel %vm570_vm10, %v1030_v0, %v3051_v33  ;;  %v1046_v26 = vsel %vm570_vm10, %v1031_v30, %v3052_v31  ;;  %v1049_v61 = vpack.c.bf16 %v1047_v52, %v1047_v52  ;;  %v3031_v31 = vfloor.f32 %v206_v46 }
 0x4d3   :  { %v1048_v32 = vpack.c.bf16 %v1046_v26, %v1045_v9 }
 0x4d5   :  { %1058 = vmatmul.bf16.vlgmr.msrb.gmra.mxu3 %v1048_v32 }
 0x4e5   :  { %1063 = vmatmul.bf16.gmra.mxu3 %v1049_v61 }
 0x558   :  { %v1059_v19 = vpop.f32.mrf.mxu3 }
 0x559   :  { %v1068_v37 = vadd.f32 %v1059_v19, %v164_v27  ;;  %v3032_v19 = vsel %vm3029_vm2, %v3030_v58, %v3031_v31 }
 0x55b   :  { %v2633_v35 = vmul.f32 -1.442695, %v1068_v37  ;;  %v1152_v37 = vsel %vm4033_vm3, %v3778_v44, 0.0 }
 0x55d   :  { %3161 = vpow2.f32 %v2633_v35 }
 0x560   :  { %v1061_v51 = vpop.f32.mrf.mxu3 }
 0x561   :  { %v1069_v53 = vadd.f32 %v1061_v51, %v167_v48  ;;  %v4083_v51 = vcvt.f32.s32 %v3032_v19 }
 0x563   :  { %v3162_v55 = vpop.eup %3161  ;;  %v2634_v56 = vmul.f32 -1.442695, %v1069_v53  ;;  %vm1136_vm4 = vcmp.ne.s32.totalorder %v4083_v51, 0 }
 0x564   :  { %v1080_v59 = vadd.f32 1.0, %v3162_v55 }
 0x565   :  { %3163 = vpow2.f32 %v2634_v56  ;;  %v1156_v56 = vadd.f32 %v1153_v57, %v1141_v50 }
 0x566   :  { %3165 = vrcp.f32 %v1080_v59  ;;  %v1094_v23 = vand.u32 2147483648, %v1080_v59  ;;  %v1092_v25 = vand.u32 2147483647, %v1080_v59  ;;  %vm1088_vm14 = vweird.f32 %v1080_v59 }
 0x567   :  { %v1168_v13 = vadd.f32 %v1165_v39, %v1156_v56 }
 0x568   :  { %v1064_v8 = vpop.f32.mrf.mxu3  ;;  %v1095_v26 = vor.u32 1.1754944e-38, %v1094_v23  ;;  %vm1093_vm6 = vcmp.eq.f32.partialorder %v1092_v25, 8.507059e+37 }
 0x569   :  { %v1070_v3 = vadd.f32 %v1064_v8, %v169_v63 }
 0x56b   :  { %v3164_v12 = vpop.eup %3163  ;;  %v2635_v2 = vmul.f32 -1.442695, %v1070_v3 }
 0x56c   :  { %v3166_v14 = vpop.eup %3165  ;;  %v4009_v18 = vadd.f32 1.0, %v3164_v12 }
 0x56d   :  { %v1084_v21 = vmul.f32 %v3166_v14, %v1080_v59  ;;  %3167 = vpow2.f32 %v2635_v2  ;;  %vm1089_vm8 = vweird.f32 %v3166_v14  ;;  %v1155_v59 = vadd.f32 %v1152_v37, %v1140_v49  ;;  %v2967_v37 = vld [vmem:[%s4559_s7 + $0x58] sm:$0xff]  ;;  %v2964_v49 = vld [vmem:[%s4559_s7 + $0x40] sm:$0xff] }
 0x56e   :  { %3169 = vrcp.f32 %v4009_v18  ;;  %vm1090_vm15 = vmor %vm1088_vm14, %vm1089_vm8  ;;  %v1109_v36 = vand.u32 2147483648, %v4009_v18  ;;  %vm1171_vm14 = vcmp.eq.s32.totalorder %v2637_v17, 3  ;;  %v1107_v48 = vand.u32 2147483647, %v4009_v18  ;;  %1422 = vmatpush.bf16.msra.mxu2 %v2967_v37 }
 0x56f   :  { %v1085_v28 = vsub.f32 1.0, %v1084_v21  ;;  %vm4050_vm8 = vmand %vm1158_vm1, %vm1134_vm5  ;;  %vm1103_vm0 = vweird.f32 %v4009_v18  ;;  %v2638_v2 = vadd.s32 4294967295, %v4083_v51 }
 0x570   :  { %v1066_v22 = vpop.f32.mrf.mxu3  ;;  %vm4079_vm1 = vmand %vm1170_vm11, %vm1134_vm5  ;;  %v1164_v53 = vsel %vm4050_vm8, %v3941_v4, 0.0  ;;  %v1110_v45 = vor.u32 1.1754944e-38, %v1109_v36  ;;  %vm1108_vm12 = vcmp.eq.f32.partialorder %v1107_v48, 8.507059e+37  ;;  %v2966_v36 = vld [vmem:[%s4559_s7 + $0x50] sm:$0xff] }
 0x571   :  { %v1086_v24 = vmul.f32 %v3166_v14, %v1085_v28  ;;  %vm4094_vm9 = vmand %vm1171_vm14, %vm1135_vm7  ;;  %v1167_v3 = vadd.f32 %v1164_v53, %v1155_v59  ;;  %vm1148_vm7 = vcmp.eq.s32.totalorder %v2638_v2, 1  ;;  %vm1133_vm3 = vcmp.eq.s32.totalorder %v2638_v2, 0  ;;  %v1255_v53 = vld [vmem:[%s4562_s10 + $0x3] ss:$0 sm:$0xff] }
 0x572   :  { %vm4114_vm8 = vmand %vm1148_vm7, %vm1136_vm4  ;;  %vm1160_vm11 = vcmp.eq.s32.totalorder %v2638_v2, 2  ;;  %1423 = vmatpush.bf16.msra.mxu2 %v2966_v36  ;;  %v1308_v56 = vadd.f32 %v1307_v40, %v1255_v53  ;;  %vm1496_vm7 = vcmp.gt.s32.totalorder %v4001_v62, 2 }
 0x573   :  { %v3168_v11 = vpop.eup %3167  ;;  %v1087_v0 = vadd.f32 %v3166_v14, %v1086_v24 }
 0x574   :  { %v3170_v33 = vpop.eup %3169  ;;  %v4029_v9 = vadd.f32 1.0, %v3168_v11 }
 0x575   :  { %v1099_v16 = vmul.f32 %v3170_v33, %v4009_v18  ;;  %v1091_v7 = vsel %vm1090_vm15, %v3166_v14, %v1087_v0  ;;  %vm1104_vm15 = vweird.f32 %v3170_v33  ;;  %v1154_v0 = vsel %vm4114_vm8, %v3822_v38, 0.0 }
 0x576   :  { %3171 = vrcp.f32 %v4029_v9  ;;  %v4046_v52 = vsel %vm1093_vm6, %v1095_v26, %v1091_v7  ;;  %vm1105_vm5 = vmor %vm1103_vm0, %vm1104_vm15  ;;  %v1124_v28 = vand.u32 2147483648, %v4029_v9  ;;  %v1122_v22 = vand.u32 2147483647, %v4029_v9 }
 0x577   :  { %v1100_v61 = vsub.f32 1.0, %v1099_v16  ;;  %v1253_v47 = vpack.c.bf16 %v4046_v52, %v3966_v10  ;;  %v1176_v8 = vsel %vm4079_vm1, %v4046_v52, 0.0  ;;  %vm1118_vm6 = vweird.f32 %v4029_v9  ;;  %vm1139_vm15 = vmand %vm1133_vm3, %vm1136_vm4 }
 0x578   :  { %v1179_v18 = vadd.f32 %v1176_v8, %v1167_v3  ;;  %v1125_v29 = vor.u32 1.1754944e-38, %v1124_v28  ;;  %vm1123_vm14 = vcmp.eq.f32.partialorder %v1122_v22, 8.507059e+37  ;;  %vm1172_vm1 = vcmp.eq.s32.totalorder %v2638_v2, 3  ;;  %vm1163_vm0 = vmand %vm1160_vm11, %vm1136_vm4 }
 0x579   :  { %v1101_v41 = vmul.f32 %v3170_v33, %v1100_v61  ;;  %2677 = vmatmul.msk.bf16.gmra.mxu1 %vm570_vm10, %v1253_v47  ;;  %v1142_v31 = vsel %vm1139_vm15, %v3710_v43, 0.0  ;;  %v1309_v61 = vpop.f32.mrf.mxu1  ;;  %vm1467_vm3 = vcmp.gt.s32.totalorder %v4005_v6, 0  ;;  %vm1512_vm8 = vcmp.gt.s32.totalorder %v4005_v6, 3 }
 0x57a   :  { %vm1468_vm11 = vcmp.gt.s32.totalorder %v4083_v51, 0  ;;  %vm1513_vm15 = vcmp.gt.s32.totalorder %v4083_v51, 3 }
 0x57b   :  { %v1102_v5 = vadd.f32 %v3170_v33, %v1101_v41  ;;  %v2965_v41 = vld [vmem:[%s4559_s7 + $0x48] sm:$0xff] }
 0x57c   :  { %v3172_v55 = vpop.eup %3171  ;;  %1424 = vmatpush.bf16.msra.mxu2 %v2965_v41 }
 0x57d   :  { %v1106_v60 = vsel %vm1105_vm5, %v3170_v33, %v1102_v5  ;;  %v1114_v63 = vmul.f32 %v3172_v55, %v4029_v9  ;;  %vm1119_vm2 = vweird.f32 %v3172_v55  ;;  %v1166_v33 = vsel %vm1163_vm0, %v3966_v10, 0.0  ;;  %v1192_v5 = vld [vmem:[%s4562_s10 + $0x2] ss:$0 sm:$0xff] }
 0x57e   :  { %v4102_v12 = vsel %vm1108_vm12, %v1110_v45, %v1106_v60  ;;  %vm1120_vm13 = vmor %vm1118_vm6, %vm1119_vm2  ;;  %v1157_v9 = vadd.f32 %v1154_v0, %v1142_v31  ;;  %v1310_v60 = vadd.f32 %v1309_v61, %v1255_v53  ;;  %vm1466_vm5 = vcmp.gt.s32.totalorder %v4001_v62, 0 }
 0x57f   :  { %v1115_v14 = vsub.f32 1.0, %v1114_v63  ;;  %v1177_v17 = vsel %vm4094_vm9, %v4102_v12, 0.0  ;;  %vm1175_vm9 = vmand %vm1172_vm1, %vm1136_vm4  ;;  %vm1481_vm12 = vcmp.gt.s32.totalorder %v4001_v62, 1  ;;  %vm1511_vm2 = vcmp.gt.s32.totalorder %v4001_v62, 3  ;;  %v2983_v62 = vld [vmem:[%s4558_s6 + $0x74] sm:$0xf0] }
 0x580   :  { %v1180_v21 = vadd.f32 %v1177_v17, %v1168_v13  ;;  %v1169_v32 = vadd.f32 %v1166_v33, %v1157_v9  ;;  %1425 = vmatpush.bf16.msra.mxu2 %v2964_v49  ;;  %vm1482_vm4 = vcmp.gt.s32.totalorder %v4005_v6, 1  ;;  %vm1497_vm6 = vcmp.gt.s32.totalorder %v4005_v6, 2 }
 0x581   :  { %v1116_v46 = vmul.f32 %v3172_v55, %v1115_v14  ;;  %v1312_v27 = vpop.f32.mrf.mxu1 }
 0x582   :  { %v1190_v23 = vpack.c.bf16 %v1180_v21, %v1179_v18 }
 0x583   :  { %v1117_v24 = vadd.f32 %v3172_v55, %v1116_v46 }
 0x584   :  { %2655 = vmatmul.msk.bf16.vlgmr.msra.gmra.mxu0 %vm570_vm10, %v1190_v23  ;;  %v1313_v23 = vadd.f32 %v1312_v27, %v1255_v53 }
 0x585   :  { %v1121_v58 = vsel %vm1120_vm13, %v3172_v55, %v1117_v24  ;;  %vm1483_vm13 = vcmp.gt.s32.totalorder %v4083_v51, 1 }
 0x586   :  { %v4121_v11 = vsel %vm1123_vm14, %v1125_v29, %v1121_v58  ;;  %vm1498_vm14 = vcmp.gt.s32.totalorder %v4083_v51, 2 }
 0x587   :  { %v1254_v30 = vpack.c.bf16 %v4121_v11, %v4102_v12  ;;  %v1178_v26 = vsel %vm1175_vm9, %v4121_v11, 0.0 }
 0x588   :  { %v1181_v16 = vadd.f32 %v1178_v26, %v1169_v32 }
 0x589   :  { %2678 = vmatmul.msk.bf16.gmra.mxu1 %vm570_vm10, %v1254_v30  ;;  %v1314_v47 = vpop.f32.mrf.mxu1 }
 0x58a   :  { %v1191_v7 = vpack.c.bf16 %v1181_v16, %v1181_v16  ;;  %v1315_v24 = vadd.f32 %v1314_v47, %v1255_v53 }
 0x591   :  { %v1317_v19 = vpop.f32.mrf.mxu1 }
 0x592   :  { %v1318_v16 = vadd.f32 %v1317_v19, %v1255_v53 }
 0x594   :  { %2656 = vmatmul.msk.bf16.gmra.mxu0 %vm570_vm10, %v1191_v7 }
 0x599   :  { %v1319_v35 = vpop.f32.mrf.mxu1 }
 0x59a   :  { %v1320_v32 = vadd.f32 %v1319_v35, %v1255_v53 }
 0x5a1   :  { %v1322_v57 = vpop.f32.mrf.mxu1 }
 0x5a2   :  { %v1323_v36 = vadd.f32 %v1322_v57, %v1255_v53 }
 0x5a9   :  { %v1324_v48 = vpop.f32.mrf.mxu1 }
 0x5aa   :  { %v1325_v37 = vadd.f32 %v1324_v48, %v1255_v53 }
 0x5f6   :  { %v1327_v50 = vpop.f32.mrf.mxu1 }
 0x5fe   :  { %v1329_v1 = vpop.f32.mrf.mxu1 }
 0x5ff   :  { %v1330_v19 = vadd.f32 %v1329_v1, %v1255_v53 }
 0x601   :  { %v1232_v39 = vpop.f32.mrf.mxu0 }
 0x602   :  { %v1233_v54 = vadd.f32 %v1232_v39, %v1192_v5 }
 0x604   :  { %v1337_v45 = vadd.f32 %v1308_v56, %v1233_v54  ;;  %v1340_v58 = vadd.f32 %v1315_v24, %v1233_v54  ;;  %v1343_v49 = vadd.f32 %v1323_v36, %v1233_v54 }
 0x606   :  { %v1332_v55 = vpop.f32.mrf.mxu1  ;;  %3173 = vtanh.f32 %v1337_v45  ;;  %v1346_v45 = vadd.f32 %v1330_v19, %v1233_v54 }
 0x607   :  { %v1333_v2 = vadd.f32 %v1332_v55, %v1255_v53  ;;  %v1328_v55 = vadd.f32 %v1327_v50, %v1255_v53 }
 0x609   :  { %v1234_v59 = vpop.f32.mrf.mxu0 }
 0x60a   :  { %v1235_v63 = vadd.f32 %v1234_v59, %v1192_v5 }
 0x60c   :  { %v1338_v8 = vadd.f32 %v1310_v60, %v1235_v63  ;;  %v3174_v17 = vpop.eup %3173  ;;  %v1347_v28 = vadd.f32 %v1333_v2, %v1235_v63  ;;  %v1341_v40 = vadd.f32 %v1318_v16, %v1235_v63  ;;  %v1344_v41 = vadd.f32 %v1325_v37, %v1235_v63  ;;  %v2730_v37 = vld [vmem:[%s4558_s6 + $0x38] sm:$0xf0] }
 0x60e   :  { %3175 = vtanh.f32 %v1338_v8  ;;  %v1334_v3 = vpop.f32.mrf.mxu1 }
 0x60f   :  { %v1335_v18 = vadd.f32 %v1334_v3, %v1255_v53  ;;  %3177 = vtanh.f32 %v1347_v28  ;;  %v4164_v53 = vld [vmem:[%s4562_s10 + $0x4] ss:$0 sm:$0xff] }
 0x611   :  { %v1237_v13 = vpop.f32.mrf.mxu0 }
 0x612   :  { %v1238_v14 = vadd.f32 %v1237_v13, %v1192_v5 }
 0x614   :  { %v3176_v21 = vpop.eup %3175  ;;  %v1348_v46 = vadd.f32 %v1335_v18, %v1238_v14  ;;  %v1339_v25 = vadd.f32 %v1313_v23, %v1238_v14  ;;  %v1342_v7 = vadd.f32 %v1320_v32, %v1238_v14  ;;  %v1345_v56 = vadd.f32 %v1328_v55, %v1238_v14  ;;  %v2974_v32 = vld [vmem:[%s4558_s6 + $0x34] sm:$0xf]  ;;  %v2972_v55 = vld [vmem:[%s4558_s6 + $0x24] sm:$0xf] }
 0x615   :  { %v1369_v22 = vpack.c.bf16 %v3176_v21, %v3174_v17  ;;  %v3178_v30 = vpop.eup %3177 }
 0x616   :  { %3179 = vtanh.f32 %v1348_v46 }
 0x617   :  { %2695 = vmatmul.msk.bf16.vlgmr.msra.gmra.mxu2 %vm570_vm10, %v1369_v22  ;;  %3181 = vtanh.f32 %v1339_v25 }
 0x618   :  { %3183 = vtanh.f32 %v1340_v58 }
 0x619   :  { %v1239_v29 = vpop.f32.mrf.mxu0  ;;  %3185 = vtanh.f32 %v1342_v7 }
 0x61a   :  { %3187 = vtanh.f32 %v1341_v40 }
 0x61b   :  { %3189 = vtanh.f32 %v1344_v41 }
 0x61c   :  { %v3180_v0 = vpop.eup %3179  ;;  %3191 = vtanh.f32 %v1343_v49  ;;  %v2733_v49 = vor.u32 %v2974_v32, %v2730_v37 }
 0x61d   :  { %v1374_v31 = vpack.c.bf16 %v3180_v0, %v3178_v30  ;;  %v3182_v33 = vpop.eup %3181  ;;  %3193 = vtanh.f32 %v1345_v56 }
 0x61e   :  { %v3184_v9 = vpop.eup %3183  ;;  %3195 = vtanh.f32 %v1346_v45  ;;  %1662 = vmatpush.bf16.msrb.mxu0 %v2733_v49  ;;  %v2764_v49 = vld [vmem:[%s4558_s6 + $0x70] sm:$0xf] }
 0x61f   :  { %v1370_v26 = vpack.c.bf16 %v3184_v9, %v3182_v33  ;;  %v3186_v61 = vpop.eup %3185  ;;  %v2728_v9 = vld [vmem:[%s4558_s6 + $0x30] sm:$0xf] }
 0x620   :  { %v3188_v27 = vpop.eup %3187 }
 0x621   :  { %v1371_v47 = vpack.c.bf16 %v3186_v61, %v3188_v27  ;;  %v3190_v39 = vpop.eup %3189 }
 0x622   :  { %v3192_v35 = vpop.eup %3191 }
 0x623   :  { %v1372_v5 = vpack.c.bf16 %v3190_v39, %v3192_v35  ;;  %v3194_v59 = vpop.eup %3193  ;;  %v2720_v35 = vld [vmem:[%s4558_s6 + $0x20] sm:$0xf] }
 0x624   :  { %v3196_v48 = vpop.eup %3195 }
 0x625   :  { %v1373_v60 = vpack.c.bf16 %v3196_v48, %v3194_v59  ;;  %v2712_v59 = vld [vmem:[%s4558_s6 + $0x10] sm:$0xf]  ;;  %v2971_v48 = vld [vmem:[%s4558_s6 + $0x14] sm:$0xf0] }
 0x627   :  { %2696 = vmatmul.msk.bf16.gmra.mxu2 %vm570_vm10, %v1370_v26  ;;  %v2975_v26 = vld [vmem:[%s4558_s6 + $0x34] sm:$0xf0] }
 0x628   :  { %v2729_v61 = vor.u32 %v2975_v26, %v2728_v9 }
 0x62a   :  { %1644 = vmatpush.bf16.msra.mxu3 %v2729_v61 }
 0x637   :  { %2697 = vmatmul.msk.bf16.gmra.mxu2 %vm570_vm10, %v1371_v47 }
 0x647   :  { %2698 = vmatmul.msk.bf16.gmra.mxu2 %vm570_vm10, %v1372_v5  ;;  %v2973_v5 = vld [vmem:[%s4558_s6 + $0x24] sm:$0xf0] }
 0x648   :  { %v2721_v45 = vor.u32 %v2973_v5, %v2720_v35  ;;  %v2756_v35 = vld [vmem:[%s4558_s6 + $0x60] sm:$0xf] }
 0x64a   :  { %1645 = vmatpush.bf16.msra.mxu3 %v2721_v45 }
 0x657   :  { %2699 = vmatmul.msk.bf16.gmra.mxu2 %vm570_vm10, %v1373_v60  ;;  %v2722_v60 = vld [vmem:[%s4558_s6 + $0x28] sm:$0xf0] }
 0x667   :  { %2700 = vmatmul.msk.bf16.gmra.mxu2 %vm570_vm10, %v1374_v31 }
 0x69a   :  { %v1427_v57 = vpop.f32.mrf.mxu2 }
 0x69b   :  { %v1428_v14 = vadd.f32 %v1427_v57, %v4164_v53 }
 0x6a2   :  { %v1429_v63 = vpop.f32.mrf.mxu2 }
 0x6a3   :  { %v1430_v25 = vadd.f32 %v1429_v63, %v4164_v53  ;;  %v2713_v63 = vor.u32 %v2971_v48, %v2712_v59 }
 0x6a5   :  { %1646 = vmatpush.bf16.msra.mxu3 %v2713_v63 }
 0x6aa   :  { %v1432_v8 = vpop.f32.mrf.mxu2 }
 0x6ab   :  { %v4202_v19 = vadd.f32 %v1432_v8, %v4164_v53  ;;  %v2725_v8 = vor.u32 %v2972_v55, %v2722_v60  ;;  %v4273_v55 = vor.u32 %v2983_v62, %v2764_v49 }
 0x6ad   :  { %1663 = vmatpush.bf16.msrb.mxu0 %v2725_v8 }
 0x6b2   :  { %v1434_v3 = vpop.f32.mrf.mxu2 }
 0x6b3   :  { %v1435_v54 = vadd.f32 %v1434_v3, %v4164_v53  ;;  %v2970_v3 = vld [vmem:[%s4558_s6 + $0x14] sm:$0xf] }
 0x6b5   :  { %v1457_v21 = vmax.f32 %v1428_v14, %v1435_v54 }
 0x6ba   :  { %v1437_v13 = vpop.f32.mrf.mxu2 }
 0x6bb   :  { %v1438_v23 = vadd.f32 %v1437_v13, %v4164_v53 }
 0x6bd   :  { %v1458_v33 = vmax.f32 %v1430_v25, %v1438_v23 }
 0x6c2   :  { %v1439_v50 = vpop.f32.mrf.mxu2 }
 0x6c3   :  { %v4190_v39 = vadd.f32 %v1439_v50, %v4164_v53 }
 0x6ca   :  { %v1442_v2 = vpop.f32.mrf.mxu2 }
 0x6cb   :  { %v1443_v18 = vadd.f32 %v1442_v2, %v4164_v53 }
 0x6cd   :  { %v1460_v46 = vmax.f32 %v1457_v21, %v1443_v18  ;;  %v2968_v21 = vld [vmem:[%s4558_s6 + $0x4] sm:$0xf] }
 0x6d2   :  { %v1444_v17 = vpop.f32.mrf.mxu2 }
 0x6d3   :  { %v1445_v29 = vadd.f32 %v1444_v17, %v4164_v53 }
 0x6d5   :  { %v1461_v36 = vmax.f32 %v1458_v33, %v1445_v29 }
 0x6da   :  { %v1447_v1 = vpop.f32.mrf.mxu2 }
 0x6db   :  { %v4214_v57 = vadd.f32 %v1447_v1, %v4164_v53  ;;  %v1459_v1 = vmax.f32 %v4202_v19, %v4190_v39 }
 0x6e2   :  { %v1449_v28 = vpop.f32.mrf.mxu2 }
 0x6e3   :  { %v1450_v22 = vadd.f32 %v1449_v28, %v4164_v53 }
 0x6e5   :  { %v1463_v24 = vmax.f32 %v1460_v46, %v1450_v22 }
 0x6e7   :  { %v1469_v58 = vsub.f32 %v1428_v14, %v1463_v24  ;;  %v1484_v30 = vsub.f32 %v1435_v54, %v1463_v24  ;;  %v1499_v0 = vsub.f32 %v1443_v18, %v1463_v24  ;;  %v1514_v31 = vsub.f32 %v1450_v22, %v1463_v24  ;;  %v2714_v54 = vld [vmem:[%s4558_s6 + $0x18] sm:$0xf0]  ;;  %v2704_v14 = vld [vmem:[%s4558_s6] sm:$0xf]  ;;  %v2969_v18 = vld [vmem:[%s4558_s6 + $0x4] sm:$0xf0] }
 0x6e8   :  { %v2717_v24 = vor.u32 %v2970_v3, %v2714_v54  ;;  %v2705_v32 = vor.u32 %v2969_v18, %v2704_v14 }
 0x6e9   :  { %v1472_v16 = vmul.f32 1.442695, %v1469_v58  ;;  %v1487_v7 = vmul.f32 1.442695, %v1484_v30  ;;  %v1502_v40 = vmul.f32 1.442695, %v1499_v0 }
 0x6ea   :  { %v1517_v27 = vmul.f32 1.442695, %v1514_v31  ;;  %v1452_v47 = vpop.f32.mrf.mxu2  ;;  %v2706_v31 = vld [vmem:[%s4558_s6 + $0x8] sm:$0xf0]  ;;  %1664 = vmatpush.bf16.msrb.mxu0 %v2717_v24  ;;  %1647 = vmatpush.bf16.msra.mxu3 %v2705_v32  ;;  %v2982_v32 = vld [vmem:[%s4558_s6 + $0x74] sm:$0xf] }
 0x6eb   :  { %3197 = vpow2.f32 %v1472_v16  ;;  %v1453_v41 = vadd.f32 %v1452_v47, %v4164_v53 }
 0x6ec   :  { %3199 = vpow2.f32 %v1487_v7 }
 0x6ed   :  { %3201 = vpow2.f32 %v1502_v40  ;;  %v1464_v56 = vmax.f32 %v1461_v36, %v1453_v41 }
 0x6ee   :  { %3203 = vpow2.f32 %v1517_v27  ;;  %v2709_v27 = vor.u32 %v2968_v21, %v2706_v31  ;;  %1731 = vmatpush.bf16.msrb.mxu3 %v4273_v55 }
 0x6ef   :  { %v1470_v13 = vsub.f32 %v1430_v25, %v1464_v56  ;;  %v1485_v50 = vsub.f32 %v1438_v23, %v1464_v56  ;;  %v1500_v2 = vsub.f32 %v1445_v29, %v1464_v56  ;;  %v1515_v17 = vsub.f32 %v1453_v41, %v1464_v56 }
 0x6f0   :  { %v1462_v29 = vmax.f32 %v1459_v1, %v4214_v57  ;;  %1665 = vmatpush.bf16.msrb.mxu0 %v2709_v27 }
 0x6f1   :  { %v3198_v28 = vpop.eup %3197  ;;  %v1474_v46 = vmul.f32 1.442695, %v1470_v13  ;;  %v1489_v22 = vmul.f32 1.442695, %v1485_v50  ;;  %v1504_v23 = vmul.f32 1.442695, %v1500_v2 }
 0x6f2   :  { %v3200_v25 = vpop.eup %3199  ;;  %v4236_v58 = vsel %vm1466_vm5, %v3198_v28, 0.0  ;;  %v1519_v30 = vmul.f32 1.442695, %v1515_v17  ;;  %v1454_v0 = vpop.f32.mrf.mxu2 }
 0x6f3   :  { %v3202_v33 = vpop.eup %3201  ;;  %v4244_v9 = vsel %vm1481_vm12, %v3200_v25, 0.0  ;;  %3205 = vpow2.f32 %v1474_v46  ;;  %v1455_v26 = vadd.f32 %v1454_v0, %v4164_v53 }
 0x6f4   :  { %v3204_v16 = vpop.eup %3203  ;;  %v1526_v7 = vadd.f32 %v4244_v9, %v4236_v58  ;;  %3207 = vpow2.f32 %v1489_v22  ;;  %v4251_v40 = vsel %vm1496_vm7, %v3202_v33, 0.0 }
 0x6f5   :  { %3209 = vpow2.f32 %v1504_v23  ;;  %v1465_v61 = vmax.f32 %v1462_v29, %v1455_v26  ;;  %v4255_v47 = vsel %vm1511_vm2, %v3204_v16, 0.0 }
 0x6f6   :  { %v1529_v53 = vadd.f32 %v1526_v7, %v4251_v40  ;;  %3211 = vpow2.f32 %v1519_v30  ;;  %v2758_v7 = vld [vmem:[%s4558_s6 + $0x68] sm:$0xf0] }
 0x6f7   :  { %v1471_v37 = vsub.f32 %v4202_v19, %v1465_v61  ;;  %v1486_v36 = vsub.f32 %v4190_v39, %v1465_v61  ;;  %v1501_v41 = vsub.f32 %v4214_v57, %v1465_v61  ;;  %v1516_v39 = vsub.f32 %v1455_v26, %v1465_v61  ;;  %v2981_v19 = vld [vmem:[%s4558_s6 + $0x64] sm:$0xf0] }
 0x6f8   :  { %v1532_v5 = vadd.f32 %v1529_v53, %v4255_v47  ;;  %v4282_v8 = vor.u32 %v2981_v19, %v2756_v35 }
 0x6f9   :  { %v3206_v56 = vpop.eup %3205  ;;  %v1476_v45 = vmul.f32 1.442695, %v1471_v37  ;;  %v1491_v59 = vmul.f32 1.442695, %v1486_v36  ;;  %v1506_v63 = vmul.f32 1.442695, %v1501_v41 }
 0x6fa   :  { %v3208_v48 = vpop.eup %3207  ;;  %v1535_v60 = vmax.f32 %v1532_v5, 1e-30  ;;  %v1479_v57 = vsel %vm1467_vm3, %v3206_v56, 0.0  ;;  %v1521_v17 = vmul.f32 1.442695, %v1516_v39  ;;  %1732 = vmatpush.bf16.msrb.mxu3 %v4282_v8 }
 0x6fb   :  { %v3210_v3 = vpop.eup %3209  ;;  %v1494_v13 = vsel %vm1482_vm4, %v3208_v48, 0.0  ;;  %3213 = vpow2.f32 %v1476_v45  ;;  %v2740_v37 = vld [vmem:[%s4558_s6 + $0x40] sm:$0xf]  ;;  %v2977_v36 = vld [vmem:[%s4558_s6 + $0x44] sm:$0xf0] }
 0x6fc   :  { %v3212_v50 = vpop.eup %3211  ;;  %3215 = vrcp.f32 %v1535_v60  ;;  %v1527_v2 = vadd.f32 %v1494_v13, %v1479_v57  ;;  %v1509_v54 = vsel %vm1497_vm6, %v3210_v3, 0.0  ;;  %v4328_v35 = vor.u32 %v2977_v36, %v2740_v37  ;;  %v2750_v48 = vld [vmem:[%s4558_s6 + $0x58] sm:$0xf0] }
 0x6fd   :  { %3217 = vpow2.f32 %v1491_v59  ;;  %v1524_v14 = vsel %vm1512_vm8, %v3212_v50, 0.0  ;;  %v2978_v59 = vld [vmem:[%s4558_s6 + $0x54] sm:$0xf] }
 0x6fe   :  { %v1530_v1 = vadd.f32 %v1527_v2, %v1509_v54  ;;  %3219 = vpow2.f32 %v1506_v63  ;;  %v2753_v2 = vor.u32 %v2978_v59, %v2750_v48 }
 0x6ff   :  { %3221 = vpow2.f32 %v1521_v17 }
 0x700   :  { %v1533_v18 = vadd.f32 %v1530_v1, %v1524_v14 }
 0x701   :  { %v3214_v21 = vpop.eup %3213 }
 0x702   :  { %v3216_v28 = vpop.eup %3215  ;;  %v1536_v46 = vmax.f32 %v1533_v18, 1e-30  ;;  %v1480_v24 = vsel %vm1468_vm11, %v3214_v21, 0.0 }
 0x703   :  { %v3218_v22 = vpop.eup %3217  ;;  %v1541_v23 = vmul.f32 %v3216_v28, %v4236_v58  ;;  %v1550_v6 = vmul.f32 %v3216_v28, %v4244_v9  ;;  %v2748_v58 = vld [vmem:[%s4558_s6 + $0x50] sm:$0xf]  ;;  %v2979_v9 = vld [vmem:[%s4558_s6 + $0x54] sm:$0xf0]  ;;  %v1559_v61 = vmul.f32 %v3216_v28, %v4251_v40  ;;  %v1568_v56 = vmul.f32 %v3216_v28, %v4255_v47 }
 0x704   :  { %v3220_v25 = vpop.eup %3219  ;;  %3223 = vrcp.f32 %v1536_v46  ;;  %v1495_v29 = vsel %vm1483_vm13, %v3218_v22, 0.0  ;;  %v4307_v16 = vor.u32 %v2979_v9, %v2748_v58 }
 0x705   :  { %v3222_v30 = vpop.eup %3221  ;;  %v1544_v0 = vmul.f32 %v1541_v23, %v3658_v42  ;;  %v1553_v31 = vmul.f32 %v1550_v6, %v3778_v44  ;;  %v1510_v33 = vsel %vm1498_vm14, %v3220_v25, 0.0  ;;  %v1528_v26 = vadd.f32 %v1495_v29, %v1480_v24  ;;  %v2766_v42 = vld [vmem:[%s4558_s6 + $0x78] sm:$0xf0]  ;;  %v2980_v44 = vld [vmem:[%s4558_s6 + $0x64] sm:$0xf] }
 0x706   :  { %v1525_v27 = vsel %vm1513_vm15, %v3222_v30, 0.0  ;;  %v4319_v53 = vor.u32 %v2982_v32, %v2766_v42  ;;  %1733 = vmatpush.bf16.msrb.mxu3 %v4307_v16  ;;  %v2761_v19 = vor.u32 %v2980_v44, %v2758_v7  ;;  %v1562_v60 = vmul.f32 %v1559_v61, %v3941_v4  ;;  %v2701_v30 = vld [vmem:[%s4562_s10 + $0x5] ss:$8 sm:$0x3] }
 0x707   :  { %v1531_v51 = vadd.f32 %v1528_v26, %v1510_v33  ;;  %v1556_v49 = vadd.f32 %v1553_v31, %v1544_v0  ;;  %v1571_v17 = vmul.f32 %v1568_v56, %v4046_v52  ;;  %v1591_v31 = vperm.slane %v2701_v30, 1 }
 0x708   :  { %1744 = vmatpush.bf16.msra.mxu0 %v4319_v53  ;;  %v1590_v26 = vperm.slane %v2701_v30, 0 }
 0x709   :  { %v1534_v62 = vadd.f32 %v1531_v51, %v1525_v27  ;;  %v1565_v50 = vadd.f32 %v1562_v60, %v1556_v49 }
 0x70a   :  { %v3224_v41 = vpop.eup %3223  ;;  %1734 = vmatpush.bf16.msrb.mxu3 %v4328_v35 }
 0x70b   :  { %v1542_v5 = vmul.f32 %v3224_v41, %v1479_v57  ;;  %v1551_v40 = vmul.f32 %v3224_v41, %v1494_v13  ;;  %v1560_v39 = vmul.f32 %v3224_v41, %v1509_v54  ;;  %v1537_v45 = vmax.f32 %v1534_v62, 1e-30 }
 0x70c   :  { %v1569_v3 = vmul.f32 %v3224_v41, %v1524_v14  ;;  %1745 = vmatpush.bf16.msra.mxu0 %v2761_v19  ;;  %v1574_v4 = vadd.f32 %v1571_v17, %v1565_v50 }
 0x70d   :  { %v1545_v57 = vmul.f32 %v1542_v5, %v3701_v20  ;;  %v1554_v63 = vmul.f32 %v1551_v40, %v3808_v15  ;;  %3225 = vrcp.f32 %v1537_v45  ;;  %v1563_v47 = vmul.f32 %v1560_v39, %v3955_v34  ;;  %v2976_v20 = vld [vmem:[%s4558_s6 + $0x44] sm:$0xf]  ;;  %v2742_v15 = vld [vmem:[%s4558_s6 + $0x48] sm:$0xf0] }
 0x70e   :  { %v1572_v54 = vmul.f32 %v1569_v3, %v4102_v12  ;;  %v2745_v18 = vor.u32 %v2976_v20, %v2742_v15 }
 0x70f   :  { %v1557_v13 = vadd.f32 %v1554_v63, %v1545_v57 }
 0x710   :  { %1746 = vmatpush.bf16.msra.mxu0 %v2753_v2 }
 0x711   :  { %v1566_v1 = vadd.f32 %v1563_v47, %v1557_v13 }
 0x713   :  { %v1575_v14 = vadd.f32 %v1572_v54, %v1566_v1  ;;  %v3226_v34 = vpop.eup %3225 }
 0x714   :  { %v1543_v28 = vmul.f32 %v3226_v34, %v1480_v24  ;;  %v1552_v46 = vmul.f32 %v3226_v34, %v1495_v29  ;;  %v1561_v22 = vmul.f32 %v3226_v34, %v1510_v33  ;;  %1747 = vmatpush.bf16.msra.mxu0 %v2745_v18  ;;  %v1570_v25 = vmul.f32 %v3226_v34, %v1525_v27 }
 0x715   :  { %v1585_v21 = vpack.c.bf16 %v1575_v14, %v1574_v4 }
 0x716   :  { %v1546_v52 = vmul.f32 %v1543_v28, %v3710_v43  ;;  %v1555_v12 = vmul.f32 %v1552_v46, %v3822_v38  ;;  %v1564_v6 = vmul.f32 %v1561_v22, %v3966_v10  ;;  %v1573_v29 = vmul.f32 %v1570_v25, %v4121_v11 }
 0x717   :  { %2734 = vmatmul.msk.bf16.vlgmr.msra.gmra.mxu3 %vm570_vm10, %v1585_v21  ;;  %2736 = vmatmul.msk.bf16.vlgmr.msrb.gmra.mxu0 %vm570_vm10, %v1585_v21  ;;  %v3307_v10 = vmov 0  }
 0x718   :  { %1814 = vmatpush.bf16.msra.mxu3 %v4273_v55  ;;  %v1558_v23 = vadd.f32 %v1555_v12, %v1546_v52  ;;  %1827 = vmatpush.bf16.msrb.mxu0 %v4319_v53 }
 0x71a   :  { %v1567_v24 = vadd.f32 %v1564_v6, %v1558_v23 }
 0x71c   :  { %1815 = vmatpush.bf16.msra.mxu3 %v4282_v8  ;;  %1828 = vmatpush.bf16.msrb.mxu0 %v2761_v19  ;;  %v1576_v43 = vadd.f32 %v1573_v29, %v1567_v24 }
 0x71e   :  { %v1586_v38 = vpack.c.bf16 %v1576_v43, %v1576_v43 }
 0x720   :  { %1816 = vmatpush.bf16.msra.mxu3 %v4307_v16  ;;  %1829 = vmatpush.bf16.msrb.mxu0 %v2753_v2 }
 0x724   :  { %1817 = vmatpush.bf16.msra.mxu3 %v4328_v35  ;;  %1830 = vmatpush.bf16.msrb.mxu0 %v2745_v18 }
 0x727   :  { %2735 = vmatmul.msk.bf16.gmra.mxu3 %vm570_vm10, %v1586_v38  ;;  %2737 = vmatmul.msk.bf16.gmra.mxu0 %vm570_vm10, %v1586_v38 }
 0x737   :  { %1735 = vmatmul.bf16.vlgmr.msrb.gmra.mxu3 %v3307_v10  ;;  %1748 = vmatmul.bf16.vlgmr.msra.gmra.mxu0 %v3307_v10 }
 0x738   :  { %1897 = vmatpush.bf16.msrb.mxu3 %v4273_v55  ;;  %1910 = vmatpush.bf16.msra.mxu0 %v4319_v53 }
 0x73c   :  { %1898 = vmatpush.bf16.msrb.mxu3 %v4282_v8  ;;  %1911 = vmatpush.bf16.msra.mxu0 %v2761_v19 }
 0x740   :  { %1899 = vmatpush.bf16.msrb.mxu3 %v4307_v16  ;;  %1912 = vmatpush.bf16.msra.mxu0 %v2753_v2 }
 0x744   :  { %1900 = vmatpush.bf16.msrb.mxu3 %v4328_v35  ;;  %1913 = vmatpush.bf16.msra.mxu0 %v2745_v18 }
 0x794   :  { %v1667_v11 = vpop.f32.mrf.mxu0 }
 0x795   :  { %v1668_v35 = vadd.f32 %v1667_v11, %v1591_v31 }
 0x79a   :  { %v1649_v0 = vpop.f32.mrf.mxu3 }
 0x79b   :  { %v1650_v61 = vadd.f32 %v1649_v0, %v1590_v26 }
 0x79c   :  { %v1669_v33 = vpop.f32.mrf.mxu0 }
 0x79d   :  { %v4372_v55 = vadd.f32 %v1669_v33, %v1591_v31 }
 0x7a2   :  { %v1651_v58 = vpop.f32.mrf.mxu3 }
 0x7a3   :  { %v4374_v8 = vadd.f32 %v1651_v58, %v1590_v26 }
 0x7a4   :  { %v1672_v9 = vpop.f32.mrf.mxu0 }
 0x7a5   :  { %v4376_v32 = vadd.f32 %v1672_v9, %v1591_v31 }
 0x7aa   :  { %v1654_v51 = vpop.f32.mrf.mxu3 }
 0x7ab   :  { %v4378_v16 = vadd.f32 %v1654_v51, %v1590_v26 }
 0x7ac   :  { %v1674_v42 = vpop.f32.mrf.mxu0 }
 0x7b2   :  { %v1656_v44 = vpop.f32.mrf.mxu3 }
 0x7b4   :  { %v1749_v7 = vpop.f32.mrf.mxu0 }
 0x7b5   :  { %v1754_v40 = vadd.f32 %v1749_v7, %v1668_v35 }
 0x7b7   :  { %v2771_v13 = vmul.f32 -1.442695, %v1754_v40 }
 0x7ba   :  { %v1736_v27 = vpop.f32.mrf.mxu3 }
 0x7bb   :  { %v1753_v53 = vadd.f32 %v1736_v27, %v1650_v61 }
 0x7bc   :  { %v1751_v37 = vpop.f32.mrf.mxu0 }
 0x7bd   :  { %v2770_v36 = vmul.f32 -1.442695, %v1753_v53 }
 0x7bf   :  { %3227 = vpow2.f32 %v2770_v36 }
 0x7c2   :  { %v1738_v41 = vpop.f32.mrf.mxu3 }
 0x7c5   :  { %v3228_v49 = vpop.eup %3227 }
 0x7c6   :  { %v1761_v62 = vadd.f32 1.0, %v3228_v49 }
 0x7c8   :  { %3229 = vrcp.f32 %v1761_v62  ;;  %v1774_v56 = vand.u32 2147483648, %v1761_v62  ;;  %v1772_v59 = vand.u32 2147483647, %v1761_v62  ;;  %vm1768_vm0 = vweird.f32 %v1761_v62 }
 0x7c9   :  { %3231 = vtanh.f32 %v1754_v40 }
 0x7ca   :  { %v1775_v60 = vor.u32 1.1754944e-38, %v1774_v56  ;;  %vm1773_vm5 = vcmp.eq.f32.partialorder %v1772_v59, 8.507059e+37  ;;  %3233 = vpow2.f32 %v2771_v13  ;;  %v2990_v13 = vld [vmem:[%s4559_s7 + $0x90] sm:$0xff] }
 0x7ce   :  { %v3230_v5 = vpop.eup %3229 }
 0x7cf   :  { %v1764_v39 = vmul.f32 %v3230_v5, %v1761_v62  ;;  %vm1769_vm1 = vweird.f32 %v3230_v5  ;;  %v3232_v63 = vpop.eup %3231 }
 0x7d0   :  { %vm1770_vm9 = vmor %vm1768_vm0, %vm1769_vm1  ;;  %v3234_v50 = vpop.eup %3233 }
 0x7d1   :  { %v1765_v19 = vsub.f32 1.0, %v1764_v39  ;;  %v1762_v2 = vadd.f32 1.0, %v3234_v50  ;;  %v2989_v50 = vld [vmem:[%s4559_s7 + $0x88] sm:$0xff] }
 0x7d3   :  { %v1766_v45 = vmul.f32 %v3230_v5, %v1765_v19  ;;  %3235 = vrcp.f32 %v1762_v2  ;;  %v1789_v18 = vand.u32 2147483648, %v1762_v2  ;;  %vm1783_vm7 = vweird.f32 %v1762_v2 }
 0x7d4   :  { %v1787_v21 = vand.u32 2147483647, %v1762_v2 }
 0x7d5   :  { %v1767_v48 = vadd.f32 %v3230_v5, %v1766_v45  ;;  %v1790_v46 = vor.u32 1.1754944e-38, %v1789_v18 }
 0x7d6   :  { %vm1788_vm3 = vcmp.eq.f32.partialorder %v1787_v21, 8.507059e+37 }
 0x7d7   :  { %v1771_v57 = vsel %vm1770_vm9, %v3230_v5, %v1767_v48 }
 0x7d8   :  { %v1776_v3 = vsel %vm1773_vm5, %v1775_v60, %v1771_v57 }
 0x7d9   :  { %v1795_v47 = vmul.f32 %v3232_v63, %v1776_v3  ;;  %v3236_v17 = vpop.eup %3235  ;;  %v1794_v15 = vmul.f32 0.0, %v1776_v3 }
 0x7da   :  { %v1779_v54 = vmul.f32 %v3236_v17, %v1762_v2  ;;  %vm1784_vm12 = vweird.f32 %v3236_v17  ;;  %v2988_v2 = vld [vmem:[%s4559_s7 + $0x80] sm:$0xff] }
 0x7db   :  { %1797 = vrot.lane.b32.xlu0 %v1795_v47, %s3306_s14  ;;  %vm1785_vm2 = vmor %vm1783_vm7, %vm1784_vm12  ;;  %v2991_v47 = vld [vmem:[%s4559_s7 + $0x98] sm:$0xff] }
 0x7dc   :  { %v1780_v1 = vsub.f32 1.0, %v1779_v54 }
 0x7de   :  { %v1781_v20 = vmul.f32 %v3236_v17, %v1780_v1 }
 0x7e0   :  { %v1782_v34 = vadd.f32 %v3236_v17, %v1781_v20 }
 0x7e2   :  { %v1786_v28 = vsel %vm1785_vm2, %v3236_v17, %v1782_v34 }
 0x7e3   :  { %v1791_v12 = vsel %vm1788_vm3, %v1790_v46, %v1786_v28 }
 0x84d   :  { %v1798_v4 = vpop.permute.xlu0 %1797 }
 0x84e   :  { %v1800_v14 = vadd.f32 %v1798_v4, %v1794_v15 }
 0x850   :  { %3237 = vtanh.f32 %v1800_v14 }
 0x856   :  { %v3238_v52 = vpop.eup %3237 }
 0x857   :  { %v4381_v22 = vmul.f32 %v3238_v52, %v1791_v12 }
 0x859   :  { %v1803_v23 = vpack.c.bf16 %v4381_v22, %v4381_v22 }
 0x85b   :  { %1805 = vrot.lane.b32.xlu1 %v1803_v23, %s3306_s14 }
 0x8cd   :  { %v1806_v6 = vpop.permute.xlu1 %1805 }
 0x8ce   :  { %2772 = vmatmul.msk.bf16.vlgmr.msra.gmra.mxu3 %vm570_vm10, %v1806_v6  ;;  %2773 = vmatmul.msk.bf16.vlgmr.msrb.gmra.mxu0 %vm570_vm10, %v1806_v6 }
 0x8cf   :  { %2066 = vmatpush.bf16.msra.mxu3 %v2991_v47 }
 0x8d3   :  { %2067 = vmatpush.bf16.msra.mxu3 %v2990_v13 }
 0x8d7   :  { %2068 = vmatpush.bf16.msra.mxu3 %v2989_v50 }
 0x8db   :  { %2069 = vmatpush.bf16.msra.mxu3 %v2988_v2 }
 0x94b   :  { %v1832_v25 = vpop.f32.mrf.mxu0 }
 0x94c   :  { %v1837_v31 = vadd.f32 %v1832_v25, %v4372_v55 }
 0x94e   :  { %v2775_v53 = vmul.f32 -1.442695, %v1837_v31 }
 0x951   :  { %v1819_v24 = vpop.f32.mrf.mxu3 }
 0x952   :  { %v1836_v29 = vadd.f32 %v1819_v24, %v4374_v8 }
 0x953   :  { %v1834_v43 = vpop.f32.mrf.mxu0 }
 0x954   :  { %v2774_v38 = vmul.f32 -1.442695, %v1836_v29 }
 0x956   :  { %3239 = vpow2.f32 %v2774_v38 }
 0x959   :  { %v1821_v10 = vpop.f32.mrf.mxu3 }
 0x95c   :  { %v3240_v11 = vpop.eup %3239 }
 0x95d   :  { %v1844_v30 = vadd.f32 1.0, %v3240_v11 }
 0x95f   :  { %3241 = vrcp.f32 %v1844_v30  ;;  %v1857_v58 = vand.u32 2147483648, %v1844_v30  ;;  %v1855_v51 = vand.u32 2147483647, %v1844_v30  ;;  %vm1851_vm6 = vweird.f32 %v1844_v30 }
 0x960   :  { %3243 = vtanh.f32 %v1837_v31 }
 0x961   :  { %v1858_v8 = vor.u32 1.1754944e-38, %v1857_v58  ;;  %vm1856_vm11 = vcmp.eq.f32.partialorder %v1855_v51, 8.507059e+37  ;;  %3245 = vpow2.f32 %v2775_v53 }
 0x965   :  { %v3242_v0 = vpop.eup %3241 }
 0x966   :  { %v1847_v33 = vmul.f32 %v3242_v0, %v1844_v30  ;;  %vm1852_vm4 = vweird.f32 %v3242_v0  ;;  %v3244_v7 = vpop.eup %3243 }
 0x967   :  { %vm1853_vm8 = vmor %vm1851_vm6, %vm1852_vm4  ;;  %v3246_v55 = vpop.eup %3245  ;;  %vm4595_vm6 = vcmask 130048  }
 0x968   :  { %v1848_v26 = vsub.f32 1.0, %v1847_v33  ;;  %v1845_v37 = vadd.f32 1.0, %v3246_v55  ;;  %v2987_v33 = vld [vmem:[%s4559_s7 + $0x78] sm:$0xff] }
 0x969   :  { %2013 = vmatpush.bf16.msrb.mxu1 %v2987_v33 }
 0x96a   :  { %v1849_v9 = vmul.f32 %v3242_v0, %v1848_v26  ;;  %3247 = vrcp.f32 %v1845_v37  ;;  %v1872_v19 = vand.u32 2147483648, %v1845_v37  ;;  %vm1866_vm14 = vweird.f32 %v1845_v37  ;;  %v2986_v26 = vld [vmem:[%s4559_s7 + $0x70] sm:$0xff] }
 0x96b   :  { %v1870_v56 = vand.u32 2147483647, %v1845_v37 }
 0x96c   :  { %v1850_v42 = vadd.f32 %v3242_v0, %v1849_v9  ;;  %v1873_v59 = vor.u32 1.1754944e-38, %v1872_v19 }
 0x96d   :  { %vm1871_vm1 = vcmp.eq.f32.partialorder %v1870_v56, 8.507059e+37  ;;  %2014 = vmatpush.bf16.msrb.mxu1 %v2986_v26  ;;  %v2031_v56 = vld [vmem:[%s4562_s10 + $0x7] ss:$0 sm:$0xff] }
 0x96e   :  { %v1854_v44 = vsel %vm1853_vm8, %v3242_v0, %v1850_v42  ;;  %vm2474_vm8 = vcmask 9216  }
 0x96f   :  { %v1859_v61 = vsel %vm1856_vm11, %v1858_v8, %v1854_v44  ;;  %v2984_v8 = vld [vmem:[%s4559_s7 + $0x60] sm:$0xff] }
 0x970   :  { %v1878_v27 = vmul.f32 %v3244_v7, %v1859_v61  ;;  %v3248_v36 = vpop.eup %3247  ;;  %v1877_v35 = vmul.f32 %v1859_v61, %v1800_v14 }
 0x971   :  { %v1862_v41 = vmul.f32 %v3248_v36, %v1845_v37  ;;  %vm1867_vm13 = vweird.f32 %v3248_v36 }
 0x972   :  { %1880 = vrot.lane.b32.xlu2 %v1878_v27, %s3306_s14  ;;  %vm1868_vm15 = vmor %vm1866_vm14, %vm1867_vm13 }
 0x973   :  { %v1863_v49 = vsub.f32 1.0, %v1862_v41 }
 0x975   :  { %v1864_v62 = vmul.f32 %v3248_v36, %v1863_v49 }
 0x977   :  { %v1865_v39 = vadd.f32 %v3248_v36, %v1864_v62  ;;  %v2995_v62 = vld [vmem:[%s4559_s7 + $0xb8] sm:$0xff] }
 0x978   :  { %2131 = vmatpush.bf16.msrb.mxu0 %v2995_v62 }
 0x979   :  { %v1869_v45 = vsel %vm1868_vm15, %v3248_v36, %v1865_v39  ;;  %v2992_v39 = vld [vmem:[%s4559_s7 + $0xa0] sm:$0xff] }
 0x97a   :  { %v1874_v60 = vsel %vm1871_vm1, %v1873_v59, %v1869_v45  ;;  %v1978_v59 = vld [vmem:[%s4562_s10 + $0x6] ss:$0 sm:$0xff] }
 0x9cc   :  { %v1881_v5 = vpop.permute.xlu2 %1880 }
 0x9cd   :  { %v4391_v40 = vadd.f32 %v1881_v5, %v1877_v35  ;;  %v2994_v5 = vld [vmem:[%s4559_s7 + $0xb0] sm:$0xff] }
 0x9ce   :  { %2132 = vmatpush.bf16.msrb.mxu0 %v2994_v5 }
 0x9cf   :  { %3249 = vtanh.f32 %v4391_v40 }
 0x9d5   :  { %v3250_v48 = vpop.eup %3249 }
 0x9d6   :  { %v1885_v57 = vmul.f32 %v3250_v48, %v1874_v60 }
 0x9d8   :  { %v2030_v63 = vpack.c.bf16 %v1885_v57, %v4381_v22  ;;  %v1886_v3 = vpack.c.bf16 %v1885_v57, %v1885_v57 }
 0x9da   :  { %2033 = vrot.lane.b32.xlu2 %v2030_v63, %s3306_s14  ;;  %1888 = vrot.lane.b32.xlu0 %v1886_v3, %s3306_s14 }
 0x9e2   :  { %2168 = vrot.lane.b32.xlu2 %v1885_v57, %s3306_s14 }
 0xa34   :  { %v2034_v54 = vpop.permute.xlu2 %2033 }
 0xa4c   :  { %v1889_v17 = vpop.permute.xlu0 %1888 }
 0xa4d   :  { %2776 = vmatmul.msk.bf16.vlgmr.msrb.gmra.mxu3 %vm570_vm10, %v1889_v17  ;;  %2777 = vmatmul.msk.bf16.vlgmr.msra.gmra.mxu0 %vm570_vm10, %v1889_v17 }
 0xa5d   :  { %2813 = vmatmul.msk.bf16.vlgmr.msra.gmra.mxu3 %vm570_vm10, %v2034_v54 }
 0xaca   :  { %v1915_v1 = vpop.f32.mrf.mxu0 }
 0xacb   :  { %v1920_v46 = vadd.f32 %v1915_v1, %v4376_v32 }
 0xacd   :  { %v2779_v32 = vmul.f32 -1.442695, %v1920_v46 }
 0xad0   :  { %v1902_v20 = vpop.f32.mrf.mxu3 }
 0xad1   :  { %v1919_v15 = vadd.f32 %v1902_v20, %v4378_v16 }
 0xad2   :  { %v1917_v4 = vpop.f32.mrf.mxu0 }
 0xad3   :  { %v2778_v14 = vmul.f32 -1.442695, %v1919_v15 }
 0xad5   :  { %3251 = vpow2.f32 %v2778_v14 }
 0xad8   :  { %v1904_v34 = vpop.f32.mrf.mxu3 }
 0xadb   :  { %v3252_v18 = vpop.eup %3251 }
 0xadc   :  { %v1927_v21 = vadd.f32 1.0, %v3252_v18  ;;  %v2999_v18 = vld [vmem:[%s4559_s7 + $0xd8] sm:$0xff] }
 0xade   :  { %3253 = vrcp.f32 %v1927_v21  ;;  %v1940_v23 = vand.u32 2147483648, %v1927_v21  ;;  %v1938_v25 = vand.u32 2147483647, %v1927_v21  ;;  %vm1934_vm9 = vweird.f32 %v1927_v21 }
 0xadf   :  { %3255 = vtanh.f32 %v1920_v46  ;;  %v2096_v46 = vld [vmem:[%s4562_s10 + $0x10] ss:$0 sm:$0xff] }
 0xae0   :  { %v1941_v16 = vor.u32 1.1754944e-38, %v1940_v23  ;;  %vm1939_vm12 = vcmp.eq.f32.partialorder %v1938_v25, 8.507059e+37  ;;  %3257 = vpow2.f32 %v2779_v32  ;;  %v2071_v19 = vpop.f32.mrf.mxu3  ;;  %v3004_v32 = vld [vmem:[%s4561_s9] sm:$0xff] }
 0xae1   :  { %v2072_v60 = vadd.f32 %v2071_v19, %v2031_v56 }
 0xae4   :  { %v3254_v28 = vpop.eup %3253 }
 0xae5   :  { %v1930_v52 = vmul.f32 %v3254_v28, %v1927_v21  ;;  %vm1935_vm0 = vweird.f32 %v3254_v28  ;;  %v3256_v43 = vpop.eup %3255 }
 0xae6   :  { %vm1936_vm5 = vmor %vm1934_vm9, %vm1935_vm0  ;;  %v3258_v11 = vpop.eup %3257 }
 0xae7   :  { %v1931_v12 = vsub.f32 1.0, %v1930_v52  ;;  %v1928_v30 = vadd.f32 1.0, %v3258_v11 }
 0xae8   :  { %v2073_v45 = vpop.f32.mrf.mxu3 }
 0xae9   :  { %v1932_v6 = vmul.f32 %v3254_v28, %v1931_v12  ;;  %3259 = vrcp.f32 %v1928_v30  ;;  %v1955_v61 = vand.u32 2147483648, %v1928_v30  ;;  %vm1949_vm2 = vweird.f32 %v1928_v30  ;;  %v2997_v12 = vld [vmem:[%s4559_s7 + $0xc8] sm:$0xff] }
 0xaea   :  { %v1953_v27 = vand.u32 2147483647, %v1928_v30  ;;  %v2074_v57 = vadd.f32 %v2073_v45, %v2031_v56  ;;  %v3007_v45 = vld [vmem:[%s4561_s9 + $0x18] sm:$0xff] }
 0xaeb   :  { %v1933_v24 = vadd.f32 %v3254_v28, %v1932_v6  ;;  %v1956_v55 = vor.u32 1.1754944e-38, %v1955_v61 }
 0xaec   :  { %vm1954_vm4 = vcmp.eq.f32.partialorder %v1953_v27, 8.507059e+37  ;;  %v3001_v27 = vld [vmem:[%s4560_s8 + $0x8] sm:$0xff] }
 0xaed   :  { %v1937_v29 = vsel %vm1936_vm5, %v3254_v28, %v1933_v24  ;;  %v2998_v28 = vld [vmem:[%s4559_s7 + $0xd0] sm:$0xff] }
 0xaee   :  { %v1942_v38 = vsel %vm1939_vm12, %v1941_v16, %v1937_v29  ;;  %v2996_v16 = vld [vmem:[%s4559_s7 + $0xc0] sm:$0xff] }
 0xaef   :  { %v1961_v10 = vmul.f32 %v3256_v43, %v1942_v38  ;;  %v3260_v0 = vpop.eup %3259  ;;  %v1960_v51 = vmul.f32 %v1942_v38, %v4391_v40  ;;  %v2993_v40 = vld [vmem:[%s4559_s7 + $0xa8] sm:$0xff] }
 0xaf0   :  { %v1945_v31 = vmul.f32 %v3260_v0, %v1928_v30  ;;  %vm1950_vm7 = vweird.f32 %v3260_v0  ;;  %2133 = vmatpush.bf16.msrb.mxu0 %v2993_v40 }
 0xaf1   :  { %1963 = vrot.lane.b32.xlu1 %v1961_v10, %s3306_s14  ;;  %vm1951_vm3 = vmor %vm1949_vm2, %vm1950_vm7 }
 0xaf2   :  { %v1946_v58 = vsub.f32 1.0, %v1945_v31 }
 0xaf4   :  { %v1947_v9 = vmul.f32 %v3260_v0, %v1946_v58  ;;  %2134 = vmatpush.bf16.msrb.mxu0 %v2992_v39  ;;  %v2281_v39 = vld [vmem:[%s4552_s0] sm:$0xff] }
 0xaf5   :  { %v2284_v19 = vpack.c.bf16 %v2281_v39, %v2281_v39 }
 0xaf6   :  { %v1948_v7 = vadd.f32 %v3260_v0, %v1947_v9 }
 0xaf8   :  { %v1952_v53 = vsel %vm1951_vm3, %v3260_v0, %v1948_v7 }
 0xaf9   :  { %2161 = vrot.lane.b32.xlu1 %v4381_v22, %s3306_s14  ;;  %v2985_v22 = vld [vmem:[%s4559_s7 + $0x68] sm:$0xff]  ;;  %v1957_v36 = vsel %vm1954_vm4, %v1956_v55, %v1952_v53  ;;  %v2169_v53 = vpop.permute.xlu2 %2168 }
 0xafa   :  { %2015 = vmatpush.bf16.msrb.mxu1 %v2985_v22 }
 0xafe   :  { %2016 = vmatpush.bf16.msrb.mxu1 %v2984_v8 }
 0xb02   :  { %2221 = vmatpush.bf16.msra.mxu1 %v2999_v18 }
 0xb06   :  { %2222 = vmatpush.bf16.msra.mxu1 %v2998_v28 }
 0xb0a   :  { %2223 = vmatpush.bf16.msra.mxu1 %v2997_v12  ;;  %v3009_v12 = vld [vmem:[%s4561_s9 + $0x28] sm:$0xff] }
 0xb0e   :  { %2224 = vmatpush.bf16.msra.mxu1 %v2996_v16 }
 0xb63   :  { %v1964_v42 = vpop.permute.xlu1 %1963 }
 0xb64   :  { %v1966_v44 = vadd.f32 %v1964_v42, %v1960_v51  ;;  %v3003_v51 = vld [vmem:[%s4560_s8 + $0x18] sm:$0xff]  ;;  %v3002_v42 = vld [vmem:[%s4560_s8 + $0x10] sm:$0xff] }
 0xb65   :  { %2272 = vmatpush.bf16.msrb.mxu2 %v3003_v51 }
 0xb66   :  { %3261 = vtanh.f32 %v1966_v44 }
 0xb69   :  { %2273 = vmatpush.bf16.msrb.mxu2 %v3002_v42 }
 0xb6b   :  { %v2162_v55 = vpop.permute.xlu1 %2161 }
 0xb6c   :  { %v3262_v37 = vpop.eup %3261 }
 0xb6d   :  { %v1968_v41 = vmul.f32 %v3262_v37, %v1957_v36  ;;  %2274 = vmatpush.bf16.msrb.mxu2 %v3001_v27 }
 0xb6f   :  { %v1977_v49 = vpack.c.bf16 %v1968_v41, %v1968_v41 }
 0xb71   :  { %1980 = vrot.lane.b32.xlu0 %v1977_v49, %s3306_s14 }
 0xb79   :  { %2175 = vrot.lane.b32.xlu0 %v1968_v41, %s3306_s14 }
 0xbe3   :  { %v1981_v35 = vpop.permute.xlu0 %1980 }
 0xbe4   :  { %2796 = vmatmul.msk.bf16.vlgmr.msrb.gmra.mxu1 %vm570_vm10, %v1981_v35  ;;  %2814 = vmatmul.msk.bf16.gmra.mxu3 %vm570_vm10, %v1981_v35  ;;  %v3000_v35 = vld [vmem:[%s4560_s8] sm:$0xff] }
 0xbe5   :  { %2302 = vmatpush.bf16.msrb.mxu1 %v3004_v32  ;;  %2275 = vmatpush.bf16.msrb.mxu2 %v3000_v35 }
 0xbeb   :  { %v2176_v41 = vpop.permute.xlu0 %2175 }
 0xc61   :  { %v2018_v48 = vpop.f32.mrf.mxu1 }
 0xc62   :  { %v2019_v63 = vadd.f32 %v2018_v48, %v1978_v59  ;;  %v3006_v59 = vld [vmem:[%s4561_s9 + $0x10] sm:$0xff]  ;;  %v3005_v48 = vld [vmem:[%s4561_s9 + $0x8] sm:$0xff] }
 0xc64   :  { %v2080_v3 = vadd.f32 %v2072_v60, %v2019_v63  ;;  %v2081_v47 = vadd.f32 %v2074_v57, %v2019_v63  ;;  %v3018_v60 = vld [vmem:[%s4561_s9 + $0x70] sm:$0xff] }
 0xc65   :  { %v3010_v57 = vld [vmem:[%s4561_s9 + $0x30] sm:$0xff]  ;;  %2429 = vmatpush.bf16.msrb.mxu3 %v3018_v60 }
 0xc66   :  { %3263 = vtanh.f32 %v2080_v3  ;;  %2464 = vmatpush.bf16.msra.mxu0 %v3010_v57  ;;  %v2189_v3 = vld [vmem:[%s4562_s10 + $0x11] ss:$0 sm:$0xff] }
 0xc67   :  { %3265 = vtanh.f32 %v2081_v47  ;;  %v2076_v13 = vpop.f32.mrf.mxu3  ;;  %v3016_v47 = vld [vmem:[%s4561_s9 + $0x60] sm:$0xff] }
 0xc68   :  { %v2077_v54 = vadd.f32 %v2076_v13, %v2031_v56  ;;  %v3008_v56 = vld [vmem:[%s4561_s9 + $0x20] sm:$0xff] }
 0xc69   :  { %v2020_v50 = vpop.f32.mrf.mxu1  ;;  %2350 = vmatpush.bf16.msra.mxu2 %v3008_v56 }
 0xc6a   :  { %v2082_v15 = vadd.f32 %v2077_v54, %v2019_v63  ;;  %v3017_v63 = vld [vmem:[%s4561_s9 + $0x68] sm:$0xff]  ;;  %2465 = vmatpush.bf16.msra.mxu0 %v3009_v12 }
 0xc6b   :  { %2430 = vmatpush.bf16.msrb.mxu3 %v3017_v63 }
 0xc6c   :  { %v3264_v2 = vpop.eup %3263  ;;  %3267 = vtanh.f32 %v2082_v15  ;;  %v3013_v15 = vld [vmem:[%s4561_s9 + $0x48] sm:$0xff] }
 0xc6d   :  { %v3266_v17 = vpop.eup %3265  ;;  %2351 = vmatpush.bf16.msra.mxu2 %v3007_v45 }
 0xc6e   :  { %v2094_v1 = vpack.c.bf16 %v3266_v17, %v3264_v2  ;;  %v3015_v2 = vld [vmem:[%s4561_s9 + $0x58] sm:$0xff] }
 0xc6f   :  { %v2078_v20 = vpop.f32.mrf.mxu3  ;;  %2431 = vmatpush.bf16.msrb.mxu3 %v3016_v47 }
 0xc70   :  { %2831 = vmatmul.msk.bf16.vlgmr.msrb.gmra.mxu0 %vm570_vm10, %v2094_v1  ;;  %v3014_v1 = vld [vmem:[%s4561_s9 + $0x50] sm:$0xff] }
 0xc71   :  { %2352 = vmatpush.bf16.msra.mxu2 %v3006_v59 }
 0xc72   :  { %v3268_v4 = vpop.eup %3267 }
 0xc73   :  { %v2095_v14 = vpack.c.bf16 %v3268_v4, %v3268_v4  ;;  %2432 = vmatpush.bf16.msrb.mxu3 %v3015_v2  ;;  %v2285_v4 = vld [vmem:[%s4562_s10 + $0x13] ss:$0 sm:$0xff] }
 0xc75   :  { %2353 = vmatpush.bf16.msra.mxu2 %v3005_v48 }
 0xc77   :  { %2433 = vmatpush.bf16.msrb.mxu3 %v3014_v1 }
 0xc7b   :  { %2434 = vmatpush.bf16.msrb.mxu3 %v3013_v15 }
 0xc80   :  { %2832 = vmatmul.msk.bf16.gmra.mxu0 %vm570_vm10, %v2095_v14  ;;  %v3012_v14 = vld [vmem:[%s4561_s9 + $0x40] sm:$0xff] }
 0xc81   :  { %2435 = vmatpush.bf16.msrb.mxu3 %v3012_v14 }
 0xced   :  { %v2136_v34 = vpop.f32.mrf.mxu0 }
 0xcee   :  { %v2137_v23 = vadd.f32 %v2136_v34, %v2096_v46 }
 0xcf5   :  { %v2138_v21 = vpop.f32.mrf.mxu0 }
 0xcf6   :  { %v2139_v52 = vadd.f32 %v2138_v21, %v2096_v46 }
 0xcf8   :  { %v2145_v25 = vmax.f32 %v2137_v23, %v2139_v52 }
 0xcfd   :  { %v2141_v6 = vpop.f32.mrf.mxu0 }
 0xcfe   :  { %v2142_v24 = vadd.f32 %v2141_v6, %v2096_v46 }
 0xd00   :  { %v2146_v29 = vmax.f32 %v2145_v25, %v2142_v24 }
 0xd02   :  { %v2147_v43 = vsub.f32 %v2137_v23, %v2146_v29  ;;  %v2150_v38 = vsub.f32 %v2139_v52, %v2146_v29  ;;  %v2153_v10 = vsub.f32 %v2142_v24, %v2146_v29  ;;  %v3011_v52 = vld [vmem:[%s4561_s9 + $0x38] sm:$0xff]  ;;  %v2240_v23 = vld [vmem:[%s4562_s10 + $0x12] ss:$0 sm:$0xff]  ;;  %v2318_v29 = vld [vmem:[%s4562_s10 + $0x14] ss:$0 sm:$0xff] }
 0xd03   :  { %2436 = vmatpush.bf16.msrb.mxu3 %v3011_v52 }
 0xd04   :  { %v2148_v11 = vmul.f32 1.442695, %v2147_v43  ;;  %v2151_v30 = vmul.f32 1.442695, %v2150_v38  ;;  %v2154_v0 = vmul.f32 1.442695, %v2153_v10 }
 0xd05   :  { %v2143_v31 = vpop.f32.mrf.mxu0 }
 0xd06   :  { %3269 = vpow2.f32 %v2148_v11  ;;  %v2471_v31 = vld [vmem:[%s4562_s10 + $0x15] ss:$0 sm:$0xff] }
 0xd07   :  { %3271 = vpow2.f32 %v2151_v30 }
 0xd08   :  { %3273 = vpow2.f32 %v2154_v0 }
 0xd0c   :  { %v3270_v33 = vpop.eup %3269 }
 0xd0d   :  { %v3272_v26 = vpop.eup %3271 }
 0xd0e   :  { %v2156_v58 = vadd.f32 %v3272_v26, %v3270_v33  ;;  %v3274_v22 = vpop.eup %3273 }
 0xd10   :  { %v2157_v9 = vadd.f32 %v3274_v22, %v2156_v58 }
 0xd12   :  { %3275 = vrcp.f32 %v2157_v9 }
 0xd18   :  { %v3276_v8 = vpop.eup %3275 }
 0xd19   :  { %v2159_v44 = vmul.f32 %v3276_v8, %v3270_v33  ;;  %v2166_v7 = vmul.f32 %v3276_v8, %v3272_v26  ;;  %v2173_v61 = vmul.f32 %v3276_v8, %v3274_v22 }
 0xd1b   :  { %v2164_v37 = vmul.f32 %v2162_v55, %v2159_v44  ;;  %v2171_v36 = vmul.f32 %v2169_v53, %v2166_v7  ;;  %v2178_v62 = vmul.f32 %v2176_v41, %v2173_v61 }
 0xd1d   :  { %v2172_v49 = vadd.f32 %v2171_v36, %v2164_v37 }
 0xd1f   :  { %v2179_v5 = vadd.f32 %v2178_v62, %v2172_v49 }
 0xd21   :  { %v2188_v40 = vpack.c.bf16 %v2179_v5, %v2179_v5 }
 0xd23   :  { %2849 = vmatmul.msk.bf16.vlgmr.msra.gmra.mxu1 %vm570_vm10, %v2188_v40 }
 0xd33   :  { %2871 = vmatmul.msk.bf16.vlgmr.msrb.gmra.mxu1 %vm4595_vm6, %v2284_v19 }
 0xda0   :  { %v2226_v13 = vpop.f32.mrf.mxu1 }
 0xda1   :  { %v2227_v50 = vadd.f32 %v2226_v13, %v2189_v3 }
 0xda3   :  { %v2230_v17 = vmax.f32 %v2227_v50, 0.0 }
 0xda5   :  { %v2239_v54 = vpack.c.bf16 %v2230_v17, %v2230_v17 }
 0xda7   :  { %2866 = vmatmul.msk.bf16.vlgmr.msrb.gmra.mxu2 %vm570_vm10, %v2239_v54 }
 0xda8   :  { %v2228_v20 = vpop.f32.mrf.mxu1 }
 0xdb0   :  { %v2304_v34 = vpop.f32.mrf.mxu1 }
 0xdb1   :  { %v2305_v18 = vadd.f32 %v2304_v34, %v2285_v4 }
 0xdb3   :  { %v2308_v21 = vmax.f32 %v2305_v18, 0.0 }
 0xdb5   :  { %v2317_v28 = vpack.c.bf16 %v2308_v21, %v2308_v21 }
 0xdb7   :  { %2888 = vmatmul.msk.bf16.vlgmr.msra.gmra.mxu2 %vm570_vm10, %v2317_v28  ;;  %vm2454_vm10 = vcmask 261120  }
 0xdb8   :  { %v2306_v46 = vpop.f32.mrf.mxu1 }
 0xe2a   :  { %v2277_v6 = vpop.f32.mrf.mxu2 }
 0xe2b   :  { %v2278_v25 = vadd.f32 %v2277_v6, %v2240_v23 }
 0xe2d   :  { %v2380_v24 = vpack.c.bf16 %v2278_v25, %v2278_v25 }
 0xe2f   :  { %2437 = vmatmul.bf16.vlgmr.msrb.gmra.mxu3 %v2380_v24 }
 0xe32   :  { %v2279_v16 = vpop.f32.mrf.mxu2 }
 0xe3a   :  { %v2355_v43 = vpop.f32.mrf.mxu2 }
 0xe3b   :  { %v2356_v38 = vadd.f32 %v2355_v43, %v2318_v29 }
 0xe3d   :  { %v2363_v10 = vpack.c.bf16 %v2356_v38, %v2356_v38 }
 0xe3f   :  { %2929 = vmatmul.msk.bf16.vlgmr.msra.gmra.mxu0 %vm2454_vm10, %v2363_v10 }
 0xe42   :  { %v2357_v32 = vpop.f32.mrf.mxu2 }
 0xeb2   :  { %v2438_v11 = vpop.f32.mrf.mxu3 }
 0xeba   :  { %v2440_v30 = vpop.f32.mrf.mxu3 }
 0xebc   :  { %v2467_v0 = vpop.f32.mrf.mxu0 }
 0xebd   :  { %v2468_v33 = vadd.f32 %v2467_v0, %v2438_v11 }
 0xebf   :  { %v2472_v26 = vadd.f32 %v2471_v31, %v2468_v33 }
 0xec1   :  { %3277 = vtanh.f32 %v2472_v26 }
 0xec4   :  { %v2469_v58 = vpop.f32.mrf.mxu0 }
 0xec7   :  { %v3278_v22 = vpop.eup %3277 }
 0xec8   :  { %2475 = vst.msk [vmem:[#allocation2] sm:$0x3] %vm2474_vm8, %v3278_v22 }
 0xec9   :  { %2486 = dma.vmem_to_hbm [thread:$0]  %s2482_s1, 32, %s2484_s24, [#allocation3]  }
 0xeca   :  { %3303 = dma.done.wait [#allocation3], 32  }
 0xecb   :  { %3304 = vsyncadd [#allocation3], 4294967264 }
 0xecc   :  { %2491 = vsyncpa [#allocation3], 1 }

</bundles_post_ra>
